<compile_context>
chip_gen: v6e
topology: v6e:2x2x1
jax: 0.10.0
libtpu: 0.0.40
codegen_flags: <defaults>
</compile_context>

<pallas_src>
import math
import functools

import numpy as np
import jax
import jax.numpy as jnp
from jax.experimental import pallas as pl
from jax.experimental.pallas import tpu as pltpu

BN_EPS = 1e-5


# ------------------------------------------------------------------ host-side constants

def _dw_shift_matrix(H, W):
    """(HW, 9*HW) 0/1 matrix.  Column tap*HW + dst picks in[dst shifted by
    (di,dj)] with zero padding, so ONE matmul yields all nine shifted images
    of a (C, HW) lane-flattened feature map."""
    HW = H * W
    S = np.zeros((HW, 9 * HW), np.float32)
    for di in (-1, 0, 1):
        for dj in (-1, 0, 1):
            tap = (di + 1) * 3 + (dj + 1)
            for h in range(H):
                for w in range(W):
                    hs, ws = h + di, w + dj
                    if 0 <= hs < H and 0 <= ws < W:
                        S[hs * W + ws, tap * HW + h * W + w] = 1.0
    return S


def _head_mask(C, num_heads):
    idx = np.arange(C) // (C // num_heads)
    return (idx[:, None] == idx[None, :]).astype(np.float32)


# ------------------------------------------------------------------ fused kernel

def _fused_block_kernel(*, T, NL, C, Hd, inv_tau, scale):
    """Returns the kernel body for one batch element (block layout (C, T*NL))."""

    def kernel(x_ref, ps_ref, pb_ref, wqkv_ref, bqkv_ref, hmask_ref,
               shift_ref, wdw_ref, bdw_ref, wproj_ref, bproj_ref,
               ms_ref, mb_ref, w1_ref, b1_ref, w2_ref, b2_ref,
               o_ref, cur_s, spk_s, spk_c, x1_s):

        def lif_stream(cur_fn, dst_ref, rows):
            # Streaming multi-step LIF: only the membrane state and one
            # (rows, NL) current chunk are live; spikes go straight to VMEM.
            v = jnp.zeros((rows, NL), jnp.float32)
            for t in range(T):
                cur = cur_fn(t)
                v = v + (cur - v) * inv_tau
                spk = (v >= 1.0).astype(jnp.float32)
                v = v * (1.0 - spk)
                dst_ref[0:rows, t * NL:(t + 1) * NL] = spk.astype(jnp.bfloat16)

        # ================= attention branch =================
        # proj_bn (folded affine) + proj_lif, streamed
        ps, pb = ps_ref[...], pb_ref[...]
        lif_stream(lambda t: ps * x_ref[0, :, t * NL:(t + 1) * NL] + pb, spk_c, C)

        # stacked q/k/v 1x1 conv (+ folded BN) as one bf16 MXU matmul, then LIFs
        cur_s[0:3 * C, :] = (jnp.dot(wqkv_ref[...], spk_c[...],
                                     preferred_element_type=jnp.float32)
                             + bqkv_ref[...])
        lif_stream(lambda t: cur_s[0:3 * C, t * NL:(t + 1) * NL], spk_s, 3 * C)

        # attention, reordered (no softmax): out_t = scale * ((v_t k_t^T) . mask) q_t
        hmask = hmask_ref[...]
        for t in range(T):
            sl = slice(t * NL, (t + 1) * NL)
            q_t = spk_s[0:C, sl]
            k_t = spk_s[C:2 * C, sl]
            v_t = spk_s[2 * C:3 * C, sl]
            m = jax.lax.dot_general(v_t, k_t, (((1,), (1,)), ((), ())),
                                    preferred_element_type=jnp.float32)
            # integer spike counts <= NL: exact in bf16 for NL <= 256
            m = (m * hmask).astype(jnp.bfloat16)
            cur_s[0:C, sl] = jnp.dot(m, q_t,
                                     preferred_element_type=jnp.float32) * scale

        # depthwise 3x3 conv (+ folded BN) on the time-mean of the v spikes:
        # one matmul against the precomputed (NL, 9*NL) shift matrix.
        v_sum = spk_s[2 * C:3 * C, 0:NL].astype(jnp.float32)
        for t in range(1, T):
            v_sum = v_sum + spk_s[2 * C:3 * C, t * NL:(t + 1) * NL].astype(jnp.float32)
        shifted = jnp.dot(v_sum.astype(jnp.bfloat16), shift_ref[...],
                          preferred_element_type=jnp.float32)           # (C, 9*NL)
        wdw = wdw_ref[...]
        acc = wdw[:, 0:1] * shifted[:, 0:NL]
        for tap in range(1, 9):
            acc = acc + wdw[:, tap:tap + 1] * shifted[:, tap * NL:(tap + 1) * NL]
        v_dw = acc * (1.0 / T) + bdw_ref[...]

        # TODO(synk): attn_lif(x, v_dw) has no public two-argument definition;
        #             v_dw is added to the LIF input current at every step.
        lif_stream(lambda t: cur_s[0:C, t * NL:(t + 1) * NL] + v_dw, spk_c, C)

        # final 1x1 proj conv + residual; x1 stays resident in VMEM.
        x1_s[...] = (x_ref[0]
                     + jnp.dot(wproj_ref[...], spk_c[...],
                               preferred_element_type=jnp.float32)
                     + bproj_ref[...])

        # ================= MLP branch =================
        # fc2_bn affine + fc2_lif, streamed
        ms, mb = ms_ref[...], mb_ref[...]
        lif_stream(lambda t: ms * x1_s[:, t * NL:(t + 1) * NL] + mb, spk_c, C)

        # fc1_conv (+ folded fc1_bn) then fc1_lif
        cur_s[0:Hd, :] = (jnp.dot(w1_ref[...], spk_c[...],
                                  preferred_element_type=jnp.float32)
                          + b1_ref[...])
        lif_stream(lambda t: cur_s[0:Hd, t * NL:(t + 1) * NL], spk_s, Hd)

        # fc2_conv + residual
        o_ref[0] = (x1_s[...]
                    + jnp.dot(w2_ref[...], spk_s[0:Hd, :],
                              preferred_element_type=jnp.float32)
                    + b2_ref[...])

    return kernel


# ------------------------------------------------------------------ params / folding

def _bn_affine(bn):
    s = bn["gamma"] / jnp.sqrt(bn["var"] + BN_EPS)
    return s, bn["beta"] - bn["mean"] * s


def init_bn(key, c):
    k1, k2, k3, k4 = jax.random.split(key, 4)
    return dict(
        gamma=1.0 + 0.1 * jax.random.normal(k1, (c,), jnp.float32),
        beta=0.1 * jax.random.normal(k2, (c,), jnp.float32),
        mean=0.1 * jax.random.normal(k3, (c,), jnp.float32),
        var=1.0 + 0.1 * jnp.abs(jax.random.normal(k4, (c,), jnp.float32)),
    )


def init_conv(key, cout, cin, bias=True):
    k1, k2 = jax.random.split(key)
    w = jax.random.normal(k1, (cout, cin), jnp.float32) / math.sqrt(cin)
    b = (0.05 * jax.random.normal(k2, (cout,), jnp.float32)) if bias \
        else jnp.zeros((cout,), jnp.float32)
    return w, b


def init_params(key, dim, hidden):
    keys = jax.random.split(key, 16)
    p = {}
    # attention
    p["proj_bn"] = init_bn(keys[0], dim)
    p["q_w"], _ = init_conv(keys[1], dim, dim, bias=False)
    p["q_bn"] = init_bn(keys[2], dim)
    p["k_w"], _ = init_conv(keys[3], dim, dim, bias=False)
    p["k_bn"] = init_bn(keys[4], dim)
    p["v_w"], _ = init_conv(keys[5], dim, dim, bias=False)
    p["v_bn"] = init_bn(keys[6], dim)
    p["vdw_w"] = jax.random.normal(keys[7], (dim, 3, 3), jnp.float32) / 3.0
    p["vdw_b"] = 0.05 * jax.random.normal(keys[8], (dim,), jnp.float32)
    p["vdw_bn"] = init_bn(keys[9], dim)
    p["projc_w"], p["projc_b"] = init_conv(keys[10], dim, dim, bias=True)
    # mlp
    p["fc2_bn"] = init_bn(keys[11], dim)
    p["fc1_w"], p["fc1_b"] = init_conv(keys[12], hidden, dim, bias=True)
    p["fc1_bn"] = init_bn(keys[13], hidden)
    p["fc2_w"], p["fc2_b"] = init_conv(keys[14], dim, hidden, bias=True)
    return p


# ------------------------------------------------------------------ forward

def _full_spec(a):
    n = a.ndim
    return pl.BlockSpec(a.shape, lambda b: (0,) * n)


@functools.partial(jax.jit, static_argnames=("num_heads", "hidden", "tau"))
def spiking_transformer_block(x, params, *, num_heads, hidden, tau):
    T, B, C, N = x.shape
    H = int(round(math.sqrt(N)))
    TN = T * N
    Hd = hidden
    R = max(3 * C, Hd)

    # channel-major, lane-dense layout: (B, C, T*N), lane = t*N + n
    xc = jnp.transpose(x, (1, 2, 0, 3)).reshape(B, C, TN)

    # ---- attention params (BN folded; MXU weight operands cast to bf16) ----
    ps, pb = _bn_affine(params["proj_bn"])

    def fold_w(w, bn):                    # 1x1 conv (no bias) followed by BN
        s, sh = _bn_affine(bn)
        return w * s[:, None], sh

    qw, qb = fold_w(params["q_w"], params["q_bn"])
    kw, kb = fold_w(params["k_w"], params["k_bn"])
    vw, vb = fold_w(params["v_w"], params["v_bn"])
    w_qkv = jnp.concatenate([qw, kw, vw], axis=0).astype(jnp.bfloat16)   # (3C, C)
    b_qkv = jnp.concatenate([qb, kb, vb], axis=0)[:, None]               # (3C, 1) f32

    sdw, shdw = _bn_affine(params["vdw_bn"])
    w_dw = (params["vdw_w"] * sdw[:, None, None]).reshape(C, 9)          # (C, 9) f32
    b_dw = (params["vdw_b"] * sdw + shdw)[:, None]                       # (C, 1) f32

    w_proj = params["projc_w"].astype(jnp.bfloat16)
    b_proj = params["projc_b"][:, None]

    # ---- MLP params (fc1_bn folded into fc1_conv) ----
    s2, sh2 = _bn_affine(params["fc2_bn"])
    s1, sh1 = _bn_affine(params["fc1_bn"])
    w1 = (params["fc1_w"] * s1[:, None]).astype(jnp.bfloat16)
    b1 = (params["fc1_b"] * s1 + sh1)[:, None]
    w2 = params["fc2_w"].astype(jnp.bfloat16)
    b2 = params["fc2_b"][:, None]

    # ---- precomputed constants (previously rebuilt in-kernel with iota) ----
    shift = jnp.asarray(_dw_shift_matrix(H, H), jnp.bfloat16)            # (N, 9N)
    hmask = jnp.asarray(_head_mask(C, num_heads), jnp.float32)           # (C, C)

    kernel = _fused_block_kernel(T=T, NL=N, C=C, Hd=Hd,
                                 inv_tau=1.0 / float(tau), scale=0.125)

    args = (xc, ps[:, None], pb[:, None], w_qkv, b_qkv, hmask,
            shift, w_dw, b_dw, w_proj, b_proj,
            s2[:, None], sh2[:, None], w1, b1, w2, b2)
    in_specs = ([pl.BlockSpec((1, C, TN), lambda b: (b, 0, 0))]
                + [_full_spec(a) for a in args[1:]])

    out = pl.pallas_call(
        kernel,
        out_shape=jax.ShapeDtypeStruct((B, C, TN), jnp.float32),
        grid=(B,),
        in_specs=in_specs,
        out_specs=pl.BlockSpec((1, C, TN), lambda b: (b, 0, 0)),
        scratch_shapes=[
            pltpu.VMEM((R, TN), jnp.float32),    # matmul-output currents (qkv / attn / fc1)
            pltpu.VMEM((R, TN), jnp.bfloat16),   # qkv spikes, then fc1 spikes
            pltpu.VMEM((C, TN), jnp.bfloat16),   # proj / attn / fc2 spikes
            pltpu.VMEM((C, TN), jnp.float32),    # x1 = x + attn(x), resident residual
        ],
        # grid=(B,) parallel: megacore sharding on v7x; harmless on v5e/v6e.
        compiler_params=pltpu.CompilerParams(dimension_semantics=("parallel",)),
    )(*args)

    return jnp.transpose(out.reshape(B, C, T, N), (2, 0, 1, 3))


# ------------------------------------------------------------------ main

if __name__ == "__main__":
    T, B, dim, N = 4, 2, 32, 64          # H = W = 8
    num_heads = 4
    mlp_ratio = 4.0
    hidden = int(dim * mlp_ratio)
    tau = 1.5

    key = jax.random.PRNGKey(0)
    k_x, k_p = jax.random.split(key)
    x = jax.random.normal(k_x, (T, B, dim, N), jnp.float32)
    params = init_params(k_p, dim, hidden)

    out = spiking_transformer_block(x, params, num_heads=num_heads,
                                    hidden=hidden, tau=tau)
    out = jax.block_until_ready(out)
    assert out.shape == (T, B, dim, N) and out.dtype == jnp.float32
    assert bool(jnp.all(jnp.isfinite(out)))
    print("KERNEL_OK")
</pallas_src>

<mosaic_0001>
module attributes {stable_mosaic.version = 11 : i64} {
  func.func @kernel(%arg0: i32, %arg1: memref<1x32x256xf32, #tpu.memory_space<vmem>>, %arg2: memref<32x1xf32, #tpu.memory_space<vmem>>, %arg3: memref<32x1xf32, #tpu.memory_space<vmem>>, %arg4: memref<96x32xbf16, #tpu.memory_space<vmem>>, %arg5: memref<96x1xf32, #tpu.memory_space<vmem>>, %arg6: memref<32x32xf32, #tpu.memory_space<vmem>>, %arg7: memref<64x576xbf16, #tpu.memory_space<vmem>>, %arg8: memref<32x9xf32, #tpu.memory_space<vmem>>, %arg9: memref<32x1xf32, #tpu.memory_space<vmem>>, %arg10: memref<32x32xbf16, #tpu.memory_space<vmem>>, %arg11: memref<32x1xf32, #tpu.memory_space<vmem>>, %arg12: memref<32x1xf32, #tpu.memory_space<vmem>>, %arg13: memref<32x1xf32, #tpu.memory_space<vmem>>, %arg14: memref<128x32xbf16, #tpu.memory_space<vmem>>, %arg15: memref<128x1xf32, #tpu.memory_space<vmem>>, %arg16: memref<32x128xbf16, #tpu.memory_space<vmem>>, %arg17: memref<32x1xf32, #tpu.memory_space<vmem>>, %arg18: memref<1x32x256xf32, #tpu.memory_space<vmem>>, %arg19: memref<128x256xf32, #tpu.memory_space<vmem>>, %arg20: memref<128x256xbf16, #tpu.memory_space<vmem>>, %arg21: memref<32x256xbf16, #tpu.memory_space<vmem>>, %arg22: memref<32x256xf32, #tpu.memory_space<vmem>>) attributes {dimension_semantics = [#tpu.dimension_semantics<parallel>], iteration_bounds = array<i64: 2>, scalar_prefetch = 0 : i64, scratch_operands = 4 : i64, tpu.core_type = #tpu.core_type<tc>, window_params = [{transform_indices = @transform_0, window_bounds = array<i64: 1, 32, 256>}, {pipeline_mode = #tpu.pipeline_mode<synchronous>, transform_indices = @transform_1, window_bounds = array<i64: 32, 1>}, {pipeline_mode = #tpu.pipeline_mode<synchronous>, transform_indices = @transform_2, window_bounds = array<i64: 32, 1>}, {pipeline_mode = #tpu.pipeline_mode<synchronous>, transform_indices = @transform_3, window_bounds = array<i64: 96, 32>}, {pipeline_mode = #tpu.pipeline_mode<synchronous>, transform_indices = @transform_4, window_bounds = array<i64: 96, 1>}, {pipeline_mode = #tpu.pipeline_mode<synchronous>, transform_indices = @transform_5, window_bounds = array<i64: 32, 32>}, {pipeline_mode = #tpu.pipeline_mode<synchronous>, transform_indices = @transform_6, window_bounds = array<i64: 64, 576>}, {pipeline_mode = #tpu.pipeline_mode<synchronous>, transform_indices = @transform_7, window_bounds = array<i64: 32, 9>}, {pipeline_mode = #tpu.pipeline_mode<synchronous>, transform_indices = @transform_8, window_bounds = array<i64: 32, 1>}, {pipeline_mode = #tpu.pipeline_mode<synchronous>, transform_indices = @transform_9, window_bounds = array<i64: 32, 32>}, {pipeline_mode = #tpu.pipeline_mode<synchronous>, transform_indices = @transform_10, window_bounds = array<i64: 32, 1>}, {pipeline_mode = #tpu.pipeline_mode<synchronous>, transform_indices = @transform_11, window_bounds = array<i64: 32, 1>}, {pipeline_mode = #tpu.pipeline_mode<synchronous>, transform_indices = @transform_12, window_bounds = array<i64: 32, 1>}, {pipeline_mode = #tpu.pipeline_mode<synchronous>, transform_indices = @transform_13, window_bounds = array<i64: 128, 32>}, {pipeline_mode = #tpu.pipeline_mode<synchronous>, transform_indices = @transform_14, window_bounds = array<i64: 128, 1>}, {pipeline_mode = #tpu.pipeline_mode<synchronous>, transform_indices = @transform_15, window_bounds = array<i64: 32, 128>}, {pipeline_mode = #tpu.pipeline_mode<synchronous>, transform_indices = @transform_16, window_bounds = array<i64: 32, 1>}, {transform_indices = @transform_17, window_bounds = array<i64: 1, 32, 256>}]} {
    %c0 = arith.constant 0 : index
    %c0_0 = arith.constant 0 : index
    %0 = vector.load %arg2[%c0, %c0_0] : memref<32x1xf32, #tpu.memory_space<vmem>>, vector<32x1xf32>
    %c0_1 = arith.constant 0 : index
    %c0_2 = arith.constant 0 : index
    %1 = vector.load %arg3[%c0_1, %c0_2] : memref<32x1xf32, #tpu.memory_space<vmem>>, vector<32x1xf32>
    %cst = arith.constant 0.000000e+00 : f32
    %2 = vector.broadcast %cst : f32 to vector<32x64xf32>
    %c0_3 = arith.constant 0 : index
    %c0_4 = arith.constant 0 : index
    %c0_5 = arith.constant 0 : index
    %3 = vector.load %arg1[%c0_3, %c0_4, %c0_5] : memref<1x32x256xf32, #tpu.memory_space<vmem>>, vector<1x32x64xf32>
    %4 = vector.shape_cast %3 : vector<1x32x64xf32> to vector<32x64xf32>
    %5 = vector.broadcast %0 : vector<32x1xf32> to vector<32x64xf32>
    %6 = arith.mulf %5, %4 : vector<32x64xf32>
    %7 = vector.broadcast %1 : vector<32x1xf32> to vector<32x64xf32>
    %8 = arith.addf %6, %7 : vector<32x64xf32>
    %9 = arith.subf %8, %2 : vector<32x64xf32>
    %cst_6 = arith.constant 0.666666686 : f32
    %10 = vector.broadcast %cst_6 : f32 to vector<32x64xf32>
    %11 = arith.mulf %9, %10 : vector<32x64xf32>
    %12 = arith.addf %2, %11 : vector<32x64xf32>
    %cst_7 = arith.constant 1.000000e+00 : f32
    %13 = vector.broadcast %cst_7 : f32 to vector<32x64xf32>
    %14 = arith.cmpf oge, %12, %13 : vector<32x64xf32>
    %15 = arith.extui %14 : vector<32x64xi1> to vector<32x64xi32>
    %16 = arith.sitofp %15 : vector<32x64xi32> to vector<32x64xf32>
    %cst_8 = arith.constant 1.000000e+00 : f32
    %17 = vector.broadcast %cst_8 : f32 to vector<32x64xf32>
    %18 = arith.subf %17, %16 : vector<32x64xf32>
    %19 = arith.mulf %12, %18 : vector<32x64xf32>
    %20 = arith.truncf %16 : vector<32x64xf32> to vector<32x64xbf16>
    %c0_9 = arith.constant 0 : index
    %c0_10 = arith.constant 0 : index
    %21 = vector.load %arg21[%c0_9, %c0_10] : memref<32x256xbf16, #tpu.memory_space<vmem>>, vector<32x64xbf16>
    tpu.vector_store %arg21[%c0_9, %c0_10], %20 {strides = array<i32>} : memref<32x256xbf16, #tpu.memory_space<vmem>>, vector<32x64xbf16>,
    %c0_11 = arith.constant 0 : index
    %c0_12 = arith.constant 0 : index
    %c64 = arith.constant 64 : index
    %22 = vector.load %arg1[%c0_11, %c0_12, %c64] : memref<1x32x256xf32, #tpu.memory_space<vmem>>, vector<1x32x64xf32>
    %23 = vector.shape_cast %22 : vector<1x32x64xf32> to vector<32x64xf32>
    %24 = vector.broadcast %0 : vector<32x1xf32> to vector<32x64xf32>
    %25 = arith.mulf %24, %23 : vector<32x64xf32>
    %26 = vector.broadcast %1 : vector<32x1xf32> to vector<32x64xf32>
    %27 = arith.addf %25, %26 : vector<32x64xf32>
    %28 = arith.subf %27, %19 : vector<32x64xf32>
    %cst_13 = arith.constant 0.666666686 : f32
    %29 = vector.broadcast %cst_13 : f32 to vector<32x64xf32>
    %30 = arith.mulf %28, %29 : vector<32x64xf32>
    %31 = arith.addf %19, %30 : vector<32x64xf32>
    %cst_14 = arith.constant 1.000000e+00 : f32
    %32 = vector.broadcast %cst_14 : f32 to vector<32x64xf32>
    %33 = arith.cmpf oge, %31, %32 : vector<32x64xf32>
    %34 = arith.extui %33 : vector<32x64xi1> to vector<32x64xi32>
    %35 = arith.sitofp %34 : vector<32x64xi32> to vector<32x64xf32>
    %cst_15 = arith.constant 1.000000e+00 : f32
    %36 = vector.broadcast %cst_15 : f32 to vector<32x64xf32>
    %37 = arith.subf %36, %35 : vector<32x64xf32>
    %38 = arith.mulf %31, %37 : vector<32x64xf32>
    %39 = arith.truncf %35 : vector<32x64xf32> to vector<32x64xbf16>
    %c0_16 = arith.constant 0 : index
    %c64_17 = arith.constant 64 : index
    %40 = vector.load %arg21[%c0_16, %c64_17] : memref<32x256xbf16, #tpu.memory_space<vmem>>, vector<32x64xbf16>
    tpu.vector_store %arg21[%c0_16, %c64_17], %39 {strides = array<i32>} : memref<32x256xbf16, #tpu.memory_space<vmem>>, vector<32x64xbf16>,
    %c0_18 = arith.constant 0 : index
    %c0_19 = arith.constant 0 : index
    %c128 = arith.constant 128 : index
    %41 = vector.load %arg1[%c0_18, %c0_19, %c128] : memref<1x32x256xf32, #tpu.memory_space<vmem>>, vector<1x32x64xf32>
    %42 = vector.shape_cast %41 : vector<1x32x64xf32> to vector<32x64xf32>
    %43 = vector.broadcast %0 : vector<32x1xf32> to vector<32x64xf32>
    %44 = arith.mulf %43, %42 : vector<32x64xf32>
    %45 = vector.broadcast %1 : vector<32x1xf32> to vector<32x64xf32>
    %46 = arith.addf %44, %45 : vector<32x64xf32>
    %47 = arith.subf %46, %38 : vector<32x64xf32>
    %cst_20 = arith.constant 0.666666686 : f32
    %48 = vector.broadcast %cst_20 : f32 to vector<32x64xf32>
    %49 = arith.mulf %47, %48 : vector<32x64xf32>
    %50 = arith.addf %38, %49 : vector<32x64xf32>
    %cst_21 = arith.constant 1.000000e+00 : f32
    %51 = vector.broadcast %cst_21 : f32 to vector<32x64xf32>
    %52 = arith.cmpf oge, %50, %51 : vector<32x64xf32>
    %53 = arith.extui %52 : vector<32x64xi1> to vector<32x64xi32>
    %54 = arith.sitofp %53 : vector<32x64xi32> to vector<32x64xf32>
    %cst_22 = arith.constant 1.000000e+00 : f32
    %55 = vector.broadcast %cst_22 : f32 to vector<32x64xf32>
    %56 = arith.subf %55, %54 : vector<32x64xf32>
    %57 = arith.mulf %50, %56 : vector<32x64xf32>
    %58 = arith.truncf %54 : vector<32x64xf32> to vector<32x64xbf16>
    %c0_23 = arith.constant 0 : index
    %c128_24 = arith.constant 128 : index
    %59 = vector.load %arg21[%c0_23, %c128_24] : memref<32x256xbf16, #tpu.memory_space<vmem>>, vector<32x64xbf16>
    tpu.vector_store %arg21[%c0_23, %c128_24], %58 {strides = array<i32>} : memref<32x256xbf16, #tpu.memory_space<vmem>>, vector<32x64xbf16>,
    %c0_25 = arith.constant 0 : index
    %c0_26 = arith.constant 0 : index
    %c192 = arith.constant 192 : index
    %60 = vector.load %arg1[%c0_25, %c0_26, %c192] : memref<1x32x256xf32, #tpu.memory_space<vmem>>, vector<1x32x64xf32>
    %61 = vector.shape_cast %60 : vector<1x32x64xf32> to vector<32x64xf32>
    %62 = vector.broadcast %0 : vector<32x1xf32> to vector<32x64xf32>
    %63 = arith.mulf %62, %61 : vector<32x64xf32>
    %64 = vector.broadcast %1 : vector<32x1xf32> to vector<32x64xf32>
    %65 = arith.addf %63, %64 : vector<32x64xf32>
    %66 = arith.subf %65, %57 : vector<32x64xf32>
    %cst_27 = arith.constant 0.666666686 : f32
    %67 = vector.broadcast %cst_27 : f32 to vector<32x64xf32>
    %68 = arith.mulf %66, %67 : vector<32x64xf32>
    %69 = arith.addf %57, %68 : vector<32x64xf32>
    %cst_28 = arith.constant 1.000000e+00 : f32
    %70 = vector.broadcast %cst_28 : f32 to vector<32x64xf32>
    %71 = arith.cmpf oge, %69, %70 : vector<32x64xf32>
    %72 = arith.extui %71 : vector<32x64xi1> to vector<32x64xi32>
    %73 = arith.sitofp %72 : vector<32x64xi32> to vector<32x64xf32>
    %74 = arith.truncf %73 : vector<32x64xf32> to vector<32x64xbf16>
    %c0_29 = arith.constant 0 : index
    %c192_30 = arith.constant 192 : index
    %75 = vector.load %arg21[%c0_29, %c192_30] : memref<32x256xbf16, #tpu.memory_space<vmem>>, vector<32x64xbf16>
    tpu.vector_store %arg21[%c0_29, %c192_30], %74 {strides = array<i32>} : memref<32x256xbf16, #tpu.memory_space<vmem>>, vector<32x64xbf16>,
    %c0_31 = arith.constant 0 : index
    %c0_32 = arith.constant 0 : index
    %76 = vector.load %arg4[%c0_31, %c0_32] : memref<96x32xbf16, #tpu.memory_space<vmem>>, vector<96x32xbf16>
    %c0_33 = arith.constant 0 : index
    %c0_34 = arith.constant 0 : index
    %77 = vector.load %arg21[%c0_33, %c0_34] : memref<32x256xbf16, #tpu.memory_space<vmem>>, vector<32x256xbf16>
    %cst_35 = arith.constant dense<0.000000e+00> : vector<96x256xf32>
    %78 = tpu.matmul %76, %77, %cst_35 {dimension_numbers = #tpu.dot_dimension_numbers<[1], [0], [0], [1], [0, 0, 1, 1], [], []>} : vector<96x32xbf16>, vector<32x256xbf16>, vector<96x256xf32> -> vector<96x256xf32>
    %c0_36 = arith.constant 0 : index
    %c0_37 = arith.constant 0 : index
    %79 = vector.load %arg5[%c0_36, %c0_37] : memref<96x1xf32, #tpu.memory_space<vmem>>, vector<96x1xf32>
    %80 = vector.broadcast %79 : vector<96x1xf32> to vector<96x256xf32>
    %81 = arith.addf %78, %80 : vector<96x256xf32>
    %c0_38 = arith.constant 0 : index
    %c0_39 = arith.constant 0 : index
    %82 = vector.load %arg19[%c0_38, %c0_39] : memref<128x256xf32, #tpu.memory_space<vmem>>, vector<96x256xf32>
    tpu.vector_store %arg19[%c0_38, %c0_39], %81 {strides = array<i32>} : memref<128x256xf32, #tpu.memory_space<vmem>>, vector<96x256xf32>,
    %cst_40 = arith.constant 0.000000e+00 : f32
    %83 = vector.broadcast %cst_40 : f32 to vector<96x64xf32>
    %c0_41 = arith.constant 0 : index
    %c0_42 = arith.constant 0 : index
    %84 = vector.load %arg19[%c0_41, %c0_42] : memref<128x256xf32, #tpu.memory_space<vmem>>, vector<96x64xf32>
    %85 = arith.subf %84, %83 : vector<96x64xf32>
    %cst_43 = arith.constant 0.666666686 : f32
    %86 = vector.broadcast %cst_43 : f32 to vector<96x64xf32>
    %87 = arith.mulf %85, %86 : vector<96x64xf32>
    %88 = arith.addf %83, %87 : vector<96x64xf32>
    %cst_44 = arith.constant 1.000000e+00 : f32
    %89 = vector.broadcast %cst_44 : f32 to vector<96x64xf32>
    %90 = arith.cmpf oge, %88, %89 : vector<96x64xf32>
    %91 = arith.extui %90 : vector<96x64xi1> to vector<96x64xi32>
    %92 = arith.sitofp %91 : vector<96x64xi32> to vector<96x64xf32>
    %cst_45 = arith.constant 1.000000e+00 : f32
    %93 = vector.broadcast %cst_45 : f32 to vector<96x64xf32>
    %94 = arith.subf %93, %92 : vector<96x64xf32>
    %95 = arith.mulf %88, %94 : vector<96x64xf32>
    %96 = arith.truncf %92 : vector<96x64xf32> to vector<96x64xbf16>
    %c0_46 = arith.constant 0 : index
    %c0_47 = arith.constant 0 : index
    %97 = vector.load %arg20[%c0_46, %c0_47] : memref<128x256xbf16, #tpu.memory_space<vmem>>, vector<96x64xbf16>
    tpu.vector_store %arg20[%c0_46, %c0_47], %96 {strides = array<i32>} : memref<128x256xbf16, #tpu.memory_space<vmem>>, vector<96x64xbf16>,
    %c0_48 = arith.constant 0 : index
    %c64_49 = arith.constant 64 : index
    %98 = vector.load %arg19[%c0_48, %c64_49] : memref<128x256xf32, #tpu.memory_space<vmem>>, vector<96x64xf32>
    %99 = arith.subf %98, %95 : vector<96x64xf32>
    %cst_50 = arith.constant 0.666666686 : f32
    %100 = vector.broadcast %cst_50 : f32 to vector<96x64xf32>
    %101 = arith.mulf %99, %100 : vector<96x64xf32>
    %102 = arith.addf %95, %101 : vector<96x64xf32>
    %cst_51 = arith.constant 1.000000e+00 : f32
    %103 = vector.broadcast %cst_51 : f32 to vector<96x64xf32>
    %104 = arith.cmpf oge, %102, %103 : vector<96x64xf32>
    %105 = arith.extui %104 : vector<96x64xi1> to vector<96x64xi32>
    %106 = arith.sitofp %105 : vector<96x64xi32> to vector<96x64xf32>
    %cst_52 = arith.constant 1.000000e+00 : f32
    %107 = vector.broadcast %cst_52 : f32 to vector<96x64xf32>
    %108 = arith.subf %107, %106 : vector<96x64xf32>
    %109 = arith.mulf %102, %108 : vector<96x64xf32>
    %110 = arith.truncf %106 : vector<96x64xf32> to vector<96x64xbf16>
    %c0_53 = arith.constant 0 : index
    %c64_54 = arith.constant 64 : index
    %111 = vector.load %arg20[%c0_53, %c64_54] : memref<128x256xbf16, #tpu.memory_space<vmem>>, vector<96x64xbf16>
    tpu.vector_store %arg20[%c0_53, %c64_54], %110 {strides = array<i32>} : memref<128x256xbf16, #tpu.memory_space<vmem>>, vector<96x64xbf16>,
    %c0_55 = arith.constant 0 : index
    %c128_56 = arith.constant 128 : index
    %112 = vector.load %arg19[%c0_55, %c128_56] : memref<128x256xf32, #tpu.memory_space<vmem>>, vector<96x64xf32>
    %113 = arith.subf %112, %109 : vector<96x64xf32>
    %cst_57 = arith.constant 0.666666686 : f32
    %114 = vector.broadcast %cst_57 : f32 to vector<96x64xf32>
    %115 = arith.mulf %113, %114 : vector<96x64xf32>
    %116 = arith.addf %109, %115 : vector<96x64xf32>
    %cst_58 = arith.constant 1.000000e+00 : f32
    %117 = vector.broadcast %cst_58 : f32 to vector<96x64xf32>
    %118 = arith.cmpf oge, %116, %117 : vector<96x64xf32>
    %119 = arith.extui %118 : vector<96x64xi1> to vector<96x64xi32>
    %120 = arith.sitofp %119 : vector<96x64xi32> to vector<96x64xf32>
    %cst_59 = arith.constant 1.000000e+00 : f32
    %121 = vector.broadcast %cst_59 : f32 to vector<96x64xf32>
    %122 = arith.subf %121, %120 : vector<96x64xf32>
    %123 = arith.mulf %116, %122 : vector<96x64xf32>
    %124 = arith.truncf %120 : vector<96x64xf32> to vector<96x64xbf16>
    %c0_60 = arith.constant 0 : index
    %c128_61 = arith.constant 128 : index
    %125 = vector.load %arg20[%c0_60, %c128_61] : memref<128x256xbf16, #tpu.memory_space<vmem>>, vector<96x64xbf16>
    tpu.vector_store %arg20[%c0_60, %c128_61], %124 {strides = array<i32>} : memref<128x256xbf16, #tpu.memory_space<vmem>>, vector<96x64xbf16>,
    %c0_62 = arith.constant 0 : index
    %c192_63 = arith.constant 192 : index
    %126 = vector.load %arg19[%c0_62, %c192_63] : memref<128x256xf32, #tpu.memory_space<vmem>>, vector<96x64xf32>
    %127 = arith.subf %126, %123 : vector<96x64xf32>
    %cst_64 = arith.constant 0.666666686 : f32
    %128 = vector.broadcast %cst_64 : f32 to vector<96x64xf32>
    %129 = arith.mulf %127, %128 : vector<96x64xf32>
    %130 = arith.addf %123, %129 : vector<96x64xf32>
    %cst_65 = arith.constant 1.000000e+00 : f32
    %131 = vector.broadcast %cst_65 : f32 to vector<96x64xf32>
    %132 = arith.cmpf oge, %130, %131 : vector<96x64xf32>
    %133 = arith.extui %132 : vector<96x64xi1> to vector<96x64xi32>
    %134 = arith.sitofp %133 : vector<96x64xi32> to vector<96x64xf32>
    %135 = arith.truncf %134 : vector<96x64xf32> to vector<96x64xbf16>
    %c0_66 = arith.constant 0 : index
    %c192_67 = arith.constant 192 : index
    %136 = vector.load %arg20[%c0_66, %c192_67] : memref<128x256xbf16, #tpu.memory_space<vmem>>, vector<96x64xbf16>
    tpu.vector_store %arg20[%c0_66, %c192_67], %135 {strides = array<i32>} : memref<128x256xbf16, #tpu.memory_space<vmem>>, vector<96x64xbf16>,
    %c0_68 = arith.constant 0 : index
    %c0_69 = arith.constant 0 : index
    %137 = vector.load %arg6[%c0_68, %c0_69] : memref<32x32xf32, #tpu.memory_space<vmem>>, vector<32x32xf32>
    %c0_70 = arith.constant 0 : index
    %c0_71 = arith.constant 0 : index
    %138 = vector.load %arg20[%c0_70, %c0_71] : memref<128x256xbf16, #tpu.memory_space<vmem>>, vector<32x64xbf16>
    %c32 = arith.constant 32 : index
    %c0_72 = arith.constant 0 : index
    %139 = vector.load %arg20[%c32, %c0_72] : memref<128x256xbf16, #tpu.memory_space<vmem>>, vector<32x64xbf16>
    %c64_73 = arith.constant 64 : index
    %c0_74 = arith.constant 0 : index
    %140 = vector.load %arg20[%c64_73, %c0_74] : memref<128x256xbf16, #tpu.memory_space<vmem>>, vector<32x64xbf16>
    %cst_75 = arith.constant dense<0.000000e+00> : vector<32x32xf32>
    %141 = tpu.matmul %140, %139, %cst_75 {dimension_numbers = #tpu.dot_dimension_numbers<[1], [1], [0], [0], [0, 0, 1, 0], [], []>} : vector<32x64xbf16>, vector<32x64xbf16>, vector<32x32xf32> -> vector<32x32xf32>
    %142 = arith.mulf %141, %137 : vector<32x32xf32>
    %143 = arith.truncf %142 : vector<32x32xf32> to vector<32x32xbf16>
    %cst_76 = arith.constant dense<0.000000e+00> : vector<32x64xf32>
    %144 = tpu.matmul %143, %138, %cst_76 {dimension_numbers = #tpu.dot_dimension_numbers<[1], [0], [0], [1], [0, 0, 1, 1], [], []>} : vector<32x32xbf16>, vector<32x64xbf16>, vector<32x64xf32> -> vector<32x64xf32>
    %cst_77 = arith.constant 1.250000e-01 : f32
    %145 = vector.broadcast %cst_77 : f32 to vector<32x64xf32>
    %146 = arith.mulf %144, %145 : vector<32x64xf32>
    %c0_78 = arith.constant 0 : index
    %c0_79 = arith.constant 0 : index
    %147 = vector.load %arg19[%c0_78, %c0_79] : memref<128x256xf32, #tpu.memory_space<vmem>>, vector<32x64xf32>
    tpu.vector_store %arg19[%c0_78, %c0_79], %146 {strides = array<i32>} : memref<128x256xf32, #tpu.memory_space<vmem>>, vector<32x64xf32>,
    %c0_80 = arith.constant 0 : index
    %c64_81 = arith.constant 64 : index
    %148 = vector.load %arg20[%c0_80, %c64_81] : memref<128x256xbf16, #tpu.memory_space<vmem>>, vector<32x64xbf16>
    %c32_82 = arith.constant 32 : index
    %c64_83 = arith.constant 64 : index
    %149 = vector.load %arg20[%c32_82, %c64_83] : memref<128x256xbf16, #tpu.memory_space<vmem>>, vector<32x64xbf16>
    %c64_84 = arith.constant 64 : index
    %c64_85 = arith.constant 64 : index
    %150 = vector.load %arg20[%c64_84, %c64_85] : memref<128x256xbf16, #tpu.memory_space<vmem>>, vector<32x64xbf16>
    %cst_86 = arith.constant dense<0.000000e+00> : vector<32x32xf32>
    %151 = tpu.matmul %150, %149, %cst_86 {dimension_numbers = #tpu.dot_dimension_numbers<[1], [1], [0], [0], [0, 0, 1, 0], [], []>} : vector<32x64xbf16>, vector<32x64xbf16>, vector<32x32xf32> -> vector<32x32xf32>
    %152 = arith.mulf %151, %137 : vector<32x32xf32>
    %153 = arith.truncf %152 : vector<32x32xf32> to vector<32x32xbf16>
    %cst_87 = arith.constant dense<0.000000e+00> : vector<32x64xf32>
    %154 = tpu.matmul %153, %148, %cst_87 {dimension_numbers = #tpu.dot_dimension_numbers<[1], [0], [0], [1], [0, 0, 1, 1], [], []>} : vector<32x32xbf16>, vector<32x64xbf16>, vector<32x64xf32> -> vector<32x64xf32>
    %cst_88 = arith.constant 1.250000e-01 : f32
    %155 = vector.broadcast %cst_88 : f32 to vector<32x64xf32>
    %156 = arith.mulf %154, %155 : vector<32x64xf32>
    %c0_89 = arith.constant 0 : index
    %c64_90 = arith.constant 64 : index
    %157 = vector.load %arg19[%c0_89, %c64_90] : memref<128x256xf32, #tpu.memory_space<vmem>>, vector<32x64xf32>
    tpu.vector_store %arg19[%c0_89, %c64_90], %156 {strides = array<i32>} : memref<128x256xf32, #tpu.memory_space<vmem>>, vector<32x64xf32>,
    %c0_91 = arith.constant 0 : index
    %c128_92 = arith.constant 128 : index
    %158 = vector.load %arg20[%c0_91, %c128_92] : memref<128x256xbf16, #tpu.memory_space<vmem>>, vector<32x64xbf16>
    %c32_93 = arith.constant 32 : index
    %c128_94 = arith.constant 128 : index
    %159 = vector.load %arg20[%c32_93, %c128_94] : memref<128x256xbf16, #tpu.memory_space<vmem>>, vector<32x64xbf16>
    %c64_95 = arith.constant 64 : index
    %c128_96 = arith.constant 128 : index
    %160 = vector.load %arg20[%c64_95, %c128_96] : memref<128x256xbf16, #tpu.memory_space<vmem>>, vector<32x64xbf16>
    %cst_97 = arith.constant dense<0.000000e+00> : vector<32x32xf32>
    %161 = tpu.matmul %160, %159, %cst_97 {dimension_numbers = #tpu.dot_dimension_numbers<[1], [1], [0], [0], [0, 0, 1, 0], [], []>} : vector<32x64xbf16>, vector<32x64xbf16>, vector<32x32xf32> -> vector<32x32xf32>
    %162 = arith.mulf %161, %137 : vector<32x32xf32>
    %163 = arith.truncf %162 : vector<32x32xf32> to vector<32x32xbf16>
    %cst_98 = arith.constant dense<0.000000e+00> : vector<32x64xf32>
    %164 = tpu.matmul %163, %158, %cst_98 {dimension_numbers = #tpu.dot_dimension_numbers<[1], [0], [0], [1], [0, 0, 1, 1], [], []>} : vector<32x32xbf16>, vector<32x64xbf16>, vector<32x64xf32> -> vector<32x64xf32>
    %cst_99 = arith.constant 1.250000e-01 : f32
    %165 = vector.broadcast %cst_99 : f32 to vector<32x64xf32>
    %166 = arith.mulf %164, %165 : vector<32x64xf32>
    %c0_100 = arith.constant 0 : index
    %c128_101 = arith.constant 128 : index
    %167 = vector.load %arg19[%c0_100, %c128_101] : memref<128x256xf32, #tpu.memory_space<vmem>>, vector<32x64xf32>
    tpu.vector_store %arg19[%c0_100, %c128_101], %166 {strides = array<i32>} : memref<128x256xf32, #tpu.memory_space<vmem>>, vector<32x64xf32>,
    %c0_102 = arith.constant 0 : index
    %c192_103 = arith.constant 192 : index
    %168 = vector.load %arg20[%c0_102, %c192_103] : memref<128x256xbf16, #tpu.memory_space<vmem>>, vector<32x64xbf16>
    %c32_104 = arith.constant 32 : index
    %c192_105 = arith.constant 192 : index
    %169 = vector.load %arg20[%c32_104, %c192_105] : memref<128x256xbf16, #tpu.memory_space<vmem>>, vector<32x64xbf16>
    %c64_106 = arith.constant 64 : index
    %c192_107 = arith.constant 192 : index
    %170 = vector.load %arg20[%c64_106, %c192_107] : memref<128x256xbf16, #tpu.memory_space<vmem>>, vector<32x64xbf16>
    %cst_108 = arith.constant dense<0.000000e+00> : vector<32x32xf32>
    %171 = tpu.matmul %170, %169, %cst_108 {dimension_numbers = #tpu.dot_dimension_numbers<[1], [1], [0], [0], [0, 0, 1, 0], [], []>} : vector<32x64xbf16>, vector<32x64xbf16>, vector<32x32xf32> -> vector<32x32xf32>
    %172 = arith.mulf %171, %137 : vector<32x32xf32>
    %173 = arith.truncf %172 : vector<32x32xf32> to vector<32x32xbf16>
    %cst_109 = arith.constant dense<0.000000e+00> : vector<32x64xf32>
    %174 = tpu.matmul %173, %168, %cst_109 {dimension_numbers = #tpu.dot_dimension_numbers<[1], [0], [0], [1], [0, 0, 1, 1], [], []>} : vector<32x32xbf16>, vector<32x64xbf16>, vector<32x64xf32> -> vector<32x64xf32>
    %cst_110 = arith.constant 1.250000e-01 : f32
    %175 = vector.broadcast %cst_110 : f32 to vector<32x64xf32>
    %176 = arith.mulf %174, %175 : vector<32x64xf32>
    %c0_111 = arith.constant 0 : index
    %c192_112 = arith.constant 192 : index
    %177 = vector.load %arg19[%c0_111, %c192_112] : memref<128x256xf32, #tpu.memory_space<vmem>>, vector<32x64xf32>
    tpu.vector_store %arg19[%c0_111, %c192_112], %176 {strides = array<i32>} : memref<128x256xf32, #tpu.memory_space<vmem>>, vector<32x64xf32>,
    %c64_113 = arith.constant 64 : index
    %c0_114 = arith.constant 0 : index
    %178 = vector.load %arg20[%c64_113, %c0_114] : memref<128x256xbf16, #tpu.memory_space<vmem>>, vector<32x64xbf16>
    %179 = arith.extf %178 : vector<32x64xbf16> to vector<32x64xf32>
    %c64_115 = arith.constant 64 : index
    %c64_116 = arith.constant 64 : index
    %180 = vector.load %arg20[%c64_115, %c64_116] : memref<128x256xbf16, #tpu.memory_space<vmem>>, vector<32x64xbf16>
    %181 = arith.extf %180 : vector<32x64xbf16> to vector<32x64xf32>
    %182 = arith.addf %179, %181 : vector<32x64xf32>
    %c64_117 = arith.constant 64 : index
    %c128_118 = arith.constant 128 : index
    %183 = vector.load %arg20[%c64_117, %c128_118] : memref<128x256xbf16, #tpu.memory_space<vmem>>, vector<32x64xbf16>
    %184 = arith.extf %183 : vector<32x64xbf16> to vector<32x64xf32>
    %185 = arith.addf %182, %184 : vector<32x64xf32>
    %c64_119 = arith.constant 64 : index
    %c192_120 = arith.constant 192 : index
    %186 = vector.load %arg20[%c64_119, %c192_120] : memref<128x256xbf16, #tpu.memory_space<vmem>>, vector<32x64xbf16>
    %187 = arith.extf %186 : vector<32x64xbf16> to vector<32x64xf32>
    %188 = arith.addf %185, %187 : vector<32x64xf32>
    %189 = arith.truncf %188 : vector<32x64xf32> to vector<32x64xbf16>
    %c0_121 = arith.constant 0 : index
    %c0_122 = arith.constant 0 : index
    %190 = vector.load %arg7[%c0_121, %c0_122] : memref<64x576xbf16, #tpu.memory_space<vmem>>, vector<64x576xbf16>
    %cst_123 = arith.constant dense<0.000000e+00> : vector<32x576xf32>
    %191 = tpu.matmul %189, %190, %cst_123 {dimension_numbers = #tpu.dot_dimension_numbers<[1], [0], [0], [1], [0, 0, 1, 1], [], []>} : vector<32x64xbf16>, vector<64x576xbf16>, vector<32x576xf32> -> vector<32x576xf32>
    %c0_124 = arith.constant 0 : index
    %c0_125 = arith.constant 0 : index
    %192 = vector.load %arg8[%c0_124, %c0_125] : memref<32x9xf32, #tpu.memory_space<vmem>>, vector<32x9xf32>
    %193 = vector.extract_strided_slice %192 {offsets = [0, 0], sizes = [32, 1], strides = [1, 1]} : vector<32x9xf32> to vector<32x1xf32>
    %194 = vector.extract_strided_slice %191 {offsets = [0, 0], sizes = [32, 64], strides = [1, 1]} : vector<32x576xf32> to vector<32x64xf32>
    %195 = vector.broadcast %193 : vector<32x1xf32> to vector<32x64xf32>
    %196 = arith.mulf %195, %194 : vector<32x64xf32>
    %197 = vector.extract_strided_slice %192 {offsets = [0, 1], sizes = [32, 1], strides = [1, 1]} : vector<32x9xf32> to vector<32x1xf32>
    %198 = vector.extract_strided_slice %191 {offsets = [0, 64], sizes = [32, 64], strides = [1, 1]} : vector<32x576xf32> to vector<32x64xf32>
    %199 = vector.broadcast %197 : vector<32x1xf32> to vector<32x64xf32>
    %200 = arith.mulf %199, %198 : vector<32x64xf32>
    %201 = arith.addf %196, %200 : vector<32x64xf32>
    %202 = vector.extract_strided_slice %192 {offsets = [0, 2], sizes = [32, 1], strides = [1, 1]} : vector<32x9xf32> to vector<32x1xf32>
    %203 = vector.extract_strided_slice %191 {offsets = [0, 128], sizes = [32, 64], strides = [1, 1]} : vector<32x576xf32> to vector<32x64xf32>
    %204 = vector.broadcast %202 : vector<32x1xf32> to vector<32x64xf32>
    %205 = arith.mulf %204, %203 : vector<32x64xf32>
    %206 = arith.addf %201, %205 : vector<32x64xf32>
    %207 = vector.extract_strided_slice %192 {offsets = [0, 3], sizes = [32, 1], strides = [1, 1]} : vector<32x9xf32> to vector<32x1xf32>
    %208 = vector.extract_strided_slice %191 {offsets = [0, 192], sizes = [32, 64], strides = [1, 1]} : vector<32x576xf32> to vector<32x64xf32>
    %209 = vector.broadcast %207 : vector<32x1xf32> to vector<32x64xf32>
    %210 = arith.mulf %209, %208 : vector<32x64xf32>
    %211 = arith.addf %206, %210 : vector<32x64xf32>
    %212 = vector.extract_strided_slice %192 {offsets = [0, 4], sizes = [32, 1], strides = [1, 1]} : vector<32x9xf32> to vector<32x1xf32>
    %213 = vector.extract_strided_slice %191 {offsets = [0, 256], sizes = [32, 64], strides = [1, 1]} : vector<32x576xf32> to vector<32x64xf32>
    %214 = vector.broadcast %212 : vector<32x1xf32> to vector<32x64xf32>
    %215 = arith.mulf %214, %213 : vector<32x64xf32>
    %216 = arith.addf %211, %215 : vector<32x64xf32>
    %217 = vector.extract_strided_slice %192 {offsets = [0, 5], sizes = [32, 1], strides = [1, 1]} : vector<32x9xf32> to vector<32x1xf32>
    %218 = vector.extract_strided_slice %191 {offsets = [0, 320], sizes = [32, 64], strides = [1, 1]} : vector<32x576xf32> to vector<32x64xf32>
    %219 = vector.broadcast %217 : vector<32x1xf32> to vector<32x64xf32>
    %220 = arith.mulf %219, %218 : vector<32x64xf32>
    %221 = arith.addf %216, %220 : vector<32x64xf32>
    %222 = vector.extract_strided_slice %192 {offsets = [0, 6], sizes = [32, 1], strides = [1, 1]} : vector<32x9xf32> to vector<32x1xf32>
    %223 = vector.extract_strided_slice %191 {offsets = [0, 384], sizes = [32, 64], strides = [1, 1]} : vector<32x576xf32> to vector<32x64xf32>
    %224 = vector.broadcast %222 : vector<32x1xf32> to vector<32x64xf32>
    %225 = arith.mulf %224, %223 : vector<32x64xf32>
    %226 = arith.addf %221, %225 : vector<32x64xf32>
    %227 = vector.extract_strided_slice %192 {offsets = [0, 7], sizes = [32, 1], strides = [1, 1]} : vector<32x9xf32> to vector<32x1xf32>
    %228 = vector.extract_strided_slice %191 {offsets = [0, 448], sizes = [32, 64], strides = [1, 1]} : vector<32x576xf32> to vector<32x64xf32>
    %229 = vector.broadcast %227 : vector<32x1xf32> to vector<32x64xf32>
    %230 = arith.mulf %229, %228 : vector<32x64xf32>
    %231 = arith.addf %226, %230 : vector<32x64xf32>
    %232 = vector.extract_strided_slice %192 {offsets = [0, 8], sizes = [32, 1], strides = [1, 1]} : vector<32x9xf32> to vector<32x1xf32>
    %233 = vector.extract_strided_slice %191 {offsets = [0, 512], sizes = [32, 64], strides = [1, 1]} : vector<32x576xf32> to vector<32x64xf32>
    %234 = vector.broadcast %232 : vector<32x1xf32> to vector<32x64xf32>
    %235 = arith.mulf %234, %233 : vector<32x64xf32>
    %236 = arith.addf %231, %235 : vector<32x64xf32>
    %cst_126 = arith.constant 2.500000e-01 : f32
    %237 = vector.broadcast %cst_126 : f32 to vector<32x64xf32>
    %238 = arith.mulf %236, %237 : vector<32x64xf32>
    %c0_127 = arith.constant 0 : index
    %c0_128 = arith.constant 0 : index
    %239 = vector.load %arg9[%c0_127, %c0_128] : memref<32x1xf32, #tpu.memory_space<vmem>>, vector<32x1xf32>
    %240 = vector.broadcast %239 : vector<32x1xf32> to vector<32x64xf32>
    %241 = arith.addf %238, %240 : vector<32x64xf32>
    %cst_129 = arith.constant 0.000000e+00 : f32
    %242 = vector.broadcast %cst_129 : f32 to vector<32x64xf32>
    %c0_130 = arith.constant 0 : index
    %c0_131 = arith.constant 0 : index
    %243 = vector.load %arg19[%c0_130, %c0_131] : memref<128x256xf32, #tpu.memory_space<vmem>>, vector<32x64xf32>
    %244 = arith.addf %243, %241 : vector<32x64xf32>
    %245 = arith.subf %244, %242 : vector<32x64xf32>
    %cst_132 = arith.constant 0.666666686 : f32
    %246 = vector.broadcast %cst_132 : f32 to vector<32x64xf32>
    %247 = arith.mulf %245, %246 : vector<32x64xf32>
    %248 = arith.addf %242, %247 : vector<32x64xf32>
    %cst_133 = arith.constant 1.000000e+00 : f32
    %249 = vector.broadcast %cst_133 : f32 to vector<32x64xf32>
    %250 = arith.cmpf oge, %248, %249 : vector<32x64xf32>
    %251 = arith.extui %250 : vector<32x64xi1> to vector<32x64xi32>
    %252 = arith.sitofp %251 : vector<32x64xi32> to vector<32x64xf32>
    %cst_134 = arith.constant 1.000000e+00 : f32
    %253 = vector.broadcast %cst_134 : f32 to vector<32x64xf32>
    %254 = arith.subf %253, %252 : vector<32x64xf32>
    %255 = arith.mulf %248, %254 : vector<32x64xf32>
    %256 = arith.truncf %252 : vector<32x64xf32> to vector<32x64xbf16>
    %c0_135 = arith.constant 0 : index
    %c0_136 = arith.constant 0 : index
    %257 = vector.load %arg21[%c0_135, %c0_136] : memref<32x256xbf16, #tpu.memory_space<vmem>>, vector<32x64xbf16>
    tpu.vector_store %arg21[%c0_135, %c0_136], %256 {strides = array<i32>} : memref<32x256xbf16, #tpu.memory_space<vmem>>, vector<32x64xbf16>,
    %c0_137 = arith.constant 0 : index
    %c64_138 = arith.constant 64 : index
    %258 = vector.load %arg19[%c0_137, %c64_138] : memref<128x256xf32, #tpu.memory_space<vmem>>, vector<32x64xf32>
    %259 = arith.addf %258, %241 : vector<32x64xf32>
    %260 = arith.subf %259, %255 : vector<32x64xf32>
    %cst_139 = arith.constant 0.666666686 : f32
    %261 = vector.broadcast %cst_139 : f32 to vector<32x64xf32>
    %262 = arith.mulf %260, %261 : vector<32x64xf32>
    %263 = arith.addf %255, %262 : vector<32x64xf32>
    %cst_140 = arith.constant 1.000000e+00 : f32
    %264 = vector.broadcast %cst_140 : f32 to vector<32x64xf32>
    %265 = arith.cmpf oge, %263, %264 : vector<32x64xf32>
    %266 = arith.extui %265 : vector<32x64xi1> to vector<32x64xi32>
    %267 = arith.sitofp %266 : vector<32x64xi32> to vector<32x64xf32>
    %cst_141 = arith.constant 1.000000e+00 : f32
    %268 = vector.broadcast %cst_141 : f32 to vector<32x64xf32>
    %269 = arith.subf %268, %267 : vector<32x64xf32>
    %270 = arith.mulf %263, %269 : vector<32x64xf32>
    %271 = arith.truncf %267 : vector<32x64xf32> to vector<32x64xbf16>
    %c0_142 = arith.constant 0 : index
    %c64_143 = arith.constant 64 : index
    %272 = vector.load %arg21[%c0_142, %c64_143] : memref<32x256xbf16, #tpu.memory_space<vmem>>, vector<32x64xbf16>
    tpu.vector_store %arg21[%c0_142, %c64_143], %271 {strides = array<i32>} : memref<32x256xbf16, #tpu.memory_space<vmem>>, vector<32x64xbf16>,
    %c0_144 = arith.constant 0 : index
    %c128_145 = arith.constant 128 : index
    %273 = vector.load %arg19[%c0_144, %c128_145] : memref<128x256xf32, #tpu.memory_space<vmem>>, vector<32x64xf32>
    %274 = arith.addf %273, %241 : vector<32x64xf32>
    %275 = arith.subf %274, %270 : vector<32x64xf32>
    %cst_146 = arith.constant 0.666666686 : f32
    %276 = vector.broadcast %cst_146 : f32 to vector<32x64xf32>
    %277 = arith.mulf %275, %276 : vector<32x64xf32>
    %278 = arith.addf %270, %277 : vector<32x64xf32>
    %cst_147 = arith.constant 1.000000e+00 : f32
    %279 = vector.broadcast %cst_147 : f32 to vector<32x64xf32>
    %280 = arith.cmpf oge, %278, %279 : vector<32x64xf32>
    %281 = arith.extui %280 : vector<32x64xi1> to vector<32x64xi32>
    %282 = arith.sitofp %281 : vector<32x64xi32> to vector<32x64xf32>
    %cst_148 = arith.constant 1.000000e+00 : f32
    %283 = vector.broadcast %cst_148 : f32 to vector<32x64xf32>
    %284 = arith.subf %283, %282 : vector<32x64xf32>
    %285 = arith.mulf %278, %284 : vector<32x64xf32>
    %286 = arith.truncf %282 : vector<32x64xf32> to vector<32x64xbf16>
    %c0_149 = arith.constant 0 : index
    %c128_150 = arith.constant 128 : index
    %287 = vector.load %arg21[%c0_149, %c128_150] : memref<32x256xbf16, #tpu.memory_space<vmem>>, vector<32x64xbf16>
    tpu.vector_store %arg21[%c0_149, %c128_150], %286 {strides = array<i32>} : memref<32x256xbf16, #tpu.memory_space<vmem>>, vector<32x64xbf16>,
    %c0_151 = arith.constant 0 : index
    %c192_152 = arith.constant 192 : index
    %288 = vector.load %arg19[%c0_151, %c192_152] : memref<128x256xf32, #tpu.memory_space<vmem>>, vector<32x64xf32>
    %289 = arith.addf %288, %241 : vector<32x64xf32>
    %290 = arith.subf %289, %285 : vector<32x64xf32>
    %cst_153 = arith.constant 0.666666686 : f32
    %291 = vector.broadcast %cst_153 : f32 to vector<32x64xf32>
    %292 = arith.mulf %290, %291 : vector<32x64xf32>
    %293 = arith.addf %285, %292 : vector<32x64xf32>
    %cst_154 = arith.constant 1.000000e+00 : f32
    %294 = vector.broadcast %cst_154 : f32 to vector<32x64xf32>
    %295 = arith.cmpf oge, %293, %294 : vector<32x64xf32>
    %296 = arith.extui %295 : vector<32x64xi1> to vector<32x64xi32>
    %297 = arith.sitofp %296 : vector<32x64xi32> to vector<32x64xf32>
    %298 = arith.truncf %297 : vector<32x64xf32> to vector<32x64xbf16>
    %c0_155 = arith.constant 0 : index
    %c192_156 = arith.constant 192 : index
    %299 = vector.load %arg21[%c0_155, %c192_156] : memref<32x256xbf16, #tpu.memory_space<vmem>>, vector<32x64xbf16>
    tpu.vector_store %arg21[%c0_155, %c192_156], %298 {strides = array<i32>} : memref<32x256xbf16, #tpu.memory_space<vmem>>, vector<32x64xbf16>,
    %c0_157 = arith.constant 0 : index
    %c0_158 = arith.constant 0 : index
    %c0_159 = arith.constant 0 : index
    %300 = vector.load %arg1[%c0_157, %c0_158, %c0_159] : memref<1x32x256xf32, #tpu.memory_space<vmem>>, vector<1x32x256xf32>
    %301 = vector.shape_cast %300 : vector<1x32x256xf32> to vector<32x256xf32>
    %c0_160 = arith.constant 0 : index
    %c0_161 = arith.constant 0 : index
    %302 = vector.load %arg10[%c0_160, %c0_161] : memref<32x32xbf16, #tpu.memory_space<vmem>>, vector<32x32xbf16>
    %c0_162 = arith.constant 0 : index
    %c0_163 = arith.constant 0 : index
    %303 = vector.load %arg21[%c0_162, %c0_163] : memref<32x256xbf16, #tpu.memory_space<vmem>>, vector<32x256xbf16>
    %cst_164 = arith.constant dense<0.000000e+00> : vector<32x256xf32>
    %304 = tpu.matmul %302, %303, %cst_164 {dimension_numbers = #tpu.dot_dimension_numbers<[1], [0], [0], [1], [0, 0, 1, 1], [], []>} : vector<32x32xbf16>, vector<32x256xbf16>, vector<32x256xf32> -> vector<32x256xf32>
    %305 = arith.addf %301, %304 : vector<32x256xf32>
    %c0_165 = arith.constant 0 : index
    %c0_166 = arith.constant 0 : index
    %306 = vector.load %arg11[%c0_165, %c0_166] : memref<32x1xf32, #tpu.memory_space<vmem>>, vector<32x1xf32>
    %307 = vector.broadcast %306 : vector<32x1xf32> to vector<32x256xf32>
    %308 = arith.addf %305, %307 : vector<32x256xf32>
    %c0_167 = arith.constant 0 : index
    %c0_168 = arith.constant 0 : index
    %309 = vector.load %arg22[%c0_167, %c0_168] : memref<32x256xf32, #tpu.memory_space<vmem>>, vector<32x256xf32>
    tpu.vector_store %arg22[%c0_167, %c0_168], %308 {strides = array<i32>} : memref<32x256xf32, #tpu.memory_space<vmem>>, vector<32x256xf32>,
    %c0_169 = arith.constant 0 : index
    %c0_170 = arith.constant 0 : index
    %310 = vector.load %arg12[%c0_169, %c0_170] : memref<32x1xf32, #tpu.memory_space<vmem>>, vector<32x1xf32>
    %c0_171 = arith.constant 0 : index
    %c0_172 = arith.constant 0 : index
    %311 = vector.load %arg13[%c0_171, %c0_172] : memref<32x1xf32, #tpu.memory_space<vmem>>, vector<32x1xf32>
    %cst_173 = arith.constant 0.000000e+00 : f32
    %312 = vector.broadcast %cst_173 : f32 to vector<32x64xf32>
    %c0_174 = arith.constant 0 : index
    %c0_175 = arith.constant 0 : index
    %313 = vector.load %arg22[%c0_174, %c0_175] : memref<32x256xf32, #tpu.memory_space<vmem>>, vector<32x64xf32>
    %314 = vector.broadcast %310 : vector<32x1xf32> to vector<32x64xf32>
    %315 = arith.mulf %314, %313 : vector<32x64xf32>
    %316 = vector.broadcast %311 : vector<32x1xf32> to vector<32x64xf32>
    %317 = arith.addf %315, %316 : vector<32x64xf32>
    %318 = arith.subf %317, %312 : vector<32x64xf32>
    %cst_176 = arith.constant 0.666666686 : f32
    %319 = vector.broadcast %cst_176 : f32 to vector<32x64xf32>
    %320 = arith.mulf %318, %319 : vector<32x64xf32>
    %321 = arith.addf %312, %320 : vector<32x64xf32>
    %cst_177 = arith.constant 1.000000e+00 : f32
    %322 = vector.broadcast %cst_177 : f32 to vector<32x64xf32>
    %323 = arith.cmpf oge, %321, %322 : vector<32x64xf32>
    %324 = arith.extui %323 : vector<32x64xi1> to vector<32x64xi32>
    %325 = arith.sitofp %324 : vector<32x64xi32> to vector<32x64xf32>
    %cst_178 = arith.constant 1.000000e+00 : f32
    %326 = vector.broadcast %cst_178 : f32 to vector<32x64xf32>
    %327 = arith.subf %326, %325 : vector<32x64xf32>
    %328 = arith.mulf %321, %327 : vector<32x64xf32>
    %329 = arith.truncf %325 : vector<32x64xf32> to vector<32x64xbf16>
    %c0_179 = arith.constant 0 : index
    %c0_180 = arith.constant 0 : index
    %330 = vector.load %arg21[%c0_179, %c0_180] : memref<32x256xbf16, #tpu.memory_space<vmem>>, vector<32x64xbf16>
    tpu.vector_store %arg21[%c0_179, %c0_180], %329 {strides = array<i32>} : memref<32x256xbf16, #tpu.memory_space<vmem>>, vector<32x64xbf16>,
    %c0_181 = arith.constant 0 : index
    %c64_182 = arith.constant 64 : index
    %331 = vector.load %arg22[%c0_181, %c64_182] : memref<32x256xf32, #tpu.memory_space<vmem>>, vector<32x64xf32>
    %332 = vector.broadcast %310 : vector<32x1xf32> to vector<32x64xf32>
    %333 = arith.mulf %332, %331 : vector<32x64xf32>
    %334 = vector.broadcast %311 : vector<32x1xf32> to vector<32x64xf32>
    %335 = arith.addf %333, %334 : vector<32x64xf32>
    %336 = arith.subf %335, %328 : vector<32x64xf32>
    %cst_183 = arith.constant 0.666666686 : f32
    %337 = vector.broadcast %cst_183 : f32 to vector<32x64xf32>
    %338 = arith.mulf %336, %337 : vector<32x64xf32>
    %339 = arith.addf %328, %338 : vector<32x64xf32>
    %cst_184 = arith.constant 1.000000e+00 : f32
    %340 = vector.broadcast %cst_184 : f32 to vector<32x64xf32>
    %341 = arith.cmpf oge, %339, %340 : vector<32x64xf32>
    %342 = arith.extui %341 : vector<32x64xi1> to vector<32x64xi32>
    %343 = arith.sitofp %342 : vector<32x64xi32> to vector<32x64xf32>
    %cst_185 = arith.constant 1.000000e+00 : f32
    %344 = vector.broadcast %cst_185 : f32 to vector<32x64xf32>
    %345 = arith.subf %344, %343 : vector<32x64xf32>
    %346 = arith.mulf %339, %345 : vector<32x64xf32>
    %347 = arith.truncf %343 : vector<32x64xf32> to vector<32x64xbf16>
    %c0_186 = arith.constant 0 : index
    %c64_187 = arith.constant 64 : index
    %348 = vector.load %arg21[%c0_186, %c64_187] : memref<32x256xbf16, #tpu.memory_space<vmem>>, vector<32x64xbf16>
    tpu.vector_store %arg21[%c0_186, %c64_187], %347 {strides = array<i32>} : memref<32x256xbf16, #tpu.memory_space<vmem>>, vector<32x64xbf16>,
    %c0_188 = arith.constant 0 : index
    %c128_189 = arith.constant 128 : index
    %349 = vector.load %arg22[%c0_188, %c128_189] : memref<32x256xf32, #tpu.memory_space<vmem>>, vector<32x64xf32>
    %350 = vector.broadcast %310 : vector<32x1xf32> to vector<32x64xf32>
    %351 = arith.mulf %350, %349 : vector<32x64xf32>
    %352 = vector.broadcast %311 : vector<32x1xf32> to vector<32x64xf32>
    %353 = arith.addf %351, %352 : vector<32x64xf32>
    %354 = arith.subf %353, %346 : vector<32x64xf32>
    %cst_190 = arith.constant 0.666666686 : f32
    %355 = vector.broadcast %cst_190 : f32 to vector<32x64xf32>
    %356 = arith.mulf %354, %355 : vector<32x64xf32>
    %357 = arith.addf %346, %356 : vector<32x64xf32>
    %cst_191 = arith.constant 1.000000e+00 : f32
    %358 = vector.broadcast %cst_191 : f32 to vector<32x64xf32>
    %359 = arith.cmpf oge, %357, %358 : vector<32x64xf32>
    %360 = arith.extui %359 : vector<32x64xi1> to vector<32x64xi32>
    %361 = arith.sitofp %360 : vector<32x64xi32> to vector<32x64xf32>
    %cst_192 = arith.constant 1.000000e+00 : f32
    %362 = vector.broadcast %cst_192 : f32 to vector<32x64xf32>
    %363 = arith.subf %362, %361 : vector<32x64xf32>
    %364 = arith.mulf %357, %363 : vector<32x64xf32>
    %365 = arith.truncf %361 : vector<32x64xf32> to vector<32x64xbf16>
    %c0_193 = arith.constant 0 : index
    %c128_194 = arith.constant 128 : index
    %366 = vector.load %arg21[%c0_193, %c128_194] : memref<32x256xbf16, #tpu.memory_space<vmem>>, vector<32x64xbf16>
    tpu.vector_store %arg21[%c0_193, %c128_194], %365 {strides = array<i32>} : memref<32x256xbf16, #tpu.memory_space<vmem>>, vector<32x64xbf16>,
    %c0_195 = arith.constant 0 : index
    %c192_196 = arith.constant 192 : index
    %367 = vector.load %arg22[%c0_195, %c192_196] : memref<32x256xf32, #tpu.memory_space<vmem>>, vector<32x64xf32>
    %368 = vector.broadcast %310 : vector<32x1xf32> to vector<32x64xf32>
    %369 = arith.mulf %368, %367 : vector<32x64xf32>
    %370 = vector.broadcast %311 : vector<32x1xf32> to vector<32x64xf32>
    %371 = arith.addf %369, %370 : vector<32x64xf32>
    %372 = arith.subf %371, %364 : vector<32x64xf32>
    %cst_197 = arith.constant 0.666666686 : f32
    %373 = vector.broadcast %cst_197 : f32 to vector<32x64xf32>
    %374 = arith.mulf %372, %373 : vector<32x64xf32>
    %375 = arith.addf %364, %374 : vector<32x64xf32>
    %cst_198 = arith.constant 1.000000e+00 : f32
    %376 = vector.broadcast %cst_198 : f32 to vector<32x64xf32>
    %377 = arith.cmpf oge, %375, %376 : vector<32x64xf32>
    %378 = arith.extui %377 : vector<32x64xi1> to vector<32x64xi32>
    %379 = arith.sitofp %378 : vector<32x64xi32> to vector<32x64xf32>
    %380 = arith.truncf %379 : vector<32x64xf32> to vector<32x64xbf16>
    %c0_199 = arith.constant 0 : index
    %c192_200 = arith.constant 192 : index
    %381 = vector.load %arg21[%c0_199, %c192_200] : memref<32x256xbf16, #tpu.memory_space<vmem>>, vector<32x64xbf16>
    tpu.vector_store %arg21[%c0_199, %c192_200], %380 {strides = array<i32>} : memref<32x256xbf16, #tpu.memory_space<vmem>>, vector<32x64xbf16>,
    %c0_201 = arith.constant 0 : index
    %c0_202 = arith.constant 0 : index
    %382 = vector.load %arg14[%c0_201, %c0_202] : memref<128x32xbf16, #tpu.memory_space<vmem>>, vector<128x32xbf16>
    %c0_203 = arith.constant 0 : index
    %c0_204 = arith.constant 0 : index
    %383 = vector.load %arg21[%c0_203, %c0_204] : memref<32x256xbf16, #tpu.memory_space<vmem>>, vector<32x256xbf16>
    %cst_205 = arith.constant dense<0.000000e+00> : vector<128x256xf32>
    %384 = tpu.matmul %382, %383, %cst_205 {dimension_numbers = #tpu.dot_dimension_numbers<[1], [0], [0], [1], [0, 0, 1, 1], [], []>} : vector<128x32xbf16>, vector<32x256xbf16>, vector<128x256xf32> -> vector<128x256xf32>
    %c0_206 = arith.constant 0 : index
    %c0_207 = arith.constant 0 : index
    %385 = vector.load %arg15[%c0_206, %c0_207] : memref<128x1xf32, #tpu.memory_space<vmem>>, vector<128x1xf32>
    %386 = vector.broadcast %385 : vector<128x1xf32> to vector<128x256xf32>
    %387 = arith.addf %384, %386 : vector<128x256xf32>
    %c0_208 = arith.constant 0 : index
    %c0_209 = arith.constant 0 : index
    %388 = vector.load %arg19[%c0_208, %c0_209] : memref<128x256xf32, #tpu.memory_space<vmem>>, vector<128x256xf32>
    tpu.vector_store %arg19[%c0_208, %c0_209], %387 {strides = array<i32>} : memref<128x256xf32, #tpu.memory_space<vmem>>, vector<128x256xf32>,
    %cst_210 = arith.constant 0.000000e+00 : f32
    %389 = vector.broadcast %cst_210 : f32 to vector<128x64xf32>
    %c0_211 = arith.constant 0 : index
    %c0_212 = arith.constant 0 : index
    %390 = vector.load %arg19[%c0_211, %c0_212] : memref<128x256xf32, #tpu.memory_space<vmem>>, vector<128x64xf32>
    %391 = arith.subf %390, %389 : vector<128x64xf32>
    %cst_213 = arith.constant 0.666666686 : f32
    %392 = vector.broadcast %cst_213 : f32 to vector<128x64xf32>
    %393 = arith.mulf %391, %392 : vector<128x64xf32>
    %394 = arith.addf %389, %393 : vector<128x64xf32>
    %cst_214 = arith.constant 1.000000e+00 : f32
    %395 = vector.broadcast %cst_214 : f32 to vector<128x64xf32>
    %396 = arith.cmpf oge, %394, %395 : vector<128x64xf32>
    %397 = arith.extui %396 : vector<128x64xi1> to vector<128x64xi32>
    %398 = arith.sitofp %397 : vector<128x64xi32> to vector<128x64xf32>
    %cst_215 = arith.constant 1.000000e+00 : f32
    %399 = vector.broadcast %cst_215 : f32 to vector<128x64xf32>
    %400 = arith.subf %399, %398 : vector<128x64xf32>
    %401 = arith.mulf %394, %400 : vector<128x64xf32>
    %402 = arith.truncf %398 : vector<128x64xf32> to vector<128x64xbf16>
    %c0_216 = arith.constant 0 : index
    %c0_217 = arith.constant 0 : index
    %403 = vector.load %arg20[%c0_216, %c0_217] : memref<128x256xbf16, #tpu.memory_space<vmem>>, vector<128x64xbf16>
    tpu.vector_store %arg20[%c0_216, %c0_217], %402 {strides = array<i32>} : memref<128x256xbf16, #tpu.memory_space<vmem>>, vector<128x64xbf16>,
    %c0_218 = arith.constant 0 : index
    %c64_219 = arith.constant 64 : index
    %404 = vector.load %arg19[%c0_218, %c64_219] : memref<128x256xf32, #tpu.memory_space<vmem>>, vector<128x64xf32>
    %405 = arith.subf %404, %401 : vector<128x64xf32>
    %cst_220 = arith.constant 0.666666686 : f32
    %406 = vector.broadcast %cst_220 : f32 to vector<128x64xf32>
    %407 = arith.mulf %405, %406 : vector<128x64xf32>
    %408 = arith.addf %401, %407 : vector<128x64xf32>
    %cst_221 = arith.constant 1.000000e+00 : f32
    %409 = vector.broadcast %cst_221 : f32 to vector<128x64xf32>
    %410 = arith.cmpf oge, %408, %409 : vector<128x64xf32>
    %411 = arith.extui %410 : vector<128x64xi1> to vector<128x64xi32>
    %412 = arith.sitofp %411 : vector<128x64xi32> to vector<128x64xf32>
    %cst_222 = arith.constant 1.000000e+00 : f32
    %413 = vector.broadcast %cst_222 : f32 to vector<128x64xf32>
    %414 = arith.subf %413, %412 : vector<128x64xf32>
    %415 = arith.mulf %408, %414 : vector<128x64xf32>
    %416 = arith.truncf %412 : vector<128x64xf32> to vector<128x64xbf16>
    %c0_223 = arith.constant 0 : index
    %c64_224 = arith.constant 64 : index
    %417 = vector.load %arg20[%c0_223, %c64_224] : memref<128x256xbf16, #tpu.memory_space<vmem>>, vector<128x64xbf16>
    tpu.vector_store %arg20[%c0_223, %c64_224], %416 {strides = array<i32>} : memref<128x256xbf16, #tpu.memory_space<vmem>>, vector<128x64xbf16>,
    %c0_225 = arith.constant 0 : index
    %c128_226 = arith.constant 128 : index
    %418 = vector.load %arg19[%c0_225, %c128_226] : memref<128x256xf32, #tpu.memory_space<vmem>>, vector<128x64xf32>
    %419 = arith.subf %418, %415 : vector<128x64xf32>
    %cst_227 = arith.constant 0.666666686 : f32
    %420 = vector.broadcast %cst_227 : f32 to vector<128x64xf32>
    %421 = arith.mulf %419, %420 : vector<128x64xf32>
    %422 = arith.addf %415, %421 : vector<128x64xf32>
    %cst_228 = arith.constant 1.000000e+00 : f32
    %423 = vector.broadcast %cst_228 : f32 to vector<128x64xf32>
    %424 = arith.cmpf oge, %422, %423 : vector<128x64xf32>
    %425 = arith.extui %424 : vector<128x64xi1> to vector<128x64xi32>
    %426 = arith.sitofp %425 : vector<128x64xi32> to vector<128x64xf32>
    %cst_229 = arith.constant 1.000000e+00 : f32
    %427 = vector.broadcast %cst_229 : f32 to vector<128x64xf32>
    %428 = arith.subf %427, %426 : vector<128x64xf32>
    %429 = arith.mulf %422, %428 : vector<128x64xf32>
    %430 = arith.truncf %426 : vector<128x64xf32> to vector<128x64xbf16>
    %c0_230 = arith.constant 0 : index
    %c128_231 = arith.constant 128 : index
    %431 = vector.load %arg20[%c0_230, %c128_231] : memref<128x256xbf16, #tpu.memory_space<vmem>>, vector<128x64xbf16>
    tpu.vector_store %arg20[%c0_230, %c128_231], %430 {strides = array<i32>} : memref<128x256xbf16, #tpu.memory_space<vmem>>, vector<128x64xbf16>,
    %c0_232 = arith.constant 0 : index
    %c192_233 = arith.constant 192 : index
    %432 = vector.load %arg19[%c0_232, %c192_233] : memref<128x256xf32, #tpu.memory_space<vmem>>, vector<128x64xf32>
    %433 = arith.subf %432, %429 : vector<128x64xf32>
    %cst_234 = arith.constant 0.666666686 : f32
    %434 = vector.broadcast %cst_234 : f32 to vector<128x64xf32>
    %435 = arith.mulf %433, %434 : vector<128x64xf32>
    %436 = arith.addf %429, %435 : vector<128x64xf32>
    %cst_235 = arith.constant 1.000000e+00 : f32
    %437 = vector.broadcast %cst_235 : f32 to vector<128x64xf32>
    %438 = arith.cmpf oge, %436, %437 : vector<128x64xf32>
    %439 = arith.extui %438 : vector<128x64xi1> to vector<128x64xi32>
    %440 = arith.sitofp %439 : vector<128x64xi32> to vector<128x64xf32>
    %441 = arith.truncf %440 : vector<128x64xf32> to vector<128x64xbf16>
    %c0_236 = arith.constant 0 : index
    %c192_237 = arith.constant 192 : index
    %442 = vector.load %arg20[%c0_236, %c192_237] : memref<128x256xbf16, #tpu.memory_space<vmem>>, vector<128x64xbf16>
    tpu.vector_store %arg20[%c0_236, %c192_237], %441 {strides = array<i32>} : memref<128x256xbf16, #tpu.memory_space<vmem>>, vector<128x64xbf16>,
    %c0_238 = arith.constant 0 : index
    %c0_239 = arith.constant 0 : index
    %443 = vector.load %arg22[%c0_238, %c0_239] : memref<32x256xf32, #tpu.memory_space<vmem>>, vector<32x256xf32>
    %c0_240 = arith.constant 0 : index
    %c0_241 = arith.constant 0 : index
    %444 = vector.load %arg16[%c0_240, %c0_241] : memref<32x128xbf16, #tpu.memory_space<vmem>>, vector<32x128xbf16>
    %c0_242 = arith.constant 0 : index
    %c0_243 = arith.constant 0 : index
    %445 = vector.load %arg20[%c0_242, %c0_243] : memref<128x256xbf16, #tpu.memory_space<vmem>>, vector<128x256xbf16>
    %cst_244 = arith.constant dense<0.000000e+00> : vector<32x256xf32>
    %446 = tpu.matmul %444, %445, %cst_244 {dimension_numbers = #tpu.dot_dimension_numbers<[1], [0], [0], [1], [0, 0, 1, 1], [], []>} : vector<32x128xbf16>, vector<128x256xbf16>, vector<32x256xf32> -> vector<32x256xf32>
    %447 = arith.addf %443, %446 : vector<32x256xf32>
    %c0_245 = arith.constant 0 : index
    %c0_246 = arith.constant 0 : index
    %448 = vector.load %arg17[%c0_245, %c0_246] : memref<32x1xf32, #tpu.memory_space<vmem>>, vector<32x1xf32>
    %449 = vector.broadcast %448 : vector<32x1xf32> to vector<32x256xf32>
    %450 = arith.addf %447, %449 : vector<32x256xf32>
    %c0_247 = arith.constant 0 : index
    %c0_248 = arith.constant 0 : index
    %c0_249 = arith.constant 0 : index
    %451 = vector.load %arg18[%c0_247, %c0_248, %c0_249] : memref<1x32x256xf32, #tpu.memory_space<vmem>>, vector<1x32x256xf32>
    %452 = vector.shape_cast %451 : vector<1x32x256xf32> to vector<32x256xf32>
    %453 = vector.shape_cast %450 : vector<32x256xf32> to vector<1x32x256xf32>
    tpu.vector_store %arg18[%c0_247, %c0_248, %c0_249], %453 {strides = array<i32>} : memref<1x32x256xf32, #tpu.memory_space<vmem>>, vector<1x32x256xf32>,
    return
  }
  func.func @transform_0(%arg0: i32) -> (i32, i32, i32) {
    %c0_i32 = arith.constant 0 : i32
    %c0_i32_0 = arith.constant 0 : i32
    %c0_i32_1 = arith.constant 0 : i32
    return %arg0, %c0_i32, %c0_i32_0 : i32, i32, i32
  }
  func.func @transform_1(%arg0: i32) -> (i32, i32) {
    %c0_i32 = arith.constant 0 : i32
    %c0_i32_0 = arith.constant 0 : i32
    %c0_i32_1 = arith.constant 0 : i32
    return %c0_i32, %c0_i32_0 : i32, i32
  }
  func.func @transform_2(%arg0: i32) -> (i32, i32) {
    %c0_i32 = arith.constant 0 : i32
    %c0_i32_0 = arith.constant 0 : i32
    %c0_i32_1 = arith.constant 0 : i32
    return %c0_i32, %c0_i32_0 : i32, i32
  }
  func.func @transform_3(%arg0: i32) -> (i32, i32) {
    %c0_i32 = arith.constant 0 : i32
    %c0_i32_0 = arith.constant 0 : i32
    %c0_i32_1 = arith.constant 0 : i32
    return %c0_i32, %c0_i32_0 : i32, i32
  }
  func.func @transform_4(%arg0: i32) -> (i32, i32) {
    %c0_i32 = arith.constant 0 : i32
    %c0_i32_0 = arith.constant 0 : i32
    %c0_i32_1 = arith.constant 0 : i32
    return %c0_i32, %c0_i32_0 : i32, i32
  }
  func.func @transform_5(%arg0: i32) -> (i32, i32) {
    %c0_i32 = arith.constant 0 : i32
    %c0_i32_0 = arith.constant 0 : i32
    %c0_i32_1 = arith.constant 0 : i32
    return %c0_i32, %c0_i32_0 : i32, i32
  }
  func.func @transform_6(%arg0: i32) -> (i32, i32) {
    %c0_i32 = arith.constant 0 : i32
    %c0_i32_0 = arith.constant 0 : i32
    %c0_i32_1 = arith.constant 0 : i32
    return %c0_i32, %c0_i32_0 : i32, i32
  }
  func.func @transform_7(%arg0: i32) -> (i32, i32) {
    %c0_i32 = arith.constant 0 : i32
    %c0_i32_0 = arith.constant 0 : i32
    %c0_i32_1 = arith.constant 0 : i32
    return %c0_i32, %c0_i32_0 : i32, i32
  }
  func.func @transform_8(%arg0: i32) -> (i32, i32) {
    %c0_i32 = arith.constant 0 : i32
    %c0_i32_0 = arith.constant 0 : i32
    %c0_i32_1 = arith.constant 0 : i32
    return %c0_i32, %c0_i32_0 : i32, i32
  }
  func.func @transform_9(%arg0: i32) -> (i32, i32) {
    %c0_i32 = arith.constant 0 : i32
    %c0_i32_0 = arith.constant 0 : i32
    %c0_i32_1 = arith.constant 0 : i32
    return %c0_i32, %c0_i32_0 : i32, i32
  }
  func.func @transform_10(%arg0: i32) -> (i32, i32) {
    %c0_i32 = arith.constant 0 : i32
    %c0_i32_0 = arith.constant 0 : i32
    %c0_i32_1 = arith.constant 0 : i32
    return %c0_i32, %c0_i32_0 : i32, i32
  }
  func.func @transform_11(%arg0: i32) -> (i32, i32) {
    %c0_i32 = arith.constant 0 : i32
    %c0_i32_0 = arith.constant 0 : i32
    %c0_i32_1 = arith.constant 0 : i32
    return %c0_i32, %c0_i32_0 : i32, i32
  }
  func.func @transform_12(%arg0: i32) -> (i32, i32) {
    %c0_i32 = arith.constant 0 : i32
    %c0_i32_0 = arith.constant 0 : i32
    %c0_i32_1 = arith.constant 0 : i32
    return %c0_i32, %c0_i32_0 : i32, i32
  }
  func.func @transform_13(%arg0: i32) -> (i32, i32) {
    %c0_i32 = arith.constant 0 : i32
    %c0_i32_0 = arith.constant 0 : i32
    %c0_i32_1 = arith.constant 0 : i32
    return %c0_i32, %c0_i32_0 : i32, i32
  }
  func.func @transform_14(%arg0: i32) -> (i32, i32) {
    %c0_i32 = arith.constant 0 : i32
    %c0_i32_0 = arith.constant 0 : i32
    %c0_i32_1 = arith.constant 0 : i32
    return %c0_i32, %c0_i32_0 : i32, i32
  }
  func.func @transform_15(%arg0: i32) -> (i32, i32) {
    %c0_i32 = arith.constant 0 : i32
    %c0_i32_0 = arith.constant 0 : i32
    %c0_i32_1 = arith.constant 0 : i32
    return %c0_i32, %c0_i32_0 : i32, i32
  }
  func.func @transform_16(%arg0: i32) -> (i32, i32) {
    %c0_i32 = arith.constant 0 : i32
    %c0_i32_0 = arith.constant 0 : i32
    %c0_i32_1 = arith.constant 0 : i32
    return %c0_i32, %c0_i32_0 : i32, i32
  }
  func.func @transform_17(%arg0: i32) -> (i32, i32, i32) {
    %c0_i32 = arith.constant 0 : i32
    %c0_i32_0 = arith.constant 0 : i32
    %c0_i32_1 = arith.constant 0 : i32
    return %arg0, %c0_i32, %c0_i32_0 : i32, i32, i32
  }
}

</mosaic_0001>

<bundles_post_ra>
// kernel: spiking_transformer_block.1
= control target key start
LH: loop header
LB: loop body
LE: loop exit
PB: predicated region body
PF: predicated region fallthrough
CT: control target
= control target key end

     0   :  { %s7171_s24 = smov 0   ;;  %s9503_s0 = inlined_call_operand.vmem [shape: f32[2,32,256], index: 0, kind: input, shape index: {}]   ;;  %s9504_s1 = inlined_call_operand.vmem [shape: f32[32,1], index: 1, kind: input, shape index: {}]   ;;  %s9505_s2 = inlined_call_operand.vmem [shape: f32[32,1], index: 2, kind: input, shape index: {}]   ;;  %s9506_s3 = inlined_call_operand.vmem [shape: bf16[96,32], index: 3, kind: input, shape index: {}]   ;;  %s9507_s4 = inlined_call_operand.vmem [shape: f32[96,1], index: 4, kind: input, shape index: {}]   ;;  %s9508_s5 = inlined_call_operand.vmem [shape: f32[32,32], index: 5, kind: input, shape index: {}]   ;;  %s9509_s6 = inlined_call_operand.vmem [shape: bf16[64,576], index: 6, kind: input, shape index: {}]   ;;  %s9510_s7 = inlined_call_operand.vmem [shape: f32[32,9], index: 7, kind: input, shape index: {}]   ;;  %s9511_s8 = inlined_call_operand.vmem [shape: f32[32,1], index: 8, kind: input, shape index: {}]   ;;  %s9512_s9 = inlined_call_operand.vmem [shape: bf16[32,32], index: 9, kind: input, shape index: {}]   ;;  %s9513_s10 = inlined_call_operand.vmem [shape: f32[32,1], index: 10, kind: input, shape index: {}]   ;;  %s9514_s11 = inlined_call_operand.vmem [shape: f32[32,1], index: 11, kind: input, shape index: {}]   ;;  %s9515_s12 = inlined_call_operand.vmem [shape: f32[32,1], index: 12, kind: input, shape index: {}]   ;;  %s9516_s13 = inlined_call_operand.vmem [shape: bf16[128,32], index: 13, kind: input, shape index: {}]   ;;  %s9517_s14 = inlined_call_operand.vmem [shape: f32[128,1], index: 14, kind: input, shape index: {}]   ;;  %s9518_s15 = inlined_call_operand.vmem [shape: bf16[32,128], index: 15, kind: input, shape index: {}]   ;;  %s9519_s16 = inlined_call_operand.vmem [shape: f32[32,1], index: 16, kind: input, shape index: {}]   ;;  %s9520_s17 = inlined_call_operand.vmem [shape: f32[2,32,256], index: 17, kind: output, shape index: {}]  }
   0x1   :  { %9536 = sst [smem:[#allocation18_spill]] %s9503_s0 }
   0x2   :  { %9537 = sst [smem:[#allocation19_spill]] %s9504_s1 }
   0x3 LB: > { %s6137_s25 = sadd.s32 4294967295, %s7068_s24   ;;  %p6141_p0 = scmp.ge.s32.totalorder %s7068_s24, 1  ;;  %s7068_s24 = sphi %s7171_s24, %s27_s24  }
   0x4   : > { %p487_p1 = scmp.lt.s32.totalorder %s7068_s24, 3 }
   0x6   : > { %p488_p2 = pnand %p6141_p0, %p487_p1 }
   0x8   : > { %491 = sbr.rel (%p488_p2) target bundleno = 5281 (0x14a1), region = 88 }
   0xd   : > { %v556_v0 = vld [vmem:[%s9505_s2 + $0x10] sm:$0xff]  ;;  %s9538_s0 = sld [smem:[#allocation19_spill]]  ;;  %v9523_v2 = vmov 0   ;;  %v557_v3 = vld [vmem:[%s9505_s2 + $0x18] sm:$0xff]  ;;  %v555_v7 = vld [vmem:[%s9505_s2 + $0x8] sm:$0xff]  ;;  %p539_p3 = scmp.lt.s32.totalorder %s6137_s25, 1 }
   0xe   : > { %6900 = vset.pattern.permute.xlu1 %v9523_v2  ;;  %6899 = vset.pattern.permute.xlu0 %v9523_v2  ;;  %v554_v8 = vld [vmem:[%s9505_s2] sm:$0xff]  ;;  %s9539_s1 = sld [smem:[#allocation18_spill]]  ;;  %v7071_v23 = vmov 0.0   ;;  %vm654_vm1 = vcmask 519168   ;;  %s7072_s21 = smov 64   ;;  %vm759_vm15 = vcmask 1043968  }
   0xf   : > { %598 = vperm.xlu1 %6900, %v556_v0   ;;  %1113 = vmatprep.mubr.bf16.mxu0 %v9523_v2  ;;  %s9567_s25 = smov (!%p539_p3, %s6137_s25), 1 }
  0x10   : > { %s9522_s30 = sshll.u32 %s9567_s25, 6  ;;  %s9558_s23 = sshll.u32 %s9567_s25, 6 }
  0x11   : > { %s9483_s28 = scalar_lea.vmem %s9520_s17, %s9558_s23 }
  0x13   : > { %v552_v1 = vld [vmem:[%s9538_s0 + $0x10] sm:$0xff]  ;;  %v553_v4 = vld [vmem:[%s9538_s0 + $0x18] sm:$0xff]  ;;  %603 = vperm.xlu1 %6900, %v557_v3   ;;  %v551_v5 = vld [vmem:[%s9538_s0 + $0x8] sm:$0xff] }
  0x14   : > { %574 = vperm.xlu0 %6899, %v552_v1   ;;  %v550_v6 = vld [vmem:[%s9538_s0] sm:$0xff]  ;;  %s7214_s20 = scalar_lea.vmem %s9539_s1, %s9522_s30 }
  0x15   : > { %v560_v9 = vld [vmem:[%s7214_s20 + $0x20] sm:$0xff]  ;;  %v561_v13 = vld [vmem:[%s7214_s20 + $0x30] sm:$0xff]  ;;  %v766_v62 = vld [vmem:[%s7214_s20 + $0x28] sm:$0xff] }
  0x16   : > { %v559_v20 = vld [vmem:[%s7214_s20 + $0x10] sm:$0xff]  ;;  %v558_v25 = vld [vmem:[%s7214_s20] sm:$0xff]  ;;  %v767_v3 = vld [vmem:[%s7214_s20 + $0x38] sm:$0xff] }
  0x17   : > { %569 = vperm.xlu1 %6900, %v551_v5  }
  0x18   : > { %579 = vperm.xlu0 %6899, %v553_v4  }
  0x1b   : > { %593 = vperm.xlu1 %6900, %v555_v7  }
  0x1c   : > { %564 = vperm.xlu0 %6899, %v550_v6  }
  0x20   : > { %588 = vperm.xlu0 %6899, %v554_v8  }
  0x8a   : > { %v7217_v10 = vpop.permute.xlu1 %598 }
  0x8e   : > { %v7224_v15 = vpop.permute.xlu1 %603 }
  0x8f   : > { %v7219_v11 = vpop.permute.xlu0 %574 }
  0x90   : > { %v584_v12 = vmul.f32 %v7219_v11, %v560_v9  ;;  %v770_v1 = vmul.f32 %v766_v62, %v7219_v11 }
  0x92   : > { %v608_v14 = vadd.f32 %v7217_v10, %v584_v12  ;;  %v7231_v21 = vpop.permute.xlu1 %569  ;;  %v7269_v9 = vadd.f32 %v770_v1, %v7217_v10 }
  0x93   : > { %v7226_v16 = vpop.permute.xlu0 %579  ;;  %v583_v28 = vmul.f32 %v7231_v21, %v559_v20  ;;  %v765_v20 = vld [vmem:[%s7214_s20 + $0x18] sm:$0xff] }
  0x94   : > { %v612_v17 = vmul.f32 0.6666667, %v608_v14  ;;  %v585_v18 = vmul.f32 %v7226_v16, %v561_v13  ;;  %v771_v8 = vmul.f32 %v767_v3, %v7226_v16 }
  0x96   : > { %vm620_vm0 = vcmp.ge.f32.partialorder %v612_v17, 1.0  ;;  %v609_v19 = vadd.f32 %v7224_v15, %v585_v18  ;;  %v7239_v32 = vpop.permute.xlu1 %593 }
  0x97   : > { %v7233_v22 = vpop.permute.xlu0 %564  ;;  %v6148_v24 = vsel %vm620_vm0, 1.0, %v7071_v23  ;;  %v607_v36 = vadd.f32 %v7239_v32, %v583_v28 }
  0x98   : > { %v632_v26 = vsub.f32 1.0, %v6148_v24  ;;  %v613_v27 = vmul.f32 0.6666667, %v609_v19  ;;  %v582_v30 = vmul.f32 %v7233_v22, %v558_v25  ;;  %v6600_v31 = vpack.c.bf16 %v6148_v24, %v6148_v24  ;;  %v764_v24 = vld [vmem:[%s7214_s20 + $0x8] sm:$0xff] }
  0x99   : > { %v611_v40 = vmul.f32 0.6666667, %v607_v36 }
  0x9a   : > { %v636_v29 = vmul.f32 %v632_v26, %v612_v17  ;;  %vm621_vm2 = vcmp.ge.f32.partialorder %v613_v27, 1.0  ;;  %657 = vst.msk [vmem:[#allocation4 + $0x10] sm:$0xf] %vm654_vm1, %v6600_v31  ;;  %v7277_v17 = vadd.f32 %v771_v8, %v7224_v15 }
  0x9b   : > { %v7241_v33 = vpop.permute.xlu0 %588  ;;  %v6149_v34 = vsel %vm621_vm2, 1.0, %v7071_v23  ;;  %vm619_vm3 = vcmp.ge.f32.partialorder %v611_v40, 1.0 }
  0x9c   : > { %679 = vrot.lane.b32.xlu0 %v636_v29, %s7072_s21  ;;  %v633_v35 = vsub.f32 1.0, %v6149_v34  ;;  %v606_v37 = vadd.f32 %v7241_v33, %v582_v30  ;;  %v6601_v38 = vpack.c.bf16 %v6149_v34, %v6149_v34  ;;  %v6147_v42 = vsel %vm619_vm3, 1.0, %v7071_v23 }
  0x9d   : > { %v631_v44 = vsub.f32 1.0, %v6147_v42  ;;  %v6599_v46 = vpack.c.bf16 %v6147_v42, %v6147_v42  ;;  %v768_v30 = vmul.f32 %v764_v24, %v7233_v22  ;;  %vm1062_vm3 = vcmask 261120  }
  0x9e   : > { %v637_v39 = vmul.f32 %v633_v35, %v613_v27  ;;  %v610_v41 = vmul.f32 0.6666667, %v606_v37  ;;  %658 = vst.msk [vmem:[#allocation4 + $0x18] sm:$0xf] %vm654_vm1, %v6601_v38 }
  0x9f   : > { %v635_v48 = vmul.f32 %v631_v44, %v611_v40  ;;  %656 = vst.msk [vmem:[#allocation4 + $0x8] sm:$0xf] %vm654_vm1, %v6599_v46  ;;  %v772_v38 = vadd.f32 %v768_v30, %v7241_v33 }
  0xa0   : > { %681 = vrot.lane.b32.xlu1 %v637_v39, %s7072_s21  ;;  %vm618_vm4 = vcmp.ge.f32.partialorder %v610_v41, 1.0 }
  0xa1   : > { %v6146_v43 = vsel %vm618_vm4, 1.0, %v7071_v23 }
  0xa2   : > { %v630_v45 = vsub.f32 1.0, %v6146_v43  ;;  %v6598_v47 = vpack.c.bf16 %v6146_v43, %v6146_v43 }
  0xa4   : > { %v634_v49 = vmul.f32 %v630_v45, %v610_v41  ;;  %655 = vst.msk [vmem:[#allocation4] sm:$0xf] %vm654_vm1, %v6598_v47  ;;  %677 = vrot.lane.b32.xlu1 %v635_v48, %s7072_s21 }
  0xa6   : > { %675 = vrot.lane.b32.xlu0 %v634_v49, %s7072_s21 }
 0x10e   : > { %v680_v50 = vpop.permute.xlu0 %679 }
 0x10f   : > { %v689_v51 = vsub.f32 %v608_v14, %v680_v50 }
 0x111   : > { %v693_v52 = vmul.f32 0.6666667, %v689_v51 }
 0x112   : > { %v682_v53 = vpop.permute.xlu1 %681 }
 0x113   : > { %v690_v54 = vsub.f32 %v609_v19, %v682_v53  ;;  %703 = vrot.lane.b32.xlu0 %v693_v52, %s7072_s21 }
 0x115   : > { %v694_v55 = vmul.f32 0.6666667, %v690_v54 }
 0x116   : > { %v678_v56 = vpop.permute.xlu1 %677 }
 0x117   : > { %705 = vrot.lane.b32.xlu1 %v694_v55, %s7072_s21  ;;  %v688_v58 = vsub.f32 %v607_v36, %v678_v56 }
 0x118   : > { %v676_v57 = vpop.permute.xlu0 %675 }
 0x119   : > { %v687_v59 = vsub.f32 %v606_v37, %v676_v57  ;;  %v692_v60 = vmul.f32 0.6666667, %v688_v58 }
 0x11b   : > { %v691_v61 = vmul.f32 0.6666667, %v687_v59  ;;  %701 = vrot.lane.b32.xlu1 %v692_v60, %s7072_s21 }
 0x11d   : > { %699 = vrot.lane.b32.xlu0 %v691_v61, %s7072_s21 }
 0x185   : > { %v704_v63 = vpop.permute.xlu0 %703 }
 0x186   : > { %v713_v0 = vadd.f32 %v704_v63, %v636_v29  ;;  %v769_v29 = vmul.f32 %v765_v20, %v7231_v21 }
 0x188   : > { %vm717_vm5 = vcmp.ge.f32.partialorder %v713_v0, 1.0  ;;  %v773_v37 = vadd.f32 %v769_v29, %v7239_v32 }
 0x189   : > { %v7264_v4 = vsel %vm717_vm5, 1.0, %v7071_v23  ;;  %v706_v5 = vpop.permute.xlu1 %705 }
 0x18a   : > { %v729_v6 = vsub.f32 1.0, %v7264_v4  ;;  %v714_v7 = vadd.f32 %v706_v5, %v637_v39 }
 0x18c   : > { %v733_v12 = vmul.f32 %v729_v6, %v713_v0  ;;  %vm718_vm6 = vcmp.ge.f32.partialorder %v714_v7, 1.0 }
 0x18d   : > { %v7272_v11 = vsel %vm718_vm6, 1.0, %v7071_v23  ;;  %v702_v18 = vpop.permute.xlu1 %701 }
 0x18e   : > { %v778_v13 = vsub.f32 %v7269_v9, %v733_v12  ;;  %v730_v14 = vsub.f32 1.0, %v7272_v11  ;;  %v712_v10 = vadd.f32 %v702_v18, %v635_v48 }
 0x18f   : > { %v700_v19 = vpop.permute.xlu0 %699 }
 0x190   : > { %v782_v16 = vmul.f32 0.6666667, %v778_v13  ;;  %v734_v25 = vmul.f32 %v730_v14, %v714_v7  ;;  %v711_v26 = vadd.f32 %v700_v19, %v634_v49  ;;  %vm716_vm7 = vcmp.ge.f32.partialorder %v712_v10, 1.0 }
 0x191   : > { %v7285_v15 = vsel %vm716_vm7, 1.0, %v7071_v23  ;;  %v6604_v13 = vpack.c.bf16 %v7264_v4, %v7264_v4 }
 0x192   : > { %v786_v27 = vadd.f32 %v782_v16, %v733_v12  ;;  %v779_v28 = vsub.f32 %v7277_v17, %v734_v25  ;;  %vm715_vm8 = vcmp.ge.f32.partialorder %v711_v26, 1.0  ;;  %v728_v35 = vsub.f32 1.0, %v7285_v15 }
 0x193   : > { %v7288_v31 = vsel %vm715_vm8, 1.0, %v7071_v23  ;;  %v6603_v14 = vpack.c.bf16 %v7285_v15, %v7285_v15 }
 0x194   : > { %vm790_vm9 = vcmp.ge.f32.partialorder %v786_v27, 1.0  ;;  %v783_v34 = vmul.f32 0.6666667, %v779_v28  ;;  %v727_v36 = vsub.f32 1.0, %v7288_v31  ;;  %v732_v22 = vmul.f32 %v728_v35, %v712_v10 }
 0x195   : > { %v6164_v21 = vsel %vm790_vm9, 1.0, %v7071_v23 }
 0x196   : > { %v787_v39 = vadd.f32 %v783_v34, %v734_v25  ;;  %v731_v40 = vmul.f32 %v727_v36, %v711_v26  ;;  %v802_v41 = vsub.f32 1.0, %v6164_v21  ;;  %v6608_v42 = vpack.c.bf16 %v6164_v21, %v6164_v21  ;;  %v946_v21 = vld [vmem:[%s9507_s4 + $0x30] sm:$0xff] }
 0x197   : > { %v777_v43 = vsub.f32 %v773_v37, %v732_v22 }
 0x198   : > { %vm791_vm10 = vcmp.ge.f32.partialorder %v787_v39, 1.0  ;;  %v776_v44 = vsub.f32 %v772_v38, %v731_v40  ;;  %v806_v45 = vmul.f32 %v802_v41, %v786_v27  ;;  %826 = vst.msk [vmem:[#allocation4 + $0x14] sm:$0xf] %vm654_vm1, %v6608_v42  ;;  %v948_v41 = vld [vmem:[%s9507_s4 + $0x40] sm:$0xff]  ;;  %v951_v42 = vld [vmem:[%s9507_s4 + $0x58] sm:$0xff] }
 0x199   : > { %v6165_v46 = vsel %vm791_vm10, 1.0, %v7071_v23  ;;  %v781_v47 = vmul.f32 0.6666667, %v777_v43  ;;  %v950_v43 = vld [vmem:[%s9507_s4 + $0x50] sm:$0xff] }
 0x19a   : > { %v780_v48 = vmul.f32 0.6666667, %v776_v44  ;;  %848 = vrot.lane.b32.xlu0 %v806_v45, %s7072_s21  ;;  %v803_v32 = vsub.f32 1.0, %v6165_v46  ;;  %v6609_v33 = vpack.c.bf16 %v6165_v46, %v6165_v46 }
 0x19b   : > { %v785_v49 = vadd.f32 %v781_v47, %v732_v22  ;;  %v944_v22 = vld [vmem:[%s9507_s4 + $0x20] sm:$0xff] }
 0x19c   : > { %v784_v50 = vadd.f32 %v780_v48, %v731_v40  ;;  %v807_v51 = vmul.f32 %v803_v32, %v787_v39  ;;  %827 = vst.msk [vmem:[#allocation4 + $0x1c] sm:$0xf] %vm654_vm1, %v6609_v33  ;;  %v945_v39 = vld [vmem:[%s9507_s4 + $0x28] sm:$0xff] }
 0x19d   : > { %vm789_vm11 = vcmp.ge.f32.partialorder %v785_v49, 1.0  ;;  %v949_v40 = vld [vmem:[%s9507_s4 + $0x48] sm:$0xff] }
 0x19e   : > { %vm788_vm12 = vcmp.ge.f32.partialorder %v784_v50, 1.0  ;;  %850 = vrot.lane.b32.xlu1 %v807_v51, %s7072_s21  ;;  %v6163_v52 = vsel %vm789_vm11, 1.0, %v7071_v23 }
 0x19f   : > { %v6162_v53 = vsel %vm788_vm12, 1.0, %v7071_v23  ;;  %v801_v54 = vsub.f32 1.0, %v6163_v52  ;;  %v6607_v56 = vpack.c.bf16 %v6163_v52, %v6163_v52  ;;  %v6950_v52 = vld [vmem:[%s9506_s3 + $0x10] sm:$0xff]  }
 0x1a0   : > { %v800_v55 = vsub.f32 1.0, %v6162_v53  ;;  %v6606_v57 = vpack.c.bf16 %v6162_v53, %v6162_v53  ;;  %v6951_v53 = vld [vmem:[%s9506_s3 + $0x18] sm:$0xff]  }
 0x1a1   : > { %v805_v58 = vmul.f32 %v801_v54, %v785_v49  ;;  %825 = vst.msk [vmem:[#allocation4 + $0xc] sm:$0xf] %vm654_vm1, %v6607_v56  ;;  %v6952_v54 = vld [vmem:[%s9506_s3 + $0x20] sm:$0xff]  }
 0x1a2   : > { %v804_v59 = vmul.f32 %v800_v55, %v784_v50  ;;  %824 = vst.msk [vmem:[#allocation4 + $0x4] sm:$0xf] %vm654_vm1, %v6606_v57  ;;  %v6948_v50 = vld [vmem:[%s9506_s3] sm:$0xff]   ;;  %v6953_v55 = vld [vmem:[%s9506_s3 + $0x28] sm:$0xff]  }
 0x1a3   : > { %846 = vrot.lane.b32.xlu1 %v805_v58, %s7072_s21 }
 0x1a4   : > { %844 = vrot.lane.b32.xlu0 %v804_v59, %s7072_s21 }
 0x20c   : > { %v849_v60 = vpop.permute.xlu0 %848 }
 0x20d   : > { %v858_v61 = vsub.f32 %v7269_v9, %v849_v60  ;;  %v6605_v9 = vpack.c.bf16 %v7272_v11, %v7272_v11 }
 0x20f   : > { %v862_v62 = vmul.f32 0.6666667, %v858_v61 }
 0x210   : > { %v851_v63 = vpop.permute.xlu1 %850 }
 0x211   : > { %v859_v0 = vsub.f32 %v7277_v17, %v851_v63  ;;  %872 = vrot.lane.b32.xlu0 %v862_v62, %s7072_s21  ;;  %v6602_v17 = vpack.c.bf16 %v7288_v31, %v7288_v31 }
 0x213   : > { %v863_v1 = vmul.f32 0.6666667, %v859_v0 }
 0x215   : > { %874 = vrot.lane.b32.xlu1 %v863_v1, %s7072_s21  ;;  %v847_v3 = vpop.permute.xlu1 %846 }
 0x216   : > { %v845_v5 = vpop.permute.xlu0 %844  ;;  %v857_v6 = vsub.f32 %v773_v37, %v847_v3 }
 0x217   : > { %v856_v7 = vsub.f32 %v772_v38, %v845_v5  ;;  %v947_v38 = vld [vmem:[%s9507_s4 + $0x38] sm:$0xff] }
 0x218   : > { %v861_v8 = vmul.f32 0.6666667, %v857_v6 }
 0x219   : > { %v860_v12 = vmul.f32 0.6666667, %v856_v7 }
 0x21a   : > { %870 = vrot.lane.b32.xlu1 %v861_v8, %s7072_s21 }
 0x21b   : > { %868 = vrot.lane.b32.xlu0 %v860_v12, %s7072_s21 }
 0x21e   : > { %753 = vrot.lane.b32.xlu1 %v6605_v9, %s7072_s21 }
 0x21f   : > { %751 = vrot.lane.b32.xlu0 %v6604_v13, %s7072_s21 }
 0x222   : > { %749 = vrot.lane.b32.xlu1 %v6603_v14, %s7072_s21 }
 0x223   : > { %747 = vrot.lane.b32.xlu0 %v6602_v17, %s7072_s21 }
 0x283   : > { %v873_v18 = vpop.permute.xlu0 %872 }
 0x284   : > { %v882_v19 = vadd.f32 %v873_v18, %v806_v45 }
 0x286   : > { %vm886_vm13 = vcmp.ge.f32.partialorder %v882_v19, 1.0 }
 0x287   : > { %v6172_v11 = vsel %vm886_vm13, 1.0, %v7071_v23  ;;  %v875_v4 = vpop.permute.xlu1 %874 }
 0x288   : > { %v6612_v20 = vpack.c.bf16 %v6172_v11, %v6172_v11  ;;  %v883_v24 = vadd.f32 %v875_v4, %v807_v51  ;;  %v6949_v51 = vld [vmem:[%s9506_s3 + $0x8] sm:$0xff]  }
 0x28a   : > { %vm887_vm14 = vcmp.ge.f32.partialorder %v883_v24, 1.0  ;;  %912 = vrot.lane.b32.xlu0 %v6612_v20, %s7072_s21 }
 0x28b   : > { %v6173_v16 = vsel %vm887_vm14, 1.0, %v7071_v23 }
 0x28c   : > { %v6613_v25 = vpack.c.bf16 %v6173_v16, %v6173_v16  ;;  %v871_v10 = vpop.permute.xlu1 %870 }
 0x28d   : > { %v869_v26 = vpop.permute.xlu0 %868  ;;  %v881_v27 = vadd.f32 %v871_v10, %v805_v58 }
 0x28e   : > { %v880_v28 = vadd.f32 %v869_v26, %v804_v59  ;;  %914 = vrot.lane.b32.xlu1 %v6613_v25, %s7072_s21 }
 0x28f   : > { %vm885_vm0 = vcmp.ge.f32.partialorder %v881_v27, 1.0 }
 0x290   : > { %vm884_vm2 = vcmp.ge.f32.partialorder %v880_v28, 1.0  ;;  %v6171_v29 = vsel %vm885_vm0, 1.0, %v7071_v23  ;;  %v754_v15 = vpop.permute.xlu1 %753 }
 0x291   : > { %v6170_v30 = vsel %vm884_vm2, 1.0, %v7071_v23  ;;  %v752_v31 = vpop.permute.xlu0 %751  ;;  %v6611_v34 = vpack.c.bf16 %v6171_v29, %v6171_v29  ;;  %763 = vst.msk [vmem:[#allocation4 + $0x18] sm:$0xf] %vm759_vm15, %v754_v15 }
 0x292   : > { %v6610_v35 = vpack.c.bf16 %v6170_v30, %v6170_v30  ;;  %762 = vst.msk [vmem:[#allocation4 + $0x10] sm:$0xf] %vm759_vm15, %v752_v31 }
 0x293   : > { %910 = vrot.lane.b32.xlu1 %v6611_v34, %s7072_s21 }
 0x294   : > { %908 = vrot.lane.b32.xlu0 %v6610_v35, %s7072_s21  ;;  %v750_v36 = vpop.permute.xlu1 %749 }
 0x295   : > { %v748_v37 = vpop.permute.xlu0 %747  ;;  %761 = vst.msk [vmem:[#allocation4 + $0x8] sm:$0xf] %vm759_vm15, %v750_v36 }
 0x296   : > { %760 = vst.msk [vmem:[#allocation4] sm:$0xf] %vm759_vm15, %v748_v37 }
 0x297   : > { %989 = vperm.xlu1 %6900, %v947_v38  }
 0x298   : > { %984 = vperm.xlu0 %6899, %v946_v21  }
 0x299   : > { %v6944_v32 = vld [vmem:[#allocation4 + $0x10] ss:$8 sps:$4 sm:$0xff]  }
 0x29b   : > { %979 = vperm.xlu1 %6900, %v945_v39  }
 0x29c   : > { %974 = vperm.xlu0 %6899, %v944_v22  }
 0x29d   : > { %v6947_v49 = vld [vmem:[#allocation4] ss:$8 sps:$4 sm:$0xff]  }
 0x29f   : > { %999 = vperm.xlu1 %6900, %v949_v40  }
 0x2a0   : > { %994 = vperm.xlu0 %6899, %v948_v41  }
 0x2a3   : > { %1009 = vperm.xlu1 %6900, %v951_v42  }
 0x2a4   : > { %1004 = vperm.xlu0 %6899, %v950_v43  }
 0x2fc   : > { %v913_v44 = vpop.permute.xlu0 %912 }
 0x2fd   : > { %922 = vst.msk [vmem:[#allocation4 + $0x14] sm:$0xf] %vm759_vm15, %v913_v44 }
 0x300   : > { %v915_v45 = vpop.permute.xlu1 %914 }
 0x301   : > { %923 = vst.msk [vmem:[#allocation4 + $0x1c] sm:$0xf] %vm759_vm15, %v915_v45 }
 0x305   : > { %v911_v46 = vpop.permute.xlu1 %910 }
 0x306   : > { %v909_v47 = vpop.permute.xlu0 %908  ;;  %921 = vst.msk [vmem:[#allocation4 + $0xc] sm:$0xf] %vm759_vm15, %v911_v46 }
 0x307   : > { %920 = vst.msk [vmem:[#allocation4 + $0x4] sm:$0xf] %vm759_vm15, %v909_v47 }
 0x308   : > { %v6942_v48 = vld [vmem:[#allocation4 + $0x14] ss:$8 sps:$4 sm:$0xff]  }
 0x309   : > { %1093 = vmatprep.subr.bf16.mxu0 %v6942_v48 }
 0x30a   : > { %1094 = vmatpush1.bf16.msra.mxu0 %v6944_v32 }
 0x30e   : > { %v6945_v33 = vld [vmem:[#allocation4 + $0x4] ss:$8 sps:$4 sm:$0xff]  }
 0x30f   : > { %1095 = vmatprep.subr.bf16.mxu0 %v6945_v33 }
 0x310   : > { %1096 = vmatpush1.bf16.msra.mxu0 %v6947_v49 }
 0x312   : > { %v7409_v0 = vpop.permute.xlu1 %989 }
 0x313   : > { %6188 = vmatmul.mubr.msk.bf16.vlgmr.msra.gmra.mxu0 %vm1062_vm3, %v6948_v50  ;;  %v7403_v61 = vpop.permute.xlu0 %984 }
 0x314   : > { %1123 = vmatprep.mubr.bf16.mxu0 %v9523_v2 }
 0x316   : > { %v7421_v12 = vpop.permute.xlu1 %979 }
 0x317   : > { %v7413_v3 = vpop.permute.xlu0 %974 }
 0x31a   : > { %v7460_v41 = vpop.permute.xlu1 %999 }
 0x31b   : > { %6189 = vmatmul.mubr.msk.bf16.gmra.mxu0 %vm1062_vm3, %v6949_v51  ;;  %v7446_v31 = vpop.permute.xlu0 %994 }
 0x31c   : > { %1133 = vmatprep.mubr.bf16.mxu0 %v9523_v2 }
 0x31f   : > { %v7478_v50 = vpop.permute.xlu0 %1004 }
 0x323   : > { %6190 = vmatmul.mubr.msk.bf16.gmra.mxu0 %vm1062_vm3, %v6950_v52 }
 0x324   : > { %1143 = vmatprep.mubr.bf16.mxu0 %v9523_v2 }
 0x32b   : > { %6191 = vmatmul.mubr.msk.bf16.gmra.mxu0 %vm1062_vm3, %v6951_v53 }
 0x32c   : > { %1153 = vmatprep.mubr.bf16.mxu0 %v9523_v2 }
 0x333   : > { %6192 = vmatmul.mubr.msk.bf16.gmra.mxu0 %vm1062_vm3, %v6952_v54 }
 0x334   : > { %1163 = vmatprep.mubr.bf16.mxu0 %v9523_v2 }
 0x33b   : > { %6193 = vmatmul.mubr.msk.bf16.gmra.mxu0 %vm1062_vm3, %v6953_v55 }
 0x3d3   : > { %v7393_v56 = vpop.f32.mrf.mxu0 }
 0x3d5   : > { %v7395_v57 = vpop.f32.mrf.mxu0 }
 0x3d7   : > { %v7397_v58 = vpop.f32.mrf.mxu0 }
 0x3d9   : > { %v7399_v59 = vpop.f32.mrf.mxu0 }
 0x3db   : > { %v7401_v60 = vpop.f32.mrf.mxu0 }
 0x3dd   : > { %v7405_v62 = vpop.f32.mrf.mxu0 }
 0x3df   : > { %v7407_v63 = vpop.f32.mrf.mxu0 }
 0x3e1   : > { %v7411_v1 = vpop.f32.mrf.mxu0 }
 0x3e3   : > { %v1135_v5 = vpop.f32.mrf.mxu0 }
 0x3e4   : > { %v7416_v6 = vadd.f32 %v1135_v5, %v7413_v3 }
 0x3e5   : > { %v7418_v7 = vpop.f32.mrf.mxu0 }
 0x3e6   : > { %v1214_v8 = vmul.f32 0.6666667, %v7416_v6 }
 0x3e7   : > { %v1139_v9 = vpop.f32.mrf.mxu0 }
 0x3e8   : > { %v7424_v13 = vadd.f32 %v1139_v9, %v7421_v12  ;;  %vm1238_vm4 = vcmp.ge.f32.partialorder %v1214_v8, 1.0 }
 0x3e9   : > { %v7426_v14 = vpop.f32.mrf.mxu0  ;;  %v6198_v17 = vsel %vm1238_vm4, 1.0, %v7071_v23 }
 0x3ea   : > { %v1215_v18 = vmul.f32 0.6666667, %v7424_v13  ;;  %v6618_v19 = vpack.c.bf16 %v6198_v17, %v6198_v17  ;;  %v1274_v35 = vsub.f32 1.0, %v6198_v17 }
 0x3eb   : > { %v1145_v11 = vpop.f32.mrf.mxu0 }
 0x3ec   : > { %v7431_v4 = vadd.f32 %v1145_v11, %v7403_v61  ;;  %vm1239_vm5 = vcmp.ge.f32.partialorder %v1215_v18, 1.0  ;;  %1346 = vst.msk [vmem:[#allocation3 + $0x20] sm:$0xf] %vm654_vm1, %v6618_v19  ;;  %v7462_v43 = vmul.f32 %v1274_v35, %v1214_v8 }
 0x3ed   : > { %v7434_v20 = vpop.f32.mrf.mxu0  ;;  %v6199_v24 = vsel %vm1239_vm5, 1.0, %v7071_v23 }
 0x3ee   : > { %v1216_v16 = vmul.f32 0.6666667, %v7431_v4  ;;  %v6619_v25 = vpack.c.bf16 %v6199_v24, %v6199_v24  ;;  %v1275_v46 = vsub.f32 1.0, %v6199_v24 }
 0x3ef   : > { %v1149_v10 = vpop.f32.mrf.mxu0 }
 0x3f0   : > { %v7439_v26 = vadd.f32 %v1149_v10, %v7409_v0  ;;  %vm1240_vm6 = vcmp.ge.f32.partialorder %v1216_v16, 1.0  ;;  %1347 = vst.msk [vmem:[#allocation3 + $0x28] sm:$0xf] %vm654_vm1, %v6619_v25  ;;  %v7481_v53 = vmul.f32 %v1275_v46, %v1215_v18  ;;  %v7493_v18 = vpop.permute.xlu1 %1009 }
 0x3f1   : > { %v7442_v27 = vpop.f32.mrf.mxu0  ;;  %v6200_v28 = vsel %vm1240_vm6, 1.0, %v7071_v23 }
 0x3f2   : > { %v1276_v29 = vsub.f32 1.0, %v6200_v28  ;;  %v1217_v30 = vmul.f32 0.6666667, %v7439_v26  ;;  %v6620_v15 = vpack.c.bf16 %v6200_v28, %v6200_v28 }
 0x3f3   : > { %v1155_v34 = vpop.f32.mrf.mxu0 }
 0x3f4   : > { %v7449_v36 = vadd.f32 %v1155_v34, %v7446_v31  ;;  %v7451_v37 = vmul.f32 %v1276_v29, %v1216_v16  ;;  %vm1241_vm7 = vcmp.ge.f32.partialorder %v1217_v30, 1.0  ;;  %1348 = vst.msk [vmem:[#allocation3 + $0x30] sm:$0xf] %vm654_vm1, %v6620_v15 }
 0x3f5   : > { %v7454_v38 = vpop.f32.mrf.mxu0  ;;  %v6201_v21 = vsel %vm1241_vm7, 1.0, %v7071_v23 }
 0x3f6   : > { %1390 = vrot.lane.b32.xlu0 %v7451_v37, %s7072_s21  ;;  %v1277_v39 = vsub.f32 1.0, %v6201_v21  ;;  %v1218_v22 = vmul.f32 0.6666667, %v7449_v36  ;;  %v6621_v40 = vpack.c.bf16 %v6201_v21, %v6201_v21 }
 0x3f7   : > { %v1159_v42 = vpop.f32.mrf.mxu0 }
 0x3f8   : > { %v7465_v44 = vadd.f32 %v1159_v42, %v7460_v41  ;;  %v7467_v45 = vmul.f32 %v1277_v39, %v1217_v30  ;;  %vm1242_vm8 = vcmp.ge.f32.partialorder %v1218_v22, 1.0  ;;  %1349 = vst.msk [vmem:[#allocation3 + $0x38] sm:$0xf] %vm654_vm1, %v6621_v40 }
 0x3f9   : > { %v7470_v47 = vpop.f32.mrf.mxu0  ;;  %v6202_v48 = vsel %vm1242_vm8, 1.0, %v7071_v23 }
 0x3fa   : > { %1392 = vrot.lane.b32.xlu1 %v7467_v45, %s7072_s21  ;;  %1386 = vrot.lane.b32.xlu0 %v7462_v43, %s7072_s21  ;;  %v1278_v32 = vsub.f32 1.0, %v6202_v48  ;;  %v1219_v33 = vmul.f32 0.6666667, %v7465_v44  ;;  %v6622_v49 = vpack.c.bf16 %v6202_v48, %v6202_v48 }
 0x3fb   : > { %v1165_v51 = vpop.f32.mrf.mxu0 }
 0x3fc   : > { %v1166_v52 = vadd.f32 %v1165_v51, %v7478_v50  ;;  %v7483_v54 = vmul.f32 %v1278_v32, %v1218_v22  ;;  %vm1243_vm9 = vcmp.ge.f32.partialorder %v1219_v33, 1.0  ;;  %1350 = vst.msk [vmem:[#allocation3 + $0x40] sm:$0xf] %vm654_vm1, %v6622_v49 }
 0x3fd   : > { %v7486_v55 = vpop.f32.mrf.mxu0  ;;  %v6203_v5 = vsel %vm1243_vm9, 1.0, %v7071_v23 }
 0x3fe   : > { %1388 = vrot.lane.b32.xlu1 %v7481_v53, %s7072_s21  ;;  %1394 = vrot.lane.b32.xlu0 %v7483_v54, %s7072_s21  ;;  %v1279_v8 = vsub.f32 1.0, %v6203_v5  ;;  %v1220_v9 = vmul.f32 0.6666667, %v1166_v52  ;;  %v6623_v17 = vpack.c.bf16 %v6203_v5, %v6203_v5 }
 0x3ff   : > { %v1169_v19 = vpop.f32.mrf.mxu0 }
 0x400   : > { %v1170_v11 = vadd.f32 %v1169_v19, %v7493_v18  ;;  %v7496_v24 = vmul.f32 %v1279_v8, %v1219_v33  ;;  %vm1244_vm10 = vcmp.ge.f32.partialorder %v1220_v9, 1.0  ;;  %1351 = vst.msk [vmem:[#allocation3 + $0x48] sm:$0xf] %vm654_vm1, %v6623_v17 }
 0x401   : > { %v6204_v16 = vsel %vm1244_vm10, 1.0, %v7071_v23 }
 0x402   : > { %1396 = vrot.lane.b32.xlu1 %v7496_v24, %s7072_s21  ;;  %v1280_v25 = vsub.f32 1.0, %v6204_v16  ;;  %v1221_v10 = vmul.f32 0.6666667, %v1170_v11  ;;  %v6624_v28 = vpack.c.bf16 %v6204_v16, %v6204_v16 }
 0x404   : > { %v7502_v29 = vmul.f32 %v1280_v25, %v1220_v9  ;;  %vm1245_vm11 = vcmp.ge.f32.partialorder %v1221_v10, 1.0  ;;  %1352 = vst.msk [vmem:[#allocation3 + $0x50] sm:$0xf] %vm654_vm1, %v6624_v28 }
 0x405   : > { %v6205_v30 = vsel %vm1245_vm11, 1.0, %v7071_v23 }
 0x406   : > { %1398 = vrot.lane.b32.xlu0 %v7502_v29, %s7072_s21  ;;  %v1281_v15 = vsub.f32 1.0, %v6205_v30  ;;  %v6625_v34 = vpack.c.bf16 %v6205_v30, %v6205_v30 }
 0x408   : > { %v7508_v35 = vmul.f32 %v1281_v15, %v1221_v10  ;;  %1353 = vst.msk [vmem:[#allocation3 + $0x58] sm:$0xf] %vm654_vm1, %v6625_v34  ;;  %v942_v10 = vld [vmem:[%s9507_s4 + $0x10] sm:$0xff] }
 0x40a   : > { %1400 = vrot.lane.b32.xlu1 %v7508_v35, %s7072_s21 }
 0x468   : > { %v1391_v21 = vpop.permute.xlu0 %1390 }
 0x469   : > { %v1420_v39 = vsub.f32 %v7431_v4, %v1391_v21 }
 0x46b   : > { %v1432_v22 = vmul.f32 0.6666667, %v1420_v39 }
 0x46c   : > { %v1393_v40 = vpop.permute.xlu1 %1392  ;;  %v1387_v42 = vpop.permute.xlu0 %1386 }
 0x46d   : > { %v1421_v46 = vsub.f32 %v7439_v26, %v1393_v40  ;;  %v1418_v48 = vsub.f32 %v7416_v6, %v1387_v42  ;;  %1462 = vrot.lane.b32.xlu0 %v1432_v22, %s7072_s21 }
 0x46f   : > { %v1433_v32 = vmul.f32 0.6666667, %v1421_v46  ;;  %v1430_v33 = vmul.f32 0.6666667, %v1418_v48  ;;  %v7548_v46 = vadd.f32 %v7434_v20, %v7403_v61  ;;  %v7562_v20 = vadd.f32 %v7418_v7, %v7413_v3 }
 0x470   : > { %v1389_v49 = vpop.permute.xlu1 %1388  ;;  %v1395_v51 = vpop.permute.xlu0 %1394 }
 0x471   : > { %v1419_v5 = vsub.f32 %v7424_v13, %v1389_v49  ;;  %v1422_v8 = vsub.f32 %v7449_v36, %v1395_v51  ;;  %1464 = vrot.lane.b32.xlu1 %v1433_v32, %s7072_s21  ;;  %1458 = vrot.lane.b32.xlu0 %v1430_v33, %s7072_s21 }
 0x473   : > { %v1431_v4 = vmul.f32 0.6666667, %v1419_v5  ;;  %v1434_v9 = vmul.f32 0.6666667, %v1422_v8  ;;  %v7566_v5 = vadd.f32 %v7442_v27, %v7409_v0  ;;  %v7577_v0 = vadd.f32 %v7426_v14, %v7421_v12 }
 0x474   : > { %v1397_v17 = vpop.permute.xlu1 %1396 }
 0x475   : > { %v1423_v26 = vsub.f32 %v7465_v44, %v1397_v17  ;;  %1460 = vrot.lane.b32.xlu1 %v1431_v4, %s7072_s21  ;;  %1466 = vrot.lane.b32.xlu0 %v1434_v9, %s7072_s21  ;;  %v943_v44 = vld [vmem:[%s9507_s4 + $0x18] sm:$0xff] }
 0x477   : > { %v1435_v6 = vmul.f32 0.6666667, %v1423_v26 }
 0x478   : > { %v1399_v19 = vpop.permute.xlu0 %1398 }
 0x479   : > { %v1424_v16 = vsub.f32 %v1166_v52, %v1399_v19  ;;  %1468 = vrot.lane.b32.xlu1 %v1435_v6, %s7072_s21  ;;  %v940_v52 = vld [vmem:[%s9507_s4] sm:$0xff] }
 0x47b   : > { %v1436_v13 = vmul.f32 0.6666667, %v1424_v16 }
 0x47c   : > { %v1401_v36 = vpop.permute.xlu1 %1400 }
 0x47d   : > { %v1425_v25 = vsub.f32 %v1170_v11, %v1401_v36  ;;  %1470 = vrot.lane.b32.xlu0 %v1436_v13, %s7072_s21  ;;  %v941_v11 = vld [vmem:[%s9507_s4 + $0x8] sm:$0xff] }
 0x47f   : > { %v1437_v28 = vmul.f32 0.6666667, %v1425_v25  ;;  %v7585_v25 = vadd.f32 %v7454_v38, %v7446_v31 }
 0x481   : > { %1472 = vrot.lane.b32.xlu1 %v1437_v28, %s7072_s21  ;;  %964 = vperm.xlu0 %6899, %v942_v10  }
 0x485   : > { %969 = vperm.xlu1 %6900, %v943_v44   ;;  %954 = vperm.xlu0 %6899, %v940_v52  }
 0x489   : > { %959 = vperm.xlu1 %6900, %v941_v11  }
 0x4df   : > { %v1463_v30 = vpop.permute.xlu0 %1462 }
 0x4e0   : > { %v1492_v15 = vadd.f32 %v1463_v30, %v7451_v37 }
 0x4e2   : > { %vm1504_vm12 = vcmp.ge.f32.partialorder %v1492_v15, 1.0 }
 0x4e3   : > { %v7541_v34 = vsel %vm1504_vm12, 1.0, %v7071_v23  ;;  %v1465_v21 = vpop.permute.xlu1 %1464  ;;  %v1459_v39 = vpop.permute.xlu0 %1458 }
 0x4e4   : > { %v1540_v22 = vsub.f32 1.0, %v7541_v34  ;;  %v1493_v40 = vadd.f32 %v1465_v21, %v7467_v45  ;;  %v1490_v42 = vadd.f32 %v1459_v39, %v7462_v43 }
 0x4e6   : > { %v1552_v48 = vmul.f32 %v1540_v22, %v1492_v15  ;;  %vm1505_vm13 = vcmp.ge.f32.partialorder %v1493_v40, 1.0  ;;  %vm1502_vm14 = vcmp.ge.f32.partialorder %v1490_v42, 1.0  ;;  %v7600_v15 = vadd.f32 %v7470_v47, %v7460_v41 }
 0x4e7   : > { %v7551_v37 = vsel %vm1505_vm13, 1.0, %v7071_v23  ;;  %v7554_v32 = vsel %vm1502_vm14, 1.0, %v7071_v23  ;;  %v1461_v33 = vpop.permute.xlu1 %1460  ;;  %v1467_v49 = vpop.permute.xlu0 %1466 }
 0x4e8   : > { %v1660_v51 = vsub.f32 %v7548_v46, %v1552_v48  ;;  %v1541_v45 = vsub.f32 1.0, %v7551_v37  ;;  %v1538_v43 = vsub.f32 1.0, %v7554_v32  ;;  %v1491_v61 = vadd.f32 %v1461_v33, %v7481_v53 }
 0x4e9   : > { %v1494_v8 = vadd.f32 %v1467_v49, %v7483_v54 }
 0x4ea   : > { %v1672_v4 = vmul.f32 0.6666667, %v1660_v51  ;;  %v1553_v9 = vmul.f32 %v1541_v45, %v1493_v40  ;;  %v1550_v17 = vmul.f32 %v1538_v43, %v1490_v42  ;;  %vm1503_vm0 = vcmp.ge.f32.partialorder %v1491_v61, 1.0 }
 0x4eb   : > { %v7570_v26 = vsel %vm1503_vm0, 1.0, %v7071_v23  ;;  %vm1506_vm2 = vcmp.ge.f32.partialorder %v1494_v8, 1.0  ;;  %v1469_v6 = vpop.permute.xlu1 %1468  ;;  %v7616_v43 = vadd.f32 %v7486_v55, %v7478_v50 }
 0x4ec   : > { %v1684_v53 = vadd.f32 %v1672_v4, %v1552_v48  ;;  %v1661_v19 = vsub.f32 %v7566_v5, %v1553_v9  ;;  %v1658_v3 = vsub.f32 %v7562_v20, %v1550_v17  ;;  %v1539_v7 = vsub.f32 1.0, %v7570_v26 }
 0x4ed   : > { %v7580_v27 = vsel %vm1506_vm2, 1.0, %v7071_v23  ;;  %v1495_v54 = vadd.f32 %v1469_v6, %v7496_v24 }
 0x4ee   : > { %vm1696_vm4 = vcmp.ge.f32.partialorder %v1684_v53, 1.0  ;;  %v1673_v16 = vmul.f32 0.6666667, %v1661_v19  ;;  %v1670_v13 = vmul.f32 0.6666667, %v1658_v3  ;;  %v1551_v36 = vmul.f32 %v1539_v7, %v1491_v61  ;;  %v1171_v61 = vpop.f32.mrf.mxu0 }
 0x4ef   : > { %v1542_v10 = vsub.f32 1.0, %v7580_v27  ;;  %vm1507_vm5 = vcmp.ge.f32.partialorder %v1495_v54, 1.0  ;;  %v1471_v28 = vpop.permute.xlu0 %1470  ;;  %v7589_v12 = vsel %vm1696_vm4, 1.0, %v7071_v23 }
 0x4f0   : > { %v1685_v14 = vadd.f32 %v1673_v16, %v1553_v9  ;;  %v1682_v44 = vadd.f32 %v1670_v13, %v1550_v17  ;;  %v1659_v52 = vsub.f32 %v7577_v0, %v1551_v36  ;;  %v7593_v24 = vsel %vm1507_vm5, 1.0, %v7071_v23 }
 0x4f1   : > { %v1554_v11 = vmul.f32 %v1542_v10, %v1494_v8  ;;  %v1543_v30 = vsub.f32 1.0, %v7593_v24  ;;  %v1496_v31 = vadd.f32 %v1471_v28, %v7502_v29  ;;  %v1732_v38 = vsub.f32 1.0, %v7589_v12 }
 0x4f2   : > { %vm1697_vm6 = vcmp.ge.f32.partialorder %v1685_v14, 1.0  ;;  %vm1694_vm7 = vcmp.ge.f32.partialorder %v1682_v44, 1.0  ;;  %v1671_v21 = vmul.f32 0.6666667, %v1659_v52 }
 0x4f3   : > { %v1662_v39 = vsub.f32 %v7585_v25, %v1554_v11  ;;  %v1555_v22 = vmul.f32 %v1543_v30, %v1495_v54  ;;  %vm1508_vm8 = vcmp.ge.f32.partialorder %v1496_v31, 1.0  ;;  %v1473_v40 = vpop.permute.xlu1 %1472  ;;  %v7603_v42 = vmul.f32 %v1732_v38, %v1684_v53 }
 0x4f4   : > { %v1683_v48 = vadd.f32 %v1671_v21, %v1551_v36  ;;  %v7606_v33 = vsel %vm1508_vm8, 1.0, %v7071_v23  ;;  %v1497_v29 = vadd.f32 %v1473_v40, %v7508_v35  ;;  %v6249_v49 = vsel %vm1697_vm6, 1.0, %v7071_v23 }
 0x4f5   : > { %v1674_v41 = vmul.f32 0.6666667, %v1662_v39  ;;  %v1663_v47 = vsub.f32 %v7600_v15, %v1555_v22  ;;  %v1544_v51 = vsub.f32 1.0, %v7606_v33  ;;  %1846 = vrot.lane.b32.xlu0 %v7603_v42, %s7072_s21  ;;  %v1733_v45 = vsub.f32 1.0, %v6249_v49 }
 0x4f6   : > { %vm1695_vm9 = vcmp.ge.f32.partialorder %v1683_v48, 1.0  ;;  %vm1509_vm10 = vcmp.ge.f32.partialorder %v1497_v29, 1.0  ;;  %v6246_v35 = vsel %vm1694_vm7, 1.0, %v7071_v23  ;;  %v7629_v54 = vadd.f32 %v1171_v61, %v7493_v18 }
 0x4f7   : > { %v1686_v8 = vadd.f32 %v1674_v41, %v1554_v11  ;;  %v1675_v4 = vmul.f32 0.6666667, %v1663_v47  ;;  %v1556_v9 = vmul.f32 %v1544_v51, %v1496_v31  ;;  %v7621_v17 = vsel %vm1509_vm10, 1.0, %v7071_v23 }
 0x4f8   : > { %v1545_v6 = vsub.f32 1.0, %v7621_v17  ;;  %v7624_v53 = vmul.f32 %v1733_v45, %v1685_v14  ;;  %v1730_v19 = vsub.f32 1.0, %v6246_v35  ;;  %v6247_v50 = vsel %vm1695_vm9, 1.0, %v7071_v23 }
 0x4f9   : > { %vm1698_vm11 = vcmp.ge.f32.partialorder %v1686_v8, 1.0  ;;  %v1687_v55 = vadd.f32 %v1675_v4, %v1555_v22  ;;  %v1664_v3 = vsub.f32 %v7616_v43, %v1556_v9  ;;  %v1731_v7 = vsub.f32 1.0, %v6247_v50 }
 0x4fa   : > { %v1557_v16 = vmul.f32 %v1545_v6, %v1497_v29  ;;  %1848 = vrot.lane.b32.xlu1 %v7624_v53, %s7072_s21  ;;  %v7633_v13 = vmul.f32 %v1730_v19, %v1682_v44  ;;  %v6250_v36 = vsel %vm1698_vm11, 1.0, %v7071_v23  ;;  %v6644_v30 = vpack.c.bf16 %v7589_v12, %v7589_v12 }
 0x4fb   : > { %vm1699_vm12 = vcmp.ge.f32.partialorder %v1687_v55, 1.0  ;;  %v1676_v10 = vmul.f32 0.6666667, %v1664_v3  ;;  %v7636_v28 = vmul.f32 %v1731_v7, %v1683_v48  ;;  %v1734_v14 = vsub.f32 1.0, %v6250_v36 }
 0x4fc   : > { %v1665_v52 = vsub.f32 %v7629_v54, %v1557_v16  ;;  %1842 = vrot.lane.b32.xlu0 %v7633_v13, %s7072_s21  ;;  %v965_v18 = vpop.permute.xlu0 %964  ;;  %v6251_v11 = vsel %vm1699_vm12, 1.0, %v7071_v23  ;;  %v6645_v44 = vpack.c.bf16 %v6249_v49, %v6249_v49  ;;  %1804 = vst.msk [vmem:[#allocation3 + $0x34] sm:$0xf] %vm654_vm1, %v6644_v30  ;;  %v6642_v12 = vpack.c.bf16 %v6246_v35, %v6246_v35 }
 0x4fd   : > { %v1688_v31 = vadd.f32 %v1676_v10, %v1556_v9  ;;  %v7644_v38 = vmul.f32 %v1734_v14, %v1686_v8  ;;  %v7647_v21 = vadd.f32 %v7401_v60, %v965_v18  ;;  %v7650_v39 = vadd.f32 %v7405_v62, %v965_v18 }
 0x4fe   : > { %v1677_v22 = vmul.f32 0.6666667, %v1665_v52  ;;  %1844 = vrot.lane.b32.xlu1 %v7636_v28, %s7072_s21  ;;  %v1735_v40 = vsub.f32 1.0, %v6251_v11  ;;  %1805 = vst.msk [vmem:[#allocation3 + $0x3c] sm:$0xf] %vm654_vm1, %v6645_v44  ;;  %v6643_v48 = vpack.c.bf16 %v6247_v50, %v6247_v50  ;;  %v6646_v62 = vpack.c.bf16 %v6250_v36, %v6250_v36 }
 0x4ff   : > { %vm1700_vm13 = vcmp.ge.f32.partialorder %v1688_v31, 1.0  ;;  %1178 = vst [vmem:[#allocation2 + $0x20] sm:$0xff] %v7647_v21  ;;  %1179 = vst [vmem:[#allocation2 + $0x28] sm:$0xff] %v7650_v39  ;;  %v1212_v60 = vmul.f32 0.6666667, %v7647_v21  ;;  %v6647_v29 = vpack.c.bf16 %v6251_v11, %v6251_v11  ;;  %vm2110_vm12 = vcmask 523264  }
 0x500   : > { %v1689_v49 = vadd.f32 %v1677_v22, %v1557_v16  ;;  %1850 = vrot.lane.b32.xlu0 %v7644_v38, %s7072_s21  ;;  %v7661_v41 = vmul.f32 %v1735_v40, %v1687_v55  ;;  %v970_v47 = vpop.permute.xlu1 %969  ;;  %v955_v51 = vpop.permute.xlu0 %954  ;;  %v6252_v45 = vsel %vm1700_vm13, 1.0, %v7071_v23  ;;  %1802 = vst.msk [vmem:[#allocation3 + $0x24] sm:$0xf] %vm654_vm1, %v6642_v12  ;;  %1803 = vst.msk [vmem:[#allocation3 + $0x2c] sm:$0xf] %vm654_vm1, %v6643_v48 }
 0x501   : > { %v7667_v35 = vadd.f32 %v7407_v63, %v970_v47  ;;  %v7670_v61 = vadd.f32 %v7411_v1, %v970_v47  ;;  %v7673_v8 = vadd.f32 %v7393_v56, %v955_v51  ;;  %v7676_v4 = vadd.f32 %v7395_v57, %v955_v51  ;;  %1806 = vst.msk [vmem:[#allocation3 + $0x44] sm:$0xf] %vm654_vm1, %v6646_v62 }
 0x502   : > { %1807 = vst.msk [vmem:[#allocation3 + $0x4c] sm:$0xf] %vm654_vm1, %v6647_v29  ;;  %vm1701_vm14 = vcmp.ge.f32.partialorder %v1689_v49, 1.0  ;;  %1852 = vrot.lane.b32.xlu1 %v7661_v41, %s7072_s21  ;;  %v1736_v9 = vsub.f32 1.0, %v6252_v45  ;;  %vm1236_vm0 = vcmp.ge.f32.partialorder %v1212_v60, 1.0  ;;  %v6648_v63 = vpack.c.bf16 %v6252_v45, %v6252_v45 }
 0x503   : > { %1180 = vst [vmem:[#allocation2 + $0x30] sm:$0xff] %v7667_v35  ;;  %1181 = vst [vmem:[#allocation2 + $0x38] sm:$0xff] %v7670_v61  ;;  %v6253_v56 = vsel %vm1701_vm14, 1.0, %v7071_v23  ;;  %v6196_v57 = vsel %vm1236_vm0, 1.0, %v7071_v23  ;;  %v1213_v1 = vmul.f32 0.6666667, %v7667_v35 }
 0x504   : > { %1174 = vst [vmem:[#allocation2] sm:$0xff] %v7673_v8  ;;  %1175 = vst [vmem:[#allocation2 + $0x8] sm:$0xff] %v7676_v4  ;;  %v1210_v6 = vmul.f32 0.6666667, %v7673_v8  ;;  %v960_v19 = vpop.permute.xlu1 %959  ;;  %v7690_v50 = vmul.f32 %v1736_v9, %v1688_v31  ;;  %v1737_v55 = vsub.f32 1.0, %v6253_v56  ;;  %v1272_v3 = vsub.f32 1.0, %v6196_v57 }
 0x505   : > { %1808 = vst.msk [vmem:[#allocation3 + $0x54] sm:$0xf] %vm654_vm1, %v6648_v63  ;;  %v6649_v7 = vpack.c.bf16 %v6253_v56, %v6253_v56  ;;  %v7694_v16 = vadd.f32 %v7397_v58, %v960_v19  ;;  %v7697_v36 = vadd.f32 %v7399_v59, %v960_v19  ;;  %vm1237_vm2 = vcmp.ge.f32.partialorder %v1213_v1, 1.0 }
 0x506   : > { %vm1234_vm4 = vcmp.ge.f32.partialorder %v1210_v6, 1.0  ;;  %1854 = vrot.lane.b32.xlu0 %v7690_v50, %s7072_s21  ;;  %v7701_v10 = vmul.f32 %v1737_v55, %v1689_v49  ;;  %v7703_v14 = vmul.f32 %v1272_v3, %v1212_v60  ;;  %v6197_v52 = vsel %vm1237_vm2, 1.0, %v7071_v23 }
 0x507   : > { %v6194_v18 = vsel %vm1234_vm4, 1.0, %v7071_v23  ;;  %1809 = vst.msk [vmem:[#allocation3 + $0x5c] sm:$0xf] %vm654_vm1, %v6649_v7  ;;  %1176 = vst [vmem:[#allocation2 + $0x10] sm:$0xff] %v7694_v16  ;;  %v1273_v58 = vsub.f32 1.0, %v6197_v52  ;;  %v6616_v30 = vpack.c.bf16 %v6196_v57, %v6196_v57  ;;  %v6617_v44 = vpack.c.bf16 %v6197_v52, %v6197_v52 }
 0x508   : > { %1177 = vst [vmem:[#allocation2 + $0x18] sm:$0xff] %v7697_v36  ;;  %v1270_v59 = vsub.f32 1.0, %v6194_v18  ;;  %v1211_v11 = vmul.f32 0.6666667, %v7694_v16  ;;  %1856 = vrot.lane.b32.xlu1 %v7701_v10, %s7072_s21  ;;  %v6614_v31 = vpack.c.bf16 %v6194_v18, %v6194_v18 }
 0x509   : > { %v7713_v22 = vmul.f32 %v1273_v58, %v1213_v1  ;;  %1344 = vst.msk [vmem:[#allocation3 + $0x10] sm:$0xf] %vm654_vm1, %v6616_v30  ;;  %1345 = vst.msk [vmem:[#allocation3 + $0x18] sm:$0xf] %vm654_vm1, %v6617_v44 }
 0x50a   : > { %v7715_v40 = vmul.f32 %v1270_v59, %v1210_v6  ;;  %vm1235_vm5 = vcmp.ge.f32.partialorder %v1211_v11, 1.0  ;;  %1342 = vst.msk [vmem:[#allocation3] sm:$0xf] %vm654_vm1, %v6614_v31 }
 0x50b   : > { %v6195_v12 = vsel %vm1235_vm5, 1.0, %v7071_v23 }
 0x50c   : > { %v1271_v48 = vsub.f32 1.0, %v6195_v12  ;;  %v6615_v60 = vpack.c.bf16 %v6195_v12, %v6195_v12 }
 0x50e   : > { %v7721_v62 = vmul.f32 %v1271_v48, %v1211_v11  ;;  %1343 = vst.msk [vmem:[#allocation3 + $0x8] sm:$0xf] %vm654_vm1, %v6615_v60  ;;  %v6631_v11 = vpack.c.bf16 %v7570_v26, %v7570_v26 }
 0x567   : > { %v1847_v29 = vpop.permute.xlu0 %1846 }
 0x568   : > { %v1876_v9 = vsub.f32 %v7548_v46, %v1847_v29 }
 0x56a   : > { %v1888_v6 = vmul.f32 0.6666667, %v1876_v9 }
 0x56c   : > { %v1849_v49 = vpop.permute.xlu1 %1848 }
 0x56d   : > { %v1877_v57 = vsub.f32 %v7566_v5, %v1849_v49 }
 0x56e   : > { %v1843_v47 = vpop.permute.xlu0 %1842 }
 0x56f   : > { %v1874_v51 = vsub.f32 %v7562_v20, %v1843_v47  ;;  %v1889_v19 = vmul.f32 0.6666667, %v1877_v57 }
 0x570   : > { %v1845_v45 = vpop.permute.xlu1 %1844 }
 0x571   : > { %v1886_v63 = vmul.f32 0.6666667, %v1874_v51  ;;  %v1875_v56 = vsub.f32 %v7577_v0, %v1845_v45  ;;  %v6634_v45 = vpack.c.bf16 %v7580_v27, %v7580_v27 }
 0x572   : > { %v1851_v20 = vpop.permute.xlu0 %1850 }
 0x573   : > { %v1887_v1 = vmul.f32 0.6666667, %v1875_v56  ;;  %1914 = vrot.lane.b32.xlu0 %v1886_v63, %s7072_s21  ;;  %v1878_v0 = vsub.f32 %v7585_v25, %v1851_v20 }
 0x574   : > { %v1853_v46 = vpop.permute.xlu1 %1852 }
 0x575   : > { %1916 = vrot.lane.b32.xlu1 %v1887_v1, %s7072_s21  ;;  %v1879_v55 = vsub.f32 %v7600_v15, %v1853_v46  ;;  %v1890_v7 = vmul.f32 0.6666667, %v1878_v0  ;;  %v6632_v15 = vpack.c.bf16 %v7541_v34, %v7541_v34 }
 0x577   : > { %1918 = vrot.lane.b32.xlu0 %v1888_v6, %s7072_s21  ;;  %v1891_v18 = vmul.f32 0.6666667, %v1879_v55 }
 0x578   : > { %v1855_v5 = vpop.permute.xlu0 %1854 }
 0x579   : > { %1920 = vrot.lane.b32.xlu1 %v1889_v19, %s7072_s21  ;;  %v1880_v52 = vsub.f32 %v7616_v43, %v1855_v5  ;;  %v6633_v43 = vpack.c.bf16 %v7551_v37, %v7551_v37 }
 0x57a   : > { %v1857_v3 = vpop.permute.xlu1 %1856 }
 0x57b   : > { %1382 = vrot.lane.b32.xlu0 %v7703_v14, %s7072_s21  ;;  %v1881_v58 = vsub.f32 %v7629_v54, %v1857_v3  ;;  %v1892_v25 = vmul.f32 0.6666667, %v1880_v52  ;;  %v6630_v54 = vpack.c.bf16 %v7554_v32, %v7554_v32 }
 0x57d   : > { %1384 = vrot.lane.b32.xlu1 %v7713_v22, %s7072_s21  ;;  %v1893_v59 = vmul.f32 0.6666667, %v1881_v58 }
 0x57f   : > { %1378 = vrot.lane.b32.xlu0 %v7715_v40, %s7072_s21 }
 0x581   : > { %1380 = vrot.lane.b32.xlu1 %v7721_v62, %s7072_s21 }
 0x583   : > { %1922 = vrot.lane.b32.xlu0 %v1890_v7, %s7072_s21 }
 0x585   : > { %1924 = vrot.lane.b32.xlu1 %v1891_v18, %s7072_s21 }
 0x587   : > { %1926 = vrot.lane.b32.xlu0 %v1892_v25, %s7072_s21 }
 0x589   : > { %1928 = vrot.lane.b32.xlu1 %v1893_v59, %s7072_s21 }
 0x58b   : > { %1606 = vrot.lane.b32.xlu0 %v6632_v15, %s7072_s21 }
 0x58d   : > { %1608 = vrot.lane.b32.xlu1 %v6633_v43, %s7072_s21 }
 0x58f   : > { %1602 = vrot.lane.b32.xlu0 %v6630_v54, %s7072_s21 }
 0x591   : > { %1604 = vrot.lane.b32.xlu1 %v6631_v11, %s7072_s21 }
 0x5e5   : > { %v1915_v30 = vpop.permute.xlu0 %1914 }
 0x5e7   : > { %v1917_v44 = vpop.permute.xlu1 %1916 }
 0x5e9   : > { %v1919_v34 = vpop.permute.xlu0 %1918 }
 0x5ea   : > { %v1948_v32 = vadd.f32 %v1919_v34, %v7603_v42  ;;  %v6635_v42 = vpack.c.bf16 %v7593_v24, %v7593_v24 }
 0x5eb   : > { %v1921_v31 = vpop.permute.xlu1 %1920 }
 0x5ec   : > { %v1949_v51 = vadd.f32 %v1921_v31, %v7624_v53  ;;  %vm1960_vm6 = vcmp.ge.f32.partialorder %v1948_v32, 1.0  ;;  %v6636_v53 = vpack.c.bf16 %v7606_v33, %v7606_v33 }
 0x5ed   : > { %v1383_v12 = vpop.permute.xlu0 %1382  ;;  %v6272_v27 = vsel %vm1960_vm6, 1.0, %v7071_v23 }
 0x5ee   : > { %v1416_v48 = vsub.f32 %v7647_v21, %v1383_v12  ;;  %v1946_v21 = vadd.f32 %v1915_v30, %v7633_v13  ;;  %vm1961_vm7 = vcmp.ge.f32.partialorder %v1949_v51, 1.0  ;;  %v6637_v13 = vpack.c.bf16 %v7621_v17, %v7621_v17 }
 0x5ef   : > { %v1385_v37 = vpop.permute.xlu1 %1384  ;;  %v6273_v24 = vsel %vm1961_vm7, 1.0, %v7071_v23  ;;  %v6656_v57 = vpack.c.bf16 %v6272_v27, %v6272_v27 }
 0x5f0   : > { %v1428_v60 = vmul.f32 0.6666667, %v1416_v48  ;;  %v1417_v29 = vsub.f32 %v7667_v35, %v1385_v37  ;;  %v1947_v35 = vadd.f32 %v1917_v44, %v7636_v28  ;;  %vm1958_vm8 = vcmp.ge.f32.partialorder %v1946_v21, 1.0 }
 0x5f1   : > { %v1379_v49 = vpop.permute.xlu0 %1378  ;;  %v6270_v1 = vsel %vm1958_vm8, 1.0, %v7071_v23  ;;  %v6657_v19 = vpack.c.bf16 %v6273_v24, %v6273_v24 }
 0x5f2   : > { %v1429_v47 = vmul.f32 0.6666667, %v1417_v29  ;;  %1454 = vrot.lane.b32.xlu0 %v1428_v60, %s7072_s21  ;;  %vm1959_vm9 = vcmp.ge.f32.partialorder %v1947_v35, 1.0  ;;  %v6654_v0 = vpack.c.bf16 %v6270_v1, %v6270_v1  ;;  %v1414_v5 = vsub.f32 %v7673_v8, %v1379_v49 }
 0x5f3   : > { %v1381_v26 = vpop.permute.xlu1 %1380  ;;  %v6271_v33 = vsel %vm1959_vm9, 1.0, %v7071_v23 }
 0x5f4   : > { %1456 = vrot.lane.b32.xlu1 %v1429_v47, %s7072_s21  ;;  %v6655_v55 = vpack.c.bf16 %v6271_v33, %v6271_v33  ;;  %v1415_v7 = vsub.f32 %v7694_v16, %v1381_v26  ;;  %v1426_v8 = vmul.f32 0.6666667, %v1414_v5 }
 0x5f5   : > { %v1923_v9 = vpop.permute.xlu0 %1922 }
 0x5f6   : > { %1610 = vrot.lane.b32.xlu0 %v6634_v45, %s7072_s21  ;;  %v1950_v20 = vadd.f32 %v1923_v9, %v7644_v38  ;;  %v1427_v16 = vmul.f32 0.6666667, %v1415_v7 }
 0x5f7   : > { %v1925_v63 = vpop.permute.xlu1 %1924 }
 0x5f8   : > { %1612 = vrot.lane.b32.xlu1 %v6635_v42, %s7072_s21  ;;  %v1951_v17 = vadd.f32 %v1925_v63, %v7661_v41  ;;  %vm1962_vm10 = vcmp.ge.f32.partialorder %v1950_v20, 1.0 }
 0x5f9   : > { %v1927_v56 = vpop.permute.xlu0 %1926  ;;  %v6274_v18 = vsel %vm1962_vm10, 1.0, %v7071_v23 }
 0x5fa   : > { %1614 = vrot.lane.b32.xlu0 %v6636_v53, %s7072_s21  ;;  %v1952_v38 = vadd.f32 %v1927_v56, %v7690_v50  ;;  %vm1963_vm11 = vcmp.ge.f32.partialorder %v1951_v17, 1.0 }
 0x5fb   : > { %v1929_v28 = vpop.permute.xlu1 %1928  ;;  %v6275_v58 = vsel %vm1963_vm11, 1.0, %v7071_v23 }
 0x5fc   : > { %1616 = vrot.lane.b32.xlu1 %v6637_v13, %s7072_s21  ;;  %v1953_v52 = vadd.f32 %v1929_v28, %v7701_v10  ;;  %vm1964_vm13 = vcmp.ge.f32.partialorder %v1952_v38, 1.0  ;;  %v6658_v10 = vpack.c.bf16 %v6274_v18, %v6274_v18  ;;  %v6659_v15 = vpack.c.bf16 %v6275_v58, %v6275_v58 }
 0x5fd   : > { %v1607_v6 = vpop.permute.xlu0 %1606  ;;  %v6276_v25 = vsel %vm1964_vm13, 1.0, %v7071_v23 }
 0x5fe   : > { %1636 = vst.msk [vmem:[#allocation3 + $0x30] sm:$0xf] %vm759_vm15, %v1607_v6  ;;  %2038 = vrot.lane.b32.xlu0 %v6656_v57, %s7072_s21  ;;  %vm1965_vm14 = vcmp.ge.f32.partialorder %v1953_v52, 1.0  ;;  %v6660_v11 = vpack.c.bf16 %v6276_v25, %v6276_v25 }
 0x5ff   : > { %v1609_v46 = vpop.permute.xlu1 %1608  ;;  %v6277_v43 = vsel %vm1965_vm14, 1.0, %v7071_v23 }
 0x600   : > { %1637 = vst.msk [vmem:[#allocation3 + $0x38] sm:$0xf] %vm759_vm15, %v1609_v46  ;;  %2040 = vrot.lane.b32.xlu1 %v6657_v19, %s7072_s21  ;;  %v6661_v30 = vpack.c.bf16 %v6277_v43, %v6277_v43 }
 0x601   : > { %v1603_v3 = vpop.permute.xlu0 %1602 }
 0x602   : > { %1634 = vst.msk [vmem:[#allocation3 + $0x20] sm:$0xf] %vm759_vm15, %v1603_v3  ;;  %2034 = vrot.lane.b32.xlu0 %v6654_v0, %s7072_s21 }
 0x603   : > { %v1605_v41 = vpop.permute.xlu1 %1604 }
 0x604   : > { %1635 = vst.msk [vmem:[#allocation3 + $0x28] sm:$0xf] %vm759_vm15, %v1605_v41  ;;  %2036 = vrot.lane.b32.xlu1 %v6655_v55, %s7072_s21 }
 0x606   : > { %1450 = vrot.lane.b32.xlu0 %v1426_v8, %s7072_s21 }
 0x607   : > { %v6954_v50 = vld [vmem:[#allocation3 + $0x30] ss:$8 sps:$4 sm:$0xff]  }
 0x608   : > { %1452 = vrot.lane.b32.xlu1 %v1427_v16, %s7072_s21  ;;  %6872 = vmatprep.subr.msk.bf16.mxu1 %vm2110_vm12, %v6954_v50  ;;  %v2121_v59 = vsel %vm2110_vm12, %v6954_v50, 0 }
 0x609   : > { %6797 = vmatpush3.bf16.xpose.msra.mxu1 %v2121_v59 }
 0x60a   : > { %2042 = vrot.lane.b32.xlu0 %v6658_v10, %s7072_s21 }
 0x60b   : > { %v6955_v54 = vld [vmem:[#allocation3 + $0x20] ss:$8 sps:$4 sm:$0xff]  }
 0x60c   : > { %2044 = vrot.lane.b32.xlu1 %v6659_v15, %s7072_s21  ;;  %6873 = vmatprep.subr.msk.bf16.mxu1 %vm2110_vm12, %v6955_v54  ;;  %v2118_v44 = vsel %vm2110_vm12, %v6955_v54, 0 }
 0x60e   : > { %2046 = vrot.lane.b32.xlu0 %v6660_v11, %s7072_s21 }
 0x610   : > { %2048 = vrot.lane.b32.xlu1 %v6661_v30, %s7072_s21 }
 0x611   : > { %6799 = vmatpush3.bf16.xpose.msra.mxu1 %v2118_v44 }
 0x664   : > { %v1455_v34 = vpop.permute.xlu0 %1454 }
 0x665   : > { %v1488_v31 = vadd.f32 %v1455_v34, %v7703_v14 }
 0x666   : > { %v1457_v12 = vpop.permute.xlu1 %1456 }
 0x667   : > { %vm1500_vm0 = vcmp.ge.f32.partialorder %v1488_v31, 1.0  ;;  %v1489_v48 = vadd.f32 %v1457_v12, %v7713_v22 }
 0x668   : > { %v7815_v37 = vsel %vm1500_vm0, 1.0, %v7071_v23  ;;  %v1611_v60 = vpop.permute.xlu0 %1610 }
 0x669   : > { %v1536_v29 = vsub.f32 1.0, %v7815_v37  ;;  %vm1501_vm2 = vcmp.ge.f32.partialorder %v1489_v48, 1.0  ;;  %1638 = vst.msk [vmem:[#allocation3 + $0x40] sm:$0xf] %vm759_vm15, %v1611_v60 }
 0x66a   : > { %v7820_v49 = vsel %vm1501_vm2, 1.0, %v7071_v23  ;;  %v1613_v32 = vpop.permute.xlu1 %1612 }
 0x66b   : > { %v1548_v47 = vmul.f32 %v1536_v29, %v1488_v31  ;;  %v1537_v14 = vsub.f32 1.0, %v7820_v49  ;;  %1639 = vst.msk [vmem:[#allocation3 + $0x48] sm:$0xf] %vm759_vm15, %v1613_v32 }
 0x66c   : > { %v1615_v26 = vpop.permute.xlu0 %1614 }
 0x66d   : > { %v1656_v22 = vsub.f32 %v7650_v39, %v1548_v47  ;;  %v1549_v51 = vmul.f32 %v1537_v14, %v1489_v48  ;;  %1640 = vst.msk [vmem:[#allocation3 + $0x50] sm:$0xf] %vm759_vm15, %v1615_v26 }
 0x66e   : > { %v1617_v45 = vpop.permute.xlu1 %1616 }
 0x66f   : > { %v1668_v9 = vmul.f32 0.6666667, %v1656_v22  ;;  %v1657_v21 = vsub.f32 %v7670_v61, %v1549_v51  ;;  %1641 = vst.msk [vmem:[#allocation3 + $0x58] sm:$0xf] %vm759_vm15, %v1617_v45 }
 0x670   : > { %v2039_v42 = vpop.permute.xlu0 %2038 }
 0x671   : > { %v1680_v35 = vadd.f32 %v1668_v9, %v1548_v47  ;;  %v1669_v63 = vmul.f32 0.6666667, %v1657_v21  ;;  %2068 = vst.msk [vmem:[#allocation3 + $0x34] sm:$0xf] %vm759_vm15, %v2039_v42 }
 0x672   : > { %v2041_v53 = vpop.permute.xlu1 %2040  ;;  %v6956_v27 = vld [vmem:[#allocation3 + $0x40] ss:$8 sps:$4 sm:$0xff]  }
 0x673   : > { %vm1692_vm4 = vcmp.ge.f32.partialorder %v1680_v35, 1.0  ;;  %v1681_v56 = vadd.f32 %v1669_v63, %v1549_v51  ;;  %2069 = vst.msk [vmem:[#allocation3 + $0x3c] sm:$0xf] %vm759_vm15, %v2041_v53  ;;  %6800 = vmatprep.mubr.msk.bf16.mxu1 %vm2110_vm12, %v6956_v27 }
 0x674   : > { %v6244_v13 = vsel %vm1692_vm4, 1.0, %v7071_v23  ;;  %v2035_v24 = vpop.permute.xlu0 %2034 }
 0x675   : > { %vm1693_vm5 = vcmp.ge.f32.partialorder %v1681_v56, 1.0  ;;  %2066 = vst.msk [vmem:[#allocation3 + $0x24] sm:$0xf] %vm759_vm15, %v2035_v24  ;;  %v1728_v28 = vsub.f32 1.0, %v6244_v13  ;;  %v6640_v57 = vpack.c.bf16 %v6244_v13, %v6244_v13 }
 0x676   : > { %v6245_v1 = vsel %vm1693_vm5, 1.0, %v7071_v23  ;;  %v2037_v6 = vpop.permute.xlu1 %2036  ;;  %v6957_v33 = vld [vmem:[#allocation3 + $0x50] ss:$8 sps:$4 sm:$0xff]  }
 0x677   : > { %2067 = vst.msk [vmem:[#allocation3 + $0x2c] sm:$0xf] %vm759_vm15, %v2037_v6  ;;  %v7835_v19 = vmul.f32 %v1728_v28, %v1680_v35  ;;  %v1729_v20 = vsub.f32 1.0, %v6245_v1  ;;  %v6641_v17 = vpack.c.bf16 %v6245_v1, %v6245_v1  ;;  %6801 = vmatmul.mubr.msk.bf16.vlgmr.msra.gmra.mxu1 %vm2110_vm12, %v6957_v33  ;;  %v7913_v6 = vld [vmem:[%s9508_s5 + $0x8] sm:$0xff] }
 0x678   : > { %1800 = vst.msk [vmem:[#allocation3 + $0x14] sm:$0xf] %vm654_vm1, %v6640_v57  ;;  %v1451_v46 = vpop.permute.xlu0 %1450  ;;  %v7908_v57 = vld [vmem:[%s9508_s5] sm:$0xff] }
 0x679   : > { %v1486_v0 = vadd.f32 %v1451_v46, %v7715_v40  ;;  %1838 = vrot.lane.b32.xlu0 %v7835_v19, %s7072_s21  ;;  %v7842_v5 = vmul.f32 %v1729_v20, %v1681_v56  ;;  %1801 = vst.msk [vmem:[#allocation3 + $0x1c] sm:$0xf] %vm654_vm1, %v6641_v17 }
 0x67a   : > { %v1453_v55 = vpop.permute.xlu1 %1452  ;;  %v6958_v3 = vld [vmem:[#allocation3 + $0x34] ss:$8 sps:$4 sm:$0xff]  }
 0x67b   : > { %vm1498_vm6 = vcmp.ge.f32.partialorder %v1486_v0, 1.0  ;;  %v1487_v7 = vadd.f32 %v1453_v55, %v7721_v62  ;;  %1840 = vrot.lane.b32.xlu1 %v7842_v5, %s7072_s21  ;;  %6876 = vmatprep.subr.msk.bf16.mxu0 %vm2110_vm12, %v6958_v3  ;;  %v2498_v40 = vsel %vm2110_vm12, %v6958_v3, 0 }
 0x67c   : > { %v7849_v38 = vsel %vm1498_vm6, 1.0, %v7071_v23  ;;  %v2043_v52 = vpop.permute.xlu0 %2042  ;;  %6829 = vmatpush3.bf16.xpose.msra.mxu0 %v2498_v40 }
 0x67d   : > { %v1534_v41 = vsub.f32 1.0, %v7849_v38  ;;  %vm1499_vm7 = vcmp.ge.f32.partialorder %v1487_v7, 1.0  ;;  %2070 = vst.msk [vmem:[#allocation3 + $0x44] sm:$0xf] %vm759_vm15, %v2043_v52 }
 0x67e   : > { %v6219_v8 = vsel %vm1499_vm7, 1.0, %v7071_v23  ;;  %v2045_v62 = vpop.permute.xlu1 %2044  ;;  %v6959_v18 = vld [vmem:[#allocation3 + $0x24] ss:$8 sps:$4 sm:$0xff]  }
 0x67f   : > { %v1546_v16 = vmul.f32 %v1534_v41, %v1486_v0  ;;  %v1535_v58 = vsub.f32 1.0, %v6219_v8  ;;  %2071 = vst.msk [vmem:[#allocation3 + $0x4c] sm:$0xf] %vm759_vm15, %v2045_v62  ;;  %6877 = vmatprep.subr.msk.bf16.mxu0 %vm2110_vm12, %v6959_v18  ;;  %v2495_v54 = vsel %vm2110_vm12, %v6959_v18, 0  ;;  %v6627_v24 = vpack.c.bf16 %v6219_v8, %v6219_v8 }
 0x680   : > { %v2047_v50 = vpop.permute.xlu0 %2046 }
 0x681   : > { %v1654_v10 = vsub.f32 %v7676_v4, %v1546_v16  ;;  %v1547_v25 = vmul.f32 %v1535_v58, %v1487_v7  ;;  %2072 = vst.msk [vmem:[#allocation3 + $0x54] sm:$0xf] %vm759_vm15, %v2047_v50 }
 0x682   : > { %v2049_v59 = vpop.permute.xlu1 %2048 }
 0x683   : > { %v1666_v15 = vmul.f32 0.6666667, %v1654_v10  ;;  %v1655_v43 = vsub.f32 %v7697_v36, %v1547_v25  ;;  %2073 = vst.msk [vmem:[#allocation3 + $0x5c] sm:$0xf] %vm759_vm15, %v2049_v59 }
 0x684   : > { %6831 = vmatpush3.bf16.xpose.msra.mxu0 %v2495_v54 }
 0x685   : > { %v1678_v11 = vadd.f32 %v1666_v15, %v1546_v16  ;;  %v1667_v30 = vmul.f32 0.6666667, %v1655_v43 }
 0x686   : > { %v6960_v44 = vld [vmem:[#allocation3 + $0x44] ss:$8 sps:$4 sm:$0xff]  }
 0x687   : > { %vm1690_vm8 = vcmp.ge.f32.partialorder %v1678_v11, 1.0  ;;  %v1679_v34 = vadd.f32 %v1667_v30, %v1547_v25  ;;  %6832 = vmatprep.mubr.msk.bf16.mxu0 %vm2110_vm12, %v6960_v44 }
 0x688   : > { %v6242_v31 = vsel %vm1690_vm8, 1.0, %v7071_v23 }
 0x689   : > { %vm1691_vm9 = vcmp.ge.f32.partialorder %v1679_v34, 1.0  ;;  %v1726_v12 = vsub.f32 1.0, %v6242_v31  ;;  %v6638_v48 = vpack.c.bf16 %v6242_v31, %v6242_v31 }
 0x68a   : > { %v6243_v60 = vsel %vm1691_vm9, 1.0, %v7071_v23  ;;  %v6961_v29 = vld [vmem:[#allocation3 + $0x54] ss:$8 sps:$4 sm:$0xff]  }
 0x68b   : > { %v7866_v32 = vmul.f32 %v1726_v12, %v1678_v11  ;;  %v1727_v47 = vsub.f32 1.0, %v6243_v60  ;;  %1798 = vst.msk [vmem:[#allocation3 + $0x4] sm:$0xf] %vm654_vm1, %v6638_v48  ;;  %v6639_v14 = vpack.c.bf16 %v6243_v60, %v6243_v60  ;;  %6833 = vmatmul.mubr.msk.bf16.vlgmr.msra.gmra.mxu0 %vm2110_vm12, %v6961_v29 }
 0x68d   : > { %1834 = vrot.lane.b32.xlu0 %v7866_v32, %s7072_s21  ;;  %v7872_v26 = vmul.f32 %v1727_v47, %v1679_v34  ;;  %1799 = vst.msk [vmem:[#allocation3 + $0xc] sm:$0xf] %vm654_vm1, %v6639_v14  ;;  %v6962_v47 = vld [vmem:[#allocation3 + $0x30] ss:$8 sps:$4 sm:$0xff]  }
 0x68f   : > { %1836 = vrot.lane.b32.xlu1 %v7872_v26, %s7072_s21 }
 0x6eb   : > { %v1839_v22 = vpop.permute.xlu0 %1838 }
 0x6ec   : > { %v1872_v51 = vsub.f32 %v7650_v39, %v1839_v22  ;;  %v6628_v39 = vpack.c.bf16 %v7815_v37, %v7815_v37  ;;  %v7898_v37 = vld [vmem:[%s9508_s5 + $0x10] sm:$0xff] }
 0x6ed   : > { %v1841_v45 = vpop.permute.xlu1 %1840  ;;  %v6964_v22 = vld [vmem:[#allocation3 + $0x34] ss:$8 sps:$4 sm:$0xff]  }
 0x6ee   : > { %v1884_v9 = vmul.f32 0.6666667, %v1872_v51  ;;  %v1873_v21 = vsub.f32 %v7670_v61, %v1841_v45  ;;  %v6629_v61 = vpack.c.bf16 %v7820_v49, %v7820_v49  ;;  %v7903_v49 = vld [vmem:[%s9508_s5 + $0x18] sm:$0xff]  ;;  %v6965_v45 = vld [vmem:[#allocation3 + $0x40] ss:$8 sps:$4 sm:$0xff]  }
 0x6f0   : > { %v1885_v42 = vmul.f32 0.6666667, %v1873_v21  ;;  %1910 = vrot.lane.b32.xlu0 %v1884_v9, %s7072_s21  ;;  %v6966_v9 = vld [vmem:[#allocation3 + $0x50] ss:$8 sps:$4 sm:$0xff]  }
 0x6f2   : > { %1912 = vrot.lane.b32.xlu1 %v1885_v42, %s7072_s21  ;;  %v6968_v42 = vld [vmem:[#allocation3 + $0x24] ss:$8 sps:$4 sm:$0xff]  }
 0x6ff   : > { %v1835_v35 = vpop.permute.xlu0 %1834 }
 0x700   : > { %v1870_v63 = vsub.f32 %v7676_v4, %v1835_v35  ;;  %v6626_v4 = vpack.c.bf16 %v7849_v38, %v7849_v38  ;;  %v6969_v35 = vld [vmem:[#allocation3 + $0x44] ss:$8 sps:$4 sm:$0xff]  }
 0x701   : > { %v1837_v53 = vpop.permute.xlu1 %1836 }
 0x702   : > { %v1882_v27 = vmul.f32 0.6666667, %v1870_v63  ;;  %v1871_v56 = vsub.f32 %v7697_v36, %v1837_v53  ;;  %v6971_v63 = vld [vmem:[#allocation3 + $0x54] ss:$8 sps:$4 sm:$0xff]  }
 0x704   : > { %v1883_v13 = vmul.f32 0.6666667, %v1871_v56  ;;  %1906 = vrot.lane.b32.xlu0 %v1882_v27, %s7072_s21 }
 0x706   : > { %1908 = vrot.lane.b32.xlu1 %v1883_v13, %s7072_s21 }
 0x708   : > { %1598 = vrot.lane.b32.xlu0 %v6628_v39, %s7072_s21  ;;  %v7969_v39 = vld [vmem:[#allocation3 + $0x48] sm:$0xff]  }
 0x70a   : > { %1600 = vrot.lane.b32.xlu1 %v6629_v61, %s7072_s21  ;;  %v7971_v61 = vld [vmem:[#allocation3 + $0x40] sm:$0xff]  }
 0x70c   : > { %1594 = vrot.lane.b32.xlu0 %v6626_v4, %s7072_s21 }
 0x70e   : > { %1596 = vrot.lane.b32.xlu1 %v6627_v24, %s7072_s21  ;;  %v2837_v24 = vunpack.c.l.bf16 %v7969_v39 }
 0x737   : > { %v6802_v36 = vpop.f32.mrf.mxu1 }
 0x738   : > { %v7916_v33 = vmul.f32 %v6802_v36, %v7898_v37 }
 0x739   : > { %v2157_v28 = vpop.f32.mrf.mxu1 }
 0x73a   : > { %v2172_v46 = vmul.f32 %v2157_v28, %v7908_v57  ;;  %v7974_v28 = vld [vmem:[#allocation3 + $0x58] sm:$0xff]  }
 0x73b   : > { %v6803_v1 = vpop.f32.mrf.mxu1 }
 0x73c   : > { %v7919_v20 = vmul.f32 %v6803_v1, %v7903_v49  ;;  %v2836_v1 = vunpack.c.l.bf16 %v7971_v61 }
 0x73d   : > { %v2160_v17 = vpop.f32.mrf.mxu1 }
 0x73e   : > { %v2177_v0 = vpack.c.bf16 %v7919_v20, %v7916_v33  ;;  %v2173_v55 = vmul.f32 %v2160_v17, %v7913_v6  ;;  %v7978_v33 = vld [vmem:[#allocation3 + $0x50] sm:$0xff]   ;;  %v6901_v20 = vpack.i.bf16 %v2837_v24, %v2836_v1  ;;  %v2839_v17 = vunpack.c.l.bf16 %v7974_v28 }
 0x740   : > { %v2176_v3 = vpack.c.bf16 %v2173_v55, %v2172_v46  ;;  %v2838_v46 = vunpack.c.l.bf16 %v7978_v33  ;;  %v7073_v55 = vmov 1  }
 0x741   : > { %6922 = vset.pattern.permute.xlu1 %v7073_v55  ;;  %6921 = vset.pattern.permute.xlu0 %v7073_v55 }
 0x742   : > { %6808 = vmatprep.mubr.msk.bf16.mxu1 %vm1062_vm3, %v2176_v3 }
 0x74b   : > { %v6834_v7 = vpop.f32.mrf.mxu0 }
 0x74c   : > { %v7927_v40 = vmul.f32 %v6834_v7, %v7898_v37 }
 0x74d   : > { %v2534_v38 = vpop.f32.mrf.mxu0 }
 0x74e   : > { %v2549_v62 = vmul.f32 %v2534_v38, %v7908_v57 }
 0x74f   : > { %v6835_v52 = vpop.f32.mrf.mxu0 }
 0x750   : > { %v7930_v41 = vmul.f32 %v6835_v52, %v7903_v49 }
 0x751   : > { %v2537_v8 = vpop.f32.mrf.mxu0 }
 0x752   : > { %v2554_v18 = vpack.c.bf16 %v7930_v41, %v7927_v40  ;;  %v2550_v16 = vmul.f32 %v2537_v8, %v7913_v6  ;;  %v8038_v41 = vld [vmem:[%s9510_s7 + $0x18] sm:$0xff] }
 0x754   : > { %v2553_v58 = vpack.c.bf16 %v2550_v16, %v2549_v62  ;;  %v8000_v16 = vld [vmem:[%s9510_s7 + $0x10] sm:$0xff] }
 0x756   : > { %6840 = vmatprep.mubr.msk.bf16.mxu0 %vm1062_vm3, %v2553_v58 }
 0x762   : > { %v1911_v50 = vpop.permute.xlu0 %1910 }
 0x763   : > { %v1944_v10 = vadd.f32 %v1911_v50, %v7835_v19 }
 0x764   : > { %v1913_v25 = vpop.permute.xlu1 %1912 }
 0x765   : > { %vm1956_vm10 = vcmp.ge.f32.partialorder %v1944_v10, 1.0  ;;  %v1945_v59 = vadd.f32 %v1913_v25, %v7842_v5  ;;  %v2865_v10 = vunpack.c.h.bf16 %v7969_v39 }
 0x766   : > { %v6268_v15 = vsel %vm1956_vm10, 1.0, %v7071_v23 }
 0x767   : > { %v6652_v43 = vpack.c.bf16 %v6268_v15, %v6268_v15  ;;  %vm1957_vm11 = vcmp.ge.f32.partialorder %v1945_v59, 1.0  ;;  %v2864_v15 = vunpack.c.h.bf16 %v7971_v61 }
 0x768   : > { %v6269_v54 = vsel %vm1957_vm11, 1.0, %v7071_v23 }
 0x769   : > { %v6653_v11 = vpack.c.bf16 %v6269_v54, %v6269_v54  ;;  %2030 = vrot.lane.b32.xlu0 %v6652_v43, %s7072_s21 }
 0x76b   : > { %2032 = vrot.lane.b32.xlu1 %v6653_v11, %s7072_s21  ;;  %v6906_v11 = vpack.i.bf16 %v2865_v10, %v2864_v15 }
 0x776   : > { %v1907_v30 = vpop.permute.xlu0 %1906 }
 0x777   : > { %v1942_v44 = vadd.f32 %v1907_v30, %v7866_v32  ;;  %v2867_v30 = vunpack.c.h.bf16 %v7974_v28 }
 0x778   : > { %v1909_v34 = vpop.permute.xlu1 %1908 }
 0x779   : > { %vm1954_vm13 = vcmp.ge.f32.partialorder %v1942_v44, 1.0  ;;  %v1943_v19 = vadd.f32 %v1909_v34, %v7872_v26  ;;  %v6963_v26 = vld [vmem:[#allocation3 + $0x20] ss:$8 sps:$4 sm:$0xff]   ;;  %v2866_v34 = vunpack.c.h.bf16 %v7978_v33 }
 0x77a   : > { %v6266_v5 = vsel %vm1954_vm13, 1.0, %v7071_v23  ;;  %v1599_v31 = vpop.permute.xlu0 %1598 }
 0x77b   : > { %v6650_v12 = vpack.c.bf16 %v6266_v5, %v6266_v5  ;;  %vm1955_vm14 = vcmp.ge.f32.partialorder %v1943_v19, 1.0  ;;  %1632 = vst.msk [vmem:[#allocation3 + $0x10] sm:$0xf] %vm759_vm15, %v1599_v31  ;;  %v6916_v31 = vpack.i.bf16 %v2867_v30, %v2866_v34 }
 0x77c   : > { %v6267_v48 = vsel %vm1955_vm14, 1.0, %v7071_v23  ;;  %v1601_v60 = vpop.permute.xlu1 %1600 }
 0x77d   : > { %v6651_v29 = vpack.c.bf16 %v6267_v48, %v6267_v48  ;;  %2026 = vrot.lane.b32.xlu0 %v6650_v12, %s7072_s21  ;;  %1633 = vst.msk [vmem:[#allocation3 + $0x18] sm:$0xf] %vm759_vm15, %v1601_v60  ;;  %v8029_v12 = vld [vmem:[%s9510_s7 + $0x8] sm:$0xff]  ;;  %v6980_v48 = vld [vmem:[%s9509_s6 + $0x84] ss:$20 sps:$4 sm:$0xff]   ;;  %v7074_v60 = vmov 3  }
 0x77e   : > { %v1595_v32 = vpop.permute.xlu0 %1594 }
 0x77f   : > { %1630 = vst.msk [vmem:[#allocation3] sm:$0xf] %vm759_vm15, %v1595_v32  ;;  %2028 = vrot.lane.b32.xlu1 %v6651_v29, %s7072_s21  ;;  %v8049_v32 = vld [vmem:[%s9510_s7] sm:$0xff] }
 0x780   : > { %v1597_v14 = vpop.permute.xlu1 %1596 }
 0x781   : > { %2291 = vrot.lane.b32.xlu0 %v6962_v47, %s7072_s21  ;;  %1631 = vst.msk [vmem:[#allocation3 + $0x8] sm:$0xf] %vm759_vm15, %v1597_v14  ;;  %v7075_v47 = vmov 5   ;;  %v6978_v14 = vld [vmem:[%s9509_s6 + $0x80] ss:$20 sps:$4 sm:$0xff]  }
 0x783   : > { %2289 = vrot.lane.b32.xlu1 %v6963_v26, %s7072_s21  ;;  %v6983_v26 = vld [vmem:[%s9509_s6 + $0x5c] ss:$20 sps:$4 sm:$0xff]  }
 0x784   : > { %v6967_v51 = vld [vmem:[#allocation3 + $0x10] ss:$8 sps:$4 sm:$0xff]  }
 0x785   : > { %2668 = vrot.lane.b32.xlu0 %v6964_v22, %s7072_s21  ;;  %6804 = vmatprep.subr.bf16.mxu1 %v6967_v51  ;;  %v6972_v53 = vld [vmem:[#allocation3 + $0x10] ss:$8 sps:$4 sm:$0xff]  }
 0x786   : > { %6805 = vmatpush3.bf16.msra.mxu1 %v6967_v51  ;;  %v6981_v22 = vld [vmem:[%s9509_s6 + $0x58] ss:$20 sps:$4 sm:$0xff]   ;;  %v6986_v51 = vld [vmem:[%s9509_s6 + $0x34] ss:$20 sps:$4 sm:$0xff]  }
 0x787   : > { %2275 = vrot.lane.b32.xlu1 %v6965_v45, %s7072_s21  ;;  %v6984_v45 = vld [vmem:[%s9509_s6 + $0x30] ss:$20 sps:$4 sm:$0xff]  }
 0x788   : > { %v6970_v21 = vld [vmem:[#allocation3] ss:$8 sps:$4 sm:$0xff]  }
 0x789   : > { %2277 = vrot.lane.b32.xlu0 %v6966_v9, %s7072_s21  ;;  %6806 = vmatprep.subr.bf16.mxu1 %v6970_v21  ;;  %v6973_v27 = vld [vmem:[#allocation3] ss:$8 sps:$4 sm:$0xff]  }
 0x78a   : > { %6807 = vmatpush3.bf16.msra.mxu1 %v6970_v21  ;;  %v6989_v9 = vld [vmem:[%s9509_s6 + $0xc] ss:$20 sps:$4 sm:$0xff]   ;;  %v7076_v21 = vmov 7  }
 0x78b   : > { %2666 = vrot.lane.b32.xlu1 %v6968_v42, %s7072_s21  ;;  %v6987_v42 = vld [vmem:[%s9509_s6 + $0x8] ss:$20 sps:$4 sm:$0xff]  }
 0x78d   : > { %2652 = vrot.lane.b32.xlu0 %v6969_v35, %s7072_s21  ;;  %6809 = vmatmul.mubr.msk.bf16.vlgmr.msra.gmra.mxu1 %vm1062_vm3, %v2177_v0  ;;  %v6911_v0 = vpack.i.bf16 %v2839_v17, %v2838_v46  ;;  %v7077_v35 = vmov 2  }
 0x78f   : > { %2654 = vrot.lane.b32.xlu1 %v6971_v63, %s7072_s21  ;;  %v7078_v63 = vmov 4  }
 0x791   : > { %2372 = vrot.lane.b32.xlu0 %v6972_v53, %s7072_s21  ;;  %v7079_v53 = vmov 6  }
 0x793   : > { %2370 = vrot.lane.b32.xlu1 %v6973_v27, %s7072_s21 }
 0x7db   : > { %v2031_v56 = vpop.permute.xlu0 %2030 }
 0x7dc   : > { %2064 = vst.msk [vmem:[#allocation3 + $0x14] sm:$0xf] %vm759_vm15, %v2031_v56 }
 0x7dd   : > { %v2033_v13 = vpop.permute.xlu1 %2032 }
 0x7de   : > { %2065 = vst.msk [vmem:[#allocation3 + $0x1c] sm:$0xf] %vm759_vm15, %v2033_v13 }
 0x7e5   : > { %v6974_v4 = vld [vmem:[#allocation3 + $0x14] ss:$8 sps:$4 sm:$0xff]  }
 0x7e6   : > { %v6975_v36 = vld [vmem:[#allocation3 + $0x14] ss:$8 sps:$4 sm:$0xff]   ;;  %2749 = vrot.lane.b32.xlu0 %v6974_v4, %s7072_s21 }
 0x7e7   : > { %6836 = vmatprep.subr.bf16.mxu0 %v6975_v36 }
 0x7e8   : > { %6837 = vmatpush3.bf16.msra.mxu0 %v6975_v36 }
 0x7ea   : > { %6902 = vrot.lane.b32.xlu0 %v6901_v20, %s7072_s21 }
 0x7ee   : > { %6912 = vrot.lane.b32.xlu0 %v6911_v0, %s7072_s21 }
 0x7ef   : > { %v2027_v3 = vpop.permute.xlu0 %2026 }
 0x7f0   : > { %2062 = vst.msk [vmem:[#allocation3 + $0x4] sm:$0xf] %vm759_vm15, %v2027_v3 }
 0x7f1   : > { %v2029_v7 = vpop.permute.xlu1 %2028 }
 0x7f2   : > { %2063 = vst.msk [vmem:[#allocation3 + $0xc] sm:$0xf] %vm759_vm15, %v2029_v7  ;;  %3220 = vperm.xlu0 %6921, %v8000_v16  }
 0x7f3   : > { %v2292_v38 = vpop.permute.xlu0 %2291 }
 0x7f4   : > { %6874 = vmatprep.subr.msk.bf16.mxu1 %vm2110_vm12, %v2292_v38  ;;  %v2303_v52 = vsel %vm2110_vm12, %v2292_v38, 0 }
 0x7f5   : > { %6813 = vmatpush3.bf16.xpose.msra.mxu1 %v2303_v52  ;;  %v2290_v8 = vpop.permute.xlu1 %2289 }
 0x7f6   : > { %6875 = vmatprep.subr.msk.bf16.mxu1 %vm2110_vm12, %v2290_v8  ;;  %v2300_v43 = vsel %vm2110_vm12, %v2290_v8, 0  ;;  %3216 = vperm.xlu0 %6921, %v8029_v12  }
 0x7f7   : > { %v2669_v62 = vpop.permute.xlu0 %2668 }
 0x7f8   : > { %v2680_v19 = vsel %vm2110_vm12, %v2669_v62, 0 }
 0x7f9   : > { %v2276_v58 = vpop.permute.xlu1 %2275  ;;  %v6976_v50 = vld [vmem:[#allocation3 + $0x4] ss:$8 sps:$4 sm:$0xff]  }
 0x7fa   : > { %6816 = vmatprep.mubr.msk.bf16.mxu1 %vm2110_vm12, %v2276_v58  ;;  %v6977_v25 = vld [vmem:[#allocation3 + $0x4] ss:$8 sps:$4 sm:$0xff]   ;;  %2747 = vrot.lane.b32.xlu1 %v6976_v50, %s7072_s21 }
 0x7fb   : > { %v2278_v59 = vpop.permute.xlu0 %2277  ;;  %6838 = vmatprep.subr.bf16.mxu0 %v6977_v25  ;;  %6924 = vset.pattern.permute.xlu0 %v7074_v60 }
 0x7fc   : > { %6839 = vmatpush3.bf16.msra.mxu0 %v6977_v25  ;;  %3288 = vperm.xlu0 %6924, %v8038_v41  }
 0x7fd   : > { %6815 = vmatpush3.bf16.xpose.msra.mxu1 %v2300_v43  ;;  %v2667_v54 = vpop.permute.xlu1 %2666  ;;  %6878 = vmatprep.subr.msk.bf16.mxu0 %vm2110_vm12, %v2669_v62 }
 0x7fe   : > { %6907 = vrot.lane.b32.xlu1 %v6906_v11, %s7072_s21  ;;  %v2677_v29 = vsel %vm2110_vm12, %v2667_v54, 0 }
 0x7ff   : > { %v2653_v44 = vpop.permute.xlu0 %2652  ;;  %6841 = vmatmul.mubr.msk.bf16.vlgmr.msra.gmra.mxu0 %vm1062_vm3, %v2554_v18 }
 0x800   : > { %6845 = vmatpush3.bf16.xpose.msra.mxu0 %v2680_v19  ;;  %6848 = vmatprep.mubr.msk.bf16.mxu0 %vm2110_vm12, %v2653_v44 }
 0x801   : > { %v2655_v5 = vpop.permute.xlu1 %2654  ;;  %6879 = vmatprep.subr.msk.bf16.mxu0 %vm2110_vm12, %v2667_v54  ;;  %6925 = vset.pattern.permute.xlu0 %v7075_v47 }
 0x802   : > { %6917 = vrot.lane.b32.xlu1 %v6916_v31, %s7072_s21  ;;  %3348 = vperm.xlu0 %6925, %v8000_v16  }
 0x803   : > { %v2373_v40 = vpop.permute.xlu0 %2372 }
 0x804   : > { %6817 = vmatmul.mubr.msk.bf16.vlgmr.msra.gmra.mxu1 %vm2110_vm12, %v2278_v59  ;;  %6820 = vmatprep.subr.bf16.mxu1 %v2373_v40 }
 0x805   : > { %6821 = vmatpush3.bf16.msra.mxu1 %v2373_v40  ;;  %v2371_v18 = vpop.permute.xlu1 %2370 }
 0x806   : > { %6822 = vmatprep.subr.bf16.mxu1 %v2371_v18  ;;  %3224 = vperm.xlu1 %6922, %v8038_v41  }
 0x807   : > { %3344 = vperm.xlu0 %6925, %v8029_v12  }
 0x808   : > { %6847 = vmatpush3.bf16.xpose.msra.mxu0 %v2677_v29 }
 0x809   : > { %6823 = vmatpush3.bf16.msra.mxu1 %v2371_v18  ;;  %3089 = vmatprep.subr.bf16.mxu0 %v6980_v48 }
 0x80a   : > { %3212 = vperm.xlu1 %6922, %v8049_v32  }
 0x80b   : > { %6928 = vset.pattern.permute.xlu0 %v7076_v21 }
 0x80c   : > { %3416 = vperm.xlu0 %6928, %v8038_v41  }
 0x80e   : > { %6923 = vset.pattern.permute.xlu1 %v7074_v60 }
 0x80f   : > { %6849 = vmatmul.mubr.msk.bf16.vlgmr.msra.gmra.mxu0 %vm2110_vm12, %v2655_v5  ;;  %3284 = vperm.xlu1 %6923, %v8000_v16  }
 0x810   : > { %3090 = vmatpush1.bf16.msra.mxu0 %v6978_v14  ;;  %3113 = vmatprep.mubr.bf16.mxu0 %v9523_v2 }
 0x811   : > { %3091 = vmatprep.subr.bf16.mxu0 %v6983_v26  ;;  %6931 = vset.pattern.permute.xlu0 %v7077_v35 }
 0x812   : > { %3264 = vperm.xlu0 %6931, %v8038_v41  }
 0x813   : > { %3276 = vperm.xlu1 %6923, %v8049_v32  }
 0x814   : > { %3092 = vmatpush1.bf16.msra.mxu0 %v6981_v22  ;;  %v6992_v22 = vld [vmem:[%s9509_s6 + $0x7c] ss:$20 sps:$4 sm:$0xff]  }
 0x815   : > { %3093 = vmatprep.subr.bf16.mxu0 %v6986_v51 }
 0x816   : > { %3252 = vperm.xlu0 %6931, %v8049_v32  }
 0x817   : > { %3280 = vperm.xlu1 %6923, %v8029_v12  }
 0x818   : > { %3094 = vmatpush1.bf16.msra.mxu0 %v6984_v45 }
 0x819   : > { %3095 = vmatprep.subr.bf16.mxu0 %v6989_v9 }
 0x81a   : > { %6934 = vset.pattern.permute.xlu0 %v7078_v63 }
 0x81b   : > { %6926 = vset.pattern.permute.xlu1 %v7075_v47  ;;  %3324 = vperm.xlu0 %6934, %v8000_v16  }
 0x81c   : > { %3096 = vmatpush1.bf16.msra.mxu0 %v6987_v42  ;;  %3352 = vperm.xlu1 %6926, %v8038_v41  }
 0x81f   : > { %3320 = vperm.xlu0 %6934, %v8029_v12  }
 0x820   : > { %3340 = vperm.xlu1 %6926, %v8049_v32  }
 0x823   : > { %6937 = vset.pattern.permute.xlu0 %v7079_v53 }
 0x824   : > { %6927 = vset.pattern.permute.xlu1 %v7076_v21  ;;  %3392 = vperm.xlu0 %6937, %v8038_v41  }
 0x825   : > { %3412 = vperm.xlu1 %6927, %v8000_v16  }
 0x828   : > { %3380 = vperm.xlu0 %6937, %v8049_v32  }
 0x829   : > { %3404 = vperm.xlu1 %6927, %v8049_v32  }
 0x82d   : > { %3408 = vperm.xlu1 %6927, %v8029_v12  }
 0x831   : > { %6929 = vset.pattern.permute.xlu1 %v9523_v2 }
 0x832   : > { %3204 = vperm.xlu1 %6929, %v8038_v41  }
 0x836   : > { %6930 = vset.pattern.permute.xlu1 %v7077_v35 }
 0x837   : > { %3260 = vperm.xlu1 %6930, %v8000_v16  }
 0x83b   : > { %6932 = vset.pattern.permute.xlu1 %v9523_v2 }
 0x83c   : > { %3189 = vperm.xlu1 %6932, %v8049_v32  }
 0x840   : > { %3194 = vperm.xlu1 %6932, %v8029_v12  }
 0x844   : > { %6933 = vset.pattern.permute.xlu1 %v7077_v35 }
 0x845   : > { %3256 = vperm.xlu1 %6933, %v8029_v12  }
 0x849   : > { %6935 = vset.pattern.permute.xlu1 %v7078_v63 }
 0x84a   : > { %3328 = vperm.xlu1 %6935, %v8038_v41  }
 0x84d   : > { %v6810_v27 = vpop.f32.mrf.mxu1 }
 0x84e   : > { %v2247_v56 = vmul.f32 0.125, %v6810_v27  ;;  %3316 = vperm.xlu1 %6935, %v8049_v32  }
 0x84f   : > { %v2230_v13 = vpop.f32.mrf.mxu1 }
 0x850   : > { %2251 = vst.msk [vmem:[#allocation2 + $0x20] sm:$0xff] %vm2110_vm12, %v2247_v56  ;;  %v2245_v4 = vmul.f32 0.125, %v2230_v13  ;;  %v6995_v56 = vld [vmem:[%s9509_s6 + $0x54] ss:$20 sps:$4 sm:$0xff]  }
 0x851   : > { %v6811_v36 = vpop.f32.mrf.mxu1  ;;  %v6999_v13 = vld [vmem:[%s9509_s6] ss:$20 sps:$4 sm:$0xff]  }
 0x852   : > { %2249 = vst.msk [vmem:[#allocation2] sm:$0xff] %vm2110_vm12, %v2245_v4  ;;  %v2248_v20 = vmul.f32 0.125, %v6811_v36  ;;  %6936 = vset.pattern.permute.xlu1 %v7079_v53  ;;  %v6990_v53 = vld [vmem:[%s9509_s6 + $0x78] ss:$20 sps:$4 sm:$0xff]   ;;  %v7002_v4 = vld [vmem:[%s9509_s6 + $0x88] ss:$20 sps:$4 sm:$0xff]  }
 0x853   : > { %v2233_v0 = vpop.f32.mrf.mxu1  ;;  %3388 = vperm.xlu1 %6936, %v8000_v16   ;;  %v7003_v36 = vld [vmem:[%s9509_s6 + $0x60] ss:$20 sps:$4 sm:$0xff]  }
 0x854   : > { %2252 = vst.msk [vmem:[#allocation2 + $0x30] sm:$0xff] %vm2110_vm12, %v2248_v20  ;;  %v2246_v55 = vmul.f32 0.125, %v2233_v0  ;;  %v7004_v20 = vld [vmem:[%s9509_s6 + $0x38] ss:$20 sps:$4 sm:$0xff]   ;;  %v7005_v0 = vld [vmem:[%s9509_s6 + $0x10] ss:$20 sps:$4 sm:$0xff]  }
 0x856   : > { %2250 = vst.msk [vmem:[#allocation2 + $0x10] sm:$0xff] %vm2110_vm12, %v2246_v55 }
 0x857   : > { %3384 = vperm.xlu1 %6936, %v8029_v12  }
 0x858   : > { %v2750_v3 = vpop.permute.xlu0 %2749 }
 0x859   : > { %6852 = vmatprep.subr.bf16.mxu1 %v2750_v3 }
 0x85c   : > { %v6903_v7 = vpop.permute.xlu0 %6902 }
 0x85d   : > { %v7054_v8 = vadd.high.f32.bf16 %v2837_v24, %v6903_v7  ;;  %v7055_v62 = vadd.low.f32.bf16 %v2836_v1, %v6903_v7 }
 0x85f   : > { %v2868_v50 = vadd.f32 %v7055_v62, %v2864_v15  ;;  %v2869_v25 = vadd.f32 %v7054_v8, %v2865_v10  ;;  %v7080_v10 = vmov 8  }
 0x860   : > { %v6913_v38 = vpop.permute.xlu0 %6912  ;;  %6938 = vset.pattern.permute.xlu0 %v7080_v10  ;;  %6939 = vset.pattern.permute.xlu1 %v7080_v10 }
 0x861   : > { %v7056_v59 = vadd.high.f32.bf16 %v2839_v17, %v6913_v38  ;;  %v7057_v43 = vadd.low.f32.bf16 %v2838_v46, %v6913_v38  ;;  %3452 = vperm.xlu0 %6938, %v8000_v16   ;;  %3456 = vperm.xlu1 %6939, %v8038_v41  }
 0x863   : > { %v2870_v1 = vadd.f32 %v7057_v43, %v2866_v34  ;;  %v2871_v61 = vadd.f32 %v7056_v59, %v2867_v30 }
 0x865   : > { %3448 = vperm.xlu0 %6938, %v8029_v12   ;;  %3444 = vperm.xlu1 %6939, %v8049_v32  }
 0x869   : > { %6940 = vset.pattern.permute.xlu0 %v9523_v2  ;;  %6941 = vset.pattern.permute.xlu1 %v9523_v2 }
 0x86a   : > { %3199 = vperm.xlu0 %6940, %v8000_v16  }
 0x86c   : > { %v2748_v52 = vpop.permute.xlu1 %2747 }
 0x86d   : > { %v3221_v62 = vpop.permute.xlu0 %3220 }
 0x870   : > { %v6908_v58 = vpop.permute.xlu1 %6907 }
 0x871   : > { %v7058_v54 = vadd.low.f32.bf16 %v2868_v50, %v6908_v58  ;;  %v7059_v11 = vadd.high.f32.bf16 %v2869_v25, %v6908_v58  ;;  %v3217_v59 = vpop.permute.xlu0 %3216 }
 0x873   : > { %v8119_v24 = vpack.c.bf16 %v7059_v11, %v7058_v54 }
 0x874   : > { %v6918_v44 = vpop.permute.xlu1 %6917 }
 0x875   : > { %6352 = vmatmul.mubr.msk.bf16.vlgmr.msra.gmra.mxu0 %vm2110_vm12, %v8119_v24  ;;  %v7060_v39 = vadd.low.f32.bf16 %v2870_v1, %v6918_v44  ;;  %v7061_v17 = vadd.high.f32.bf16 %v2871_v61, %v6918_v44 }
 0x876   : > { %3123 = vmatprep.mubr.bf16.mxu0 %v9523_v2 }
 0x877   : > { %v8128_v46 = vpack.c.bf16 %v7061_v17, %v7060_v39  ;;  %v3289_v44 = vpop.permute.xlu0 %3288 }
 0x87d   : > { %6353 = vmatmul.mubr.msk.bf16.gmra.mxu0 %vm2110_vm12, %v8128_v46 }
 0x87e   : > { %3907 = vmatprep.mubr.bf16.mxu0 %v9523_v2 }
 0x881   : > { %v3225_v55 = vpop.permute.xlu1 %3224 }
 0x8bf   : > { %v6842_v28 = vpop.f32.mrf.mxu0 }
 0x8c0   : > { %v2624_v33 = vmul.f32 0.125, %v6842_v28 }
 0x8c1   : > { %v2607_v15 = vpop.f32.mrf.mxu0 }
 0x8c2   : > { %2628 = vst.msk [vmem:[#allocation2 + $0x28] sm:$0xff] %vm2110_vm12, %v2624_v33  ;;  %v2622_v30 = vmul.f32 0.125, %v2607_v15  ;;  %v3349_v33 = vpop.permute.xlu0 %3348 }
 0x8c3   : > { %v6843_v19 = vpop.f32.mrf.mxu0 }
 0x8c4   : > { %v6818_v34 = vpop.f32.mrf.mxu1  ;;  %2626 = vst.msk [vmem:[#allocation2 + $0x8] sm:$0xff] %vm2110_vm12, %v2622_v30  ;;  %v2625_v5 = vmul.f32 0.125, %v6843_v19 }
 0x8c5   : > { %v2610_v12 = vpop.f32.mrf.mxu0  ;;  %v2356_v29 = vmul.f32 %v6818_v34, %v7898_v37 }
 0x8c6   : > { %v2339_v31 = vpop.f32.mrf.mxu1  ;;  %2629 = vst.msk [vmem:[#allocation2 + $0x38] sm:$0xff] %vm2110_vm12, %v2625_v5  ;;  %v2623_v40 = vmul.f32 0.125, %v2610_v12 }
 0x8c7   : > { %v2354_v48 = vmul.f32 %v2339_v31, %v7908_v57 }
 0x8c8   : > { %v6819_v41 = vpop.f32.mrf.mxu1  ;;  %2627 = vst.msk [vmem:[#allocation2 + $0x18] sm:$0xff] %vm2110_vm12, %v2623_v40 }
 0x8c9   : > { %v2357_v16 = vmul.f32 %v6819_v41, %v7903_v49 }
 0x8ca   : > { %v2342_v18 = vpop.f32.mrf.mxu1 }
 0x8cb   : > { %v2355_v60 = vmul.f32 %v2342_v18, %v7913_v6  ;;  %v2359_v47 = vpack.c.bf16 %v2357_v16, %v2356_v29 }
 0x8cd   : > { %v2358_v32 = vpack.c.bf16 %v2355_v60, %v2354_v48 }
 0x8cf   : > { %6824 = vmatprep.mubr.msk.bf16.mxu1 %vm1062_vm3, %v2358_v32  ;;  %v6850_v14 = vpop.f32.mrf.mxu0 }
 0x8d0   : > { %6825 = vmatmul.mubr.msk.bf16.vlgmr.msra.gmra.mxu1 %vm1062_vm3, %v2359_v47  ;;  %v2733_v35 = vmul.f32 %v6850_v14, %v7898_v37  ;;  %v6998_v37 = vld [vmem:[%s9509_s6 + $0x2c] ss:$20 sps:$4 sm:$0xff]  }
 0x8d1   : > { %6853 = vmatpush3.bf16.msra.mxu1 %v2750_v3  ;;  %v2716_v26 = vpop.f32.mrf.mxu0  ;;  %v3213_v3 = vpop.permute.xlu1 %3212 }
 0x8d2   : > { %6854 = vmatprep.subr.bf16.mxu1 %v2748_v52  ;;  %v2731_v21 = vmul.f32 %v2716_v26, %v7908_v57  ;;  %v6996_v57 = vld [vmem:[%s9509_s6 + $0x28] ss:$20 sps:$4 sm:$0xff]  }
 0x8d3   : > { %v6851_v51 = vpop.f32.mrf.mxu0 }
 0x8d4   : > { %v2734_v45 = vmul.f32 %v6851_v51, %v7903_v49  ;;  %v6993_v49 = vld [vmem:[%s9509_s6 + $0x50] ss:$20 sps:$4 sm:$0xff]  }
 0x8d5   : > { %6855 = vmatpush3.bf16.msra.mxu1 %v2748_v52  ;;  %v2719_v9 = vpop.f32.mrf.mxu0  ;;  %v3285_v7 = vpop.permute.xlu1 %3284 }
 0x8d6   : > { %3036 = vmatprep.subr.bf16.mxu1 %v6992_v22  ;;  %v2732_v42 = vmul.f32 %v2719_v9, %v7913_v6  ;;  %v2736_v27 = vpack.c.bf16 %v2734_v45, %v2733_v35  ;;  %v7001_v6 = vld [vmem:[%s9509_s6 + $0x4] ss:$20 sps:$4 sm:$0xff]  }
 0x8d8   : > { %v2735_v63 = vpack.c.bf16 %v2732_v42, %v2731_v21  ;;  %v3345_v42 = vpop.permute.xlu0 %3344 }
 0x8d9   : > { %v3277_v52 = vpop.permute.xlu1 %3276 }
 0x8da   : > { %6856 = vmatprep.mubr.msk.bf16.mxu1 %vm1062_vm3, %v2735_v63 }
 0x8db   : > { %6857 = vmatmul.mubr.msk.bf16.vlgmr.msra.gmra.mxu1 %vm1062_vm3, %v2736_v27  ;;  %v3473_v27 = vld [vmem:[%s9511_s8 + $0x10] sm:$0xff] }
 0x8dc   : > { %3037 = vmatpush1.bf16.msra.mxu1 %v6990_v53  ;;  %3060 = vmatprep.mubr.bf16.mxu1 %v9523_v2 }
 0x8dd   : > { %3038 = vmatprep.subr.bf16.mxu1 %v6995_v56  ;;  %v3281_v50 = vpop.permute.xlu1 %3280 }
 0x8e0   : > { %3039 = vmatpush1.bf16.msra.mxu1 %v6993_v49  ;;  %v3417_v49 = vpop.permute.xlu0 %3416 }
 0x8e1   : > { %3040 = vmatprep.subr.bf16.mxu1 %v6998_v37  ;;  %v3353_v43 = vpop.permute.xlu1 %3352 }
 0x8e4   : > { %3041 = vmatpush1.bf16.msra.mxu1 %v6996_v57 }
 0x8e5   : > { %3042 = vmatprep.subr.bf16.mxu1 %v7001_v6  ;;  %v3341_v39 = vpop.permute.xlu1 %3340 }
 0x8e8   : > { %3043 = vmatpush1.bf16.msra.mxu1 %v6999_v13  ;;  %v3474_v13 = vld [vmem:[%s9511_s8 + $0x18] sm:$0xff] }
 0x8e9   : > { %6860 = vmatprep.subr.bf16.mxu1 %v7002_v4  ;;  %v3413_v47 = vpop.permute.xlu1 %3412 }
 0x8eb   : > { %6350 = vmatmul.mubr.msk.bf16.vlgmr.msra.gmra.mxu1 %vm2110_vm12, %v8119_v24 }
 0x8ec   : > { %6861 = vmatpush3.bf16.msra.mxu1 %v7002_v4  ;;  %3070 = vmatprep.mubr.bf16.mxu1 %v9523_v2 }
 0x8ed   : > { %6862 = vmatprep.subr.bf16.mxu1 %v7003_v36  ;;  %v3405_v9 = vpop.permute.xlu1 %3404 }
 0x8f0   : > { %6863 = vmatpush3.bf16.msra.mxu1 %v7003_v36 }
 0x8f1   : > { %6864 = vmatprep.subr.bf16.mxu1 %v7004_v20  ;;  %v3409_v56 = vpop.permute.xlu1 %3408 }
 0x8f3   : > { %6351 = vmatmul.mubr.msk.bf16.gmra.mxu1 %vm2110_vm12, %v8128_v46 }
 0x8f4   : > { %6865 = vmatpush3.bf16.msra.mxu1 %v7004_v20  ;;  %6868 = vmatprep.mubr.msk.bf16.mxu1 %vm2110_vm12, %v8119_v24 }
 0x8f5   : > { %6866 = vmatprep.subr.bf16.mxu1 %v7005_v0  ;;  %v8278_v4 = vpop.permute.xlu1 %3204 }
 0x8f8   : > { %6867 = vmatpush3.bf16.msra.mxu1 %v7005_v0 }
 0x8f9   : > { %v3261_v0 = vpop.permute.xlu1 %3260 }
 0x8fb   : > { %6869 = vmatmul.mubr.msk.bf16.vlgmr.msra.gmra.mxu1 %vm2110_vm12, %v8128_v46  ;;  %vm2451_vm12 = vcmask 1048064  }
 0x8fc   : > { %4580 = vmatprep.mubr.bf16.mxu1 %v9523_v2 }
 0x935   : > { %v8203_v38 = vpop.f32.mrf.mxu0 }
 0x936   : > { %v3355_v10 = vmul.f32 %v3341_v39, %v8203_v38 }
 0x937   : > { %v8205_v8 = vpop.f32.mrf.mxu0 }
 0x938   : > { %v3419_v20 = vmul.f32 %v3405_v9, %v8205_v8 }
 0x939   : > { %v8207_v58 = vpop.f32.mrf.mxu0 }
 0x93a   : > { %v3356_v63 = vmul.f32 %v3345_v42, %v8207_v58 }
 0x93b   : > { %v8209_v25 = vpop.f32.mrf.mxu0 }
 0x93d   : > { %v8211_v54 = vpop.f32.mrf.mxu0 }
 0x93e   : > { %v3357_v15 = vmul.f32 %v3349_v33, %v8211_v54 }
 0x93f   : > { %v8213_v1 = vpop.f32.mrf.mxu0 }
 0x940   : > { %v3421_v35 = vmul.f32 %v3413_v47, %v8213_v1 }
 0x941   : > { %v8217_v28 = vpop.f32.mrf.mxu0 }
 0x942   : > { %v3358_v30 = vmul.f32 %v3353_v43, %v8217_v28 }
 0x943   : > { %v8264_v53 = vpop.f32.mrf.mxu0 }
 0x944   : > { %v3422_v57 = vmul.f32 %v3417_v49, %v8264_v53 }
 0x990   : > { %v6826_v11 = vpop.f32.mrf.mxu1 }
 0x991   : > { %v2433_v24 = vmul.f32 0.125, %v6826_v11 }
 0x992   : > { %v2416_v61 = vpop.f32.mrf.mxu1 }
 0x993   : > { %2443 = vrot.lane.b32.xlu1 %v2433_v24, %s7072_s21  ;;  %v2431_v36 = vmul.f32 0.125, %v2416_v61 }
 0x994   : > { %v6827_v17 = vpop.f32.mrf.mxu1 }
 0x995   : > { %v2434_v46 = vmul.f32 0.125, %v6827_v17 }
 0x996   : > { %v2419_v34 = vpop.f32.mrf.mxu1 }
 0x997   : > { %2445 = vrot.lane.b32.xlu0 %v2434_v46, %s7072_s21  ;;  %3363 = vrot.lane.b32.xlu1 %v3355_v10, %s7072_s21 }
 0x99b   : > { %3367 = vrot.lane.b32.xlu1 %v3357_v15, %s7072_s21  ;;  %3369 = vrot.lane.b32.xlu0 %v3358_v30, %s7072_s21  ;;  %v8225_v19 = vpop.f32.mrf.mxu1 }
 0x99d   : > { %v8227_v5 = vpop.f32.mrf.mxu1 }
 0x99f   : > { %v8229_v31 = vpop.f32.mrf.mxu1 }
 0x9a1   : > { %v8231_v12 = vpop.f32.mrf.mxu1 }
 0x9ab   : > { %v8233_v40 = vpop.f32.mrf.mxu1 }
 0x9ac   : > { %v3227_v41 = vmul.f32 %v3213_v3, %v8233_v40  ;;  %v3471_v3 = vld [vmem:[%s9511_s8] sm:$0xff] }
 0x9ad   : > { %v8236_v16 = vpop.f32.mrf.mxu1 }
 0x9ae   : > { %3235 = vrot.lane.b32.xlu1 %v3227_v41, %s7072_s21  ;;  %v3291_v48 = vmul.f32 %v3277_v52, %v8236_v16  ;;  %v3190_v52 = vpop.permute.xlu1 %3189 }
 0x9af   : > { %v8239_v18 = vpop.f32.mrf.mxu1 }
 0x9b0   : > { %v3228_v14 = vmul.f32 %v3217_v59, %v8239_v18 }
 0x9b1   : > { %v8242_v60 = vpop.f32.mrf.mxu1 }
 0x9b2   : > { %v3292_v29 = vmul.f32 %v3281_v50, %v8242_v60  ;;  %3299 = vrot.lane.b32.xlu1 %v3291_v48, %s7072_s21  ;;  %v3265_v50 = vpop.permute.xlu0 %3264  ;;  %v3195_v59 = vpop.permute.xlu1 %3194 }
 0x9b3   : > { %v8246_v32 = vpop.f32.mrf.mxu1 }
 0x9b4   : > { %3301 = vrot.lane.b32.xlu0 %v3292_v29, %s7072_s21  ;;  %v3229_v45 = vmul.f32 %v3221_v62, %v8246_v32  ;;  %v3472_v62 = vld [vmem:[%s9511_s8 + $0x8] sm:$0xff] }
 0x9b5   : > { %v8250_v26 = vpop.f32.mrf.mxu1 }
 0x9b6   : > { %v3293_v22 = vmul.f32 %v3285_v7, %v8250_v26  ;;  %3237 = vrot.lane.b32.xlu1 %v3228_v14, %s7072_s21  ;;  %v3420_v7 = vmul.f32 %v3409_v56, %v8209_v25  ;;  %v3253_v43 = vpop.permute.xlu0 %3252  ;;  %v3257_v11 = vpop.permute.xlu1 %3256 }
 0x9b7   : > { %v8254_v51 = vpop.f32.mrf.mxu1 }
 0x9b8   : > { %3303 = vrot.lane.b32.xlu0 %v3293_v22, %s7072_s21  ;;  %v3230_v21 = vmul.f32 %v3225_v55, %v8254_v51  ;;  %v2432_v55 = vmul.f32 0.125, %v2419_v34 }
 0x9b9   : > { %v8270_v37 = vpop.f32.mrf.mxu1 }
 0x9ba   : > { %3239 = vrot.lane.b32.xlu1 %v3229_v45, %s7072_s21  ;;  %v3294_v6 = vmul.f32 %v3289_v44, %v8270_v37  ;;  %v3325_v44 = vpop.permute.xlu0 %3324  ;;  %v8293_v24 = vpop.permute.xlu1 %3328  ;;  %v3207_v45 = vmul.f32 %v3190_v52, %v8233_v40 }
 0x9bc   : > { %3241 = vrot.lane.b32.xlu0 %v3230_v21, %s7072_s21  ;;  %v3267_v21 = vmul.f32 %v3253_v43, %v8236_v16 }
 0x9be   : > { %3431 = vrot.lane.b32.xlu1 %v3421_v35, %s7072_s21  ;;  %v3321_v61 = vpop.permute.xlu0 %3320  ;;  %v3317_v39 = vpop.permute.xlu1 %3316 }
 0x9bf   : > { %v3331_v56 = vmul.f32 %v3317_v39, %v8203_v38  ;;  %v3332_v43 = vmul.f32 %v3321_v61, %v8207_v58  ;;  %v3269_v39 = vmul.f32 %v3261_v0, %v8250_v26 }
 0x9c0   : > { %3365 = vrot.lane.b32.xlu0 %v3356_v63, %s7072_s21 }
 0x9c2   : > { %3487 = vperm.xlu1 %6941, %v3473_v27   ;;  %v8295_v17 = vpop.permute.xlu0 %3392  ;;  %v3389_v10 = vpop.permute.xlu1 %3388 }
 0x9c3   : > { %v3397_v0 = vmul.f32 %v3389_v10, %v8213_v1  ;;  %v3334_v1 = vmul.f32 %v8293_v24, %v8217_v28 }
 0x9c4   : > { %3433 = vrot.lane.b32.xlu0 %v3422_v57, %s7072_s21 }
 0x9c6   : > { %3305 = vrot.lane.b32.xlu1 %v3294_v6, %s7072_s21  ;;  %v3381_v46 = vpop.permute.xlu0 %3380  ;;  %v3385_v33 = vpop.permute.xlu1 %3384  ;;  %v3208_v6 = vmul.f32 %v3195_v59, %v8239_v18  ;;  %v3210_v18 = vmul.f32 %v8278_v4, %v8254_v51 }
 0x9c7   : > { %v3396_v58 = vmul.f32 %v3385_v33, %v8209_v25 }
 0x9c8   : > { %3492 = vperm.xlu0 %6940, %v3474_v13  }
 0x9ca   : > { %2439 = vrot.lane.b32.xlu1 %v2431_v36, %s7072_s21  ;;  %v3453_v15 = vpop.permute.xlu0 %3452  ;;  %v8297_v30 = vpop.permute.xlu1 %3456 }
 0x9cc   : > { %3427 = vrot.lane.b32.xlu0 %v3419_v20, %s7072_s21  ;;  %v3395_v20 = vmul.f32 %v3381_v46, %v8205_v8 }
 0x9ce   : > { %2441 = vrot.lane.b32.xlu1 %v2432_v55, %s7072_s21  ;;  %v8299_v34 = vpop.permute.xlu0 %3448  ;;  %v8301_v41 = vpop.permute.xlu1 %3444  ;;  %v3268_v55 = vmul.f32 %v3257_v11, %v8242_v60  ;;  %v3270_v60 = vmul.f32 %v3265_v50, %v8270_v37 }
 0x9d0   : > { %3477 = vperm.xlu0 %6940, %v3471_v3  }
 0x9d2   : > { %3429 = vrot.lane.b32.xlu1 %v3420_v7, %s7072_s21  ;;  %v3200_v48 = vpop.permute.xlu0 %3199 }
 0x9d3   : > { %v3209_v16 = vmul.f32 %v3200_v48, %v8246_v32  ;;  %v3333_v32 = vmul.f32 %v3325_v44, %v8211_v54 }
 0x9d6   : > { %3482 = vperm.xlu1 %6941, %v3472_v62  }
 0xa05   : > { %v2444_v29 = vpop.permute.xlu1 %2443 }
 0xa06   : > { %2454 = vst.msk [vmem:[#allocation2 + $0x20] sm:$0xff] %vm2451_vm12, %v2444_v29 }
 0xa09   : > { %v2446_v47 = vpop.permute.xlu0 %2445  ;;  %v3364_v14 = vpop.permute.xlu1 %3363 }
 0xa0a   : > { %2455 = vst.msk [vmem:[#allocation2 + $0x30] sm:$0xff] %vm2451_vm12, %v2446_v47 }
 0xa0d   : > { %v3368_v22 = vpop.permute.xlu1 %3367  ;;  %v3370_v35 = vpop.permute.xlu0 %3369 }
 0xa20   : > { %v3236_v9 = vpop.permute.xlu1 %3235 }
 0xa21   : > { %v3247_v42 = vadd.f32 %v3236_v9, %v3207_v45  ;;  %v6870_v9 = vpop.f32.mrf.mxu1 }
 0xa22   : > { %v3461_v37 = vmul.f32 %v6870_v9, %v3453_v15 }
 0xa23   : > { %v3271_v63 = vadd.f32 %v3267_v21, %v3247_v42 }
 0xa24   : > { %v3300_v27 = vpop.permute.xlu1 %3299 }
 0xa25   : > { %v3311_v49 = vadd.f32 %v3300_v27, %v3271_v63 }
 0xa26   : > { %v3302_v57 = vpop.permute.xlu0 %3301 }
 0xa27   : > { %v3335_v13 = vadd.f32 %v3331_v56, %v3311_v49  ;;  %v8322_v49 = vld [vmem:[#allocation2 + $0x20] sm:$0xff] }
 0xa28   : > { %v3238_v36 = vpop.permute.xlu1 %3237 }
 0xa29   : > { %v3248_v40 = vadd.f32 %v3238_v36, %v3208_v6  ;;  %v3375_v3 = vadd.f32 %v3364_v14, %v3335_v13  ;;  %v3398_v36 = vmul.f32 %v8295_v17, %v8264_v53 }
 0xa2a   : > { %v3304_v7 = vpop.permute.xlu0 %3303 }
 0xa2b   : > { %v3272_v52 = vadd.f32 %v3268_v55, %v3248_v40  ;;  %v3399_v62 = vadd.f32 %v3395_v20, %v3375_v3 }
 0xa2c   : > { %v3240_v38 = vpop.permute.xlu1 %3239 }
 0xa2d   : > { %v3249_v59 = vadd.f32 %v3240_v38, %v3209_v16  ;;  %v3312_v29 = vadd.f32 %v3302_v57, %v3272_v52 }
 0xa2e   : > { %v3242_v8 = vpop.permute.xlu0 %3241 }
 0xa2f   : > { %v3273_v11 = vadd.f32 %v3269_v39, %v3249_v59  ;;  %v3250_v46 = vadd.f32 %v3242_v8, %v3210_v18  ;;  %v3336_v47 = vadd.f32 %v3332_v43, %v3312_v29 }
 0xa30   : > { %v3432_v42 = vpop.permute.xlu1 %3431 }
 0xa31   : > { %v3313_v48 = vadd.f32 %v3304_v7, %v3273_v11  ;;  %v3274_v14 = vadd.f32 %v3270_v60, %v3250_v46 }
 0xa32   : > { %v3366_v45 = vpop.permute.xlu0 %3365 }
 0xa33   : > { %v3337_v61 = vadd.f32 %v3333_v32, %v3313_v48  ;;  %v3376_v26 = vadd.f32 %v3366_v45, %v3336_v47  ;;  %v3502_v47 = vld [vmem:[#allocation2 + $0x30] sm:$0xff] }
 0xa35   : > { %v3377_v51 = vadd.f32 %v3368_v22, %v3337_v61  ;;  %v3400_v4 = vadd.f32 %v3396_v58, %v3376_v26  ;;  %v3168_v22 = vpop.f32.mrf.mxu1 }
 0xa36   : > { %v3434_v54 = vpop.permute.xlu0 %3433  ;;  %v3459_v28 = vmul.f32 %v8301_v41, %v3168_v22  ;;  %v2808_v22 = vmul.f32 0.125, %v8227_v5 }
 0xa37   : > { %v3401_v21 = vadd.f32 %v3397_v0, %v3377_v51  ;;  %v6871_v40 = vpop.f32.mrf.mxu1 }
 0xa38   : > { %v3462_v43 = vmul.f32 %v6871_v40, %v8297_v30 }
 0xa39   : > { %v3441_v50 = vadd.f32 %v3432_v42, %v3401_v21  ;;  %v3171_v53 = vpop.f32.mrf.mxu1 }
 0xa3a   : > { %v3460_v29 = vmul.f32 %v8299_v34, %v3171_v53 }
 0xa3b   : > { %v3465_v63 = vadd.f32 %v3461_v37, %v3441_v50 }
 0xa3d   : > { %v3488_v27 = vpop.permute.xlu1 %3487  ;;  %v3469_v56 = vmul.f32 0.25, %v3465_v63 }
 0xa3f   : > { %v8320_v44 = vadd.f32 %v3488_v27, %v3469_v56 }
 0xa41   : > { %v3505_v25 = vadd.f32 %v8322_v49, %v8320_v44  ;;  %v3306_v33 = vpop.permute.xlu1 %3305 }
 0xa42   : > { %v3314_v10 = vadd.f32 %v3306_v33, %v3274_v14 }
 0xa43   : > { %v3509_v57 = vmul.f32 0.6666667, %v3505_v25  ;;  %v3493_v15 = vpop.permute.xlu0 %3492 }
 0xa44   : > { %v3338_v6 = vadd.f32 %v3334_v1, %v3314_v10  ;;  %v2810_v1 = vmul.f32 0.125, %v8225_v19  ;;  %v2809_v19 = vmul.f32 0.125, %v8231_v12 }
 0xa45   : > { %vm3517_vm0 = vcmp.ge.f32.partialorder %v3509_v57, 1.0  ;;  %v2440_v13 = vpop.permute.xlu1 %2439 }
 0xa46   : > { %v6358_v20 = vsel %vm3517_vm0, 1.0, %v7071_v23  ;;  %v3378_v55 = vadd.f32 %v3370_v35, %v3338_v6  ;;  %2452 = vst.msk [vmem:[#allocation2] sm:$0xff] %vm2451_vm12, %v2440_v13 }
 0xa47   : > { %v6664_v3 = vpack.c.bf16 %v6358_v20, %v6358_v20  ;;  %v3428_v7 = vpop.permute.xlu0 %3427  ;;  %v3529_v32 = vsub.f32 1.0, %v6358_v20 }
 0xa48   : > { %v3402_v24 = vadd.f32 %v3398_v36, %v3378_v55  ;;  %v3439_v16 = vadd.f32 %v3428_v7, %v3399_v62 }
 0xa49   : > { %3553 = vst.msk [vmem:[#allocation4 + $0x10] sm:$0xf] %vm654_vm1, %v6664_v3  ;;  %v2442_v52 = vpop.permute.xlu1 %2441  ;;  %v8350_v51 = vmul.f32 %v3529_v32, %v3509_v57  ;;  %v2811_v57 = vmul.f32 0.125, %v8229_v31 }
 0xa4a   : > { %v3442_v38 = vadd.f32 %v3434_v54, %v3402_v24  ;;  %v3463_v39 = vadd.f32 %v3459_v28, %v3439_v16  ;;  %2453 = vst.msk [vmem:[#allocation2 + $0x10] sm:$0xff] %vm2451_vm12, %v2442_v52 }
 0xa4b   : > { %v3478_v18 = vpop.permute.xlu0 %3477 }
 0xa4c   : > { %v3466_v17 = vadd.f32 %v3462_v43, %v3442_v38  ;;  %v3467_v35 = vmul.f32 0.25, %v3463_v39 }
 0xa4d   : > { %v3430_v59 = vpop.permute.xlu1 %3429  ;;  %v3499_v60 = vld [vmem:[#allocation2] sm:$0xff] }
 0xa4e   : > { %v3470_v8 = vmul.f32 0.25, %v3466_v17  ;;  %v8337_v41 = vadd.f32 %v3478_v18, %v3467_v35  ;;  %v3440_v62 = vadd.f32 %v3430_v59, %v3400_v4 }
 0xa50   : > { %v8339_v11 = vadd.f32 %v3493_v15, %v3470_v8  ;;  %v3503_v30 = vadd.f32 %v3499_v60, %v8337_v41  ;;  %v3464_v46 = vadd.f32 %v3460_v29, %v3440_v62  ;;  %3563 = vrot.lane.b32.xlu0 %v8337_v41, %s7072_s21 }
 0xa51   : > { %v3483_v34 = vpop.permute.xlu1 %3482  ;;  %v3500_v0 = vld [vmem:[#allocation2 + $0x10] sm:$0xff] }
 0xa52   : > { %v3506_v48 = vadd.f32 %v3502_v47, %v8339_v11  ;;  %v3507_v14 = vmul.f32 0.6666667, %v3503_v30  ;;  %v3468_v45 = vmul.f32 0.25, %v3464_v46 }
 0xa54   : > { %v3510_v58 = vmul.f32 0.6666667, %v3506_v48  ;;  %vm3515_vm2 = vcmp.ge.f32.partialorder %v3507_v14, 1.0  ;;  %v8345_v61 = vadd.f32 %v3483_v34, %v3468_v45  ;;  %3567 = vrot.lane.b32.xlu0 %v8320_v44, %s7072_s21 }
 0xa55   : > { %v6356_v26 = vsel %vm3515_vm2, 1.0, %v7071_v23 }
 0xa56   : > { %vm3518_vm4 = vcmp.ge.f32.partialorder %v3510_v58, 1.0  ;;  %v6662_v4 = vpack.c.bf16 %v6356_v26, %v6356_v26  ;;  %v3504_v9 = vadd.f32 %v3500_v0, %v8345_v61  ;;  %3565 = vrot.lane.b32.xlu1 %v8345_v61, %s7072_s21  ;;  %v3527_v21 = vsub.f32 1.0, %v6356_v26 }
 0xa57   : > { %v6359_v42 = vsel %vm3518_vm4, 1.0, %v7071_v23 }
 0xa58   : > { %v6665_v37 = vpack.c.bf16 %v6359_v42, %v6359_v42  ;;  %3551 = vst.msk [vmem:[#allocation4] sm:$0xf] %vm654_vm1, %v6662_v4  ;;  %v3508_v50 = vmul.f32 0.6666667, %v3504_v9  ;;  %3587 = vrot.lane.b32.xlu0 %v8350_v51, %s7072_s21  ;;  %v3530_v63 = vsub.f32 1.0, %v6359_v42  ;;  %v3531_v27 = vmul.f32 %v3527_v21, %v3507_v14 }
 0xa5a   : > { %3554 = vst.msk [vmem:[#allocation4 + $0x18] sm:$0xf] %vm654_vm1, %v6665_v37  ;;  %vm3516_vm5 = vcmp.ge.f32.partialorder %v3508_v50, 1.0  ;;  %3569 = vrot.lane.b32.xlu1 %v8339_v11, %s7072_s21  ;;  %v3534_v25 = vmul.f32 %v3530_v63, %v3510_v58 }
 0xa5b   : > { %v6357_v56 = vsel %vm3516_vm5, 1.0, %v7071_v23 }
 0xa5c   : > { %v6663_v54 = vpack.c.bf16 %v6357_v56, %v6357_v56  ;;  %3583 = vrot.lane.b32.xlu0 %v3531_v27, %s7072_s21  ;;  %v3528_v33 = vsub.f32 1.0, %v6357_v56 }
 0xa5e   : > { %3552 = vst.msk [vmem:[#allocation4 + $0x8] sm:$0xf] %vm654_vm1, %v6663_v54  ;;  %3589 = vrot.lane.b32.xlu1 %v3534_v25, %s7072_s21  ;;  %v8368_v10 = vmul.f32 %v3528_v33, %v3508_v50 }
 0xa60   : > { %2820 = vrot.lane.b32.xlu0 %v2810_v1, %s7072_s21 }
 0xa62   : > { %3585 = vrot.lane.b32.xlu1 %v8368_v10, %s7072_s21 }
 0xa64   : > { %2816 = vrot.lane.b32.xlu0 %v2808_v22, %s7072_s21 }
 0xa66   : > { %2822 = vrot.lane.b32.xlu1 %v2811_v57, %s7072_s21 }
 0xa6a   : > { %2818 = vrot.lane.b32.xlu1 %v2809_v19, %s7072_s21 }
 0xac2   : > { %v8378_v15 = vpop.permute.xlu0 %3563 }
 0xac3   : > { %v3575_v55 = vadd.f32 %v8378_v15, %v3499_v60 }
 0xac6   : > { %v8380_v6 = vpop.permute.xlu0 %3567 }
 0xac7   : > { %v3577_v5 = vadd.f32 %v8380_v6, %v8322_v49 }
 0xac8   : > { %v8382_v13 = vpop.permute.xlu1 %3565 }
 0xac9   : > { %v3576_v43 = vadd.f32 %v8382_v13, %v3500_v0 }
 0xaca   : > { %v3588_v36 = vpop.permute.xlu0 %3587 }
 0xacb   : > { %v3597_v20 = vsub.f32 %v3577_v5, %v3588_v36 }
 0xacc   : > { %v8386_v31 = vpop.permute.xlu1 %3569 }
 0xacd   : > { %v3601_v40 = vmul.f32 0.6666667, %v3597_v20  ;;  %v3578_v12 = vadd.f32 %v8386_v31, %v3502_v47 }
 0xace   : > { %v3584_v3 = vpop.permute.xlu0 %3583 }
 0xacf   : > { %v3595_v7 = vsub.f32 %v3575_v55, %v3584_v3  ;;  %3611 = vrot.lane.b32.xlu0 %v3601_v40, %s7072_s21 }
 0xad0   : > { %v3590_v28 = vpop.permute.xlu1 %3589 }
 0xad1   : > { %v3599_v24 = vmul.f32 0.6666667, %v3595_v7  ;;  %v3598_v16 = vsub.f32 %v3578_v12, %v3590_v28 }
 0xad2   : > { %v2821_v52 = vpop.permute.xlu0 %2820 }
 0xad3   : > { %v3602_v49 = vmul.f32 0.6666667, %v3598_v16  ;;  %2830 = vst.msk [vmem:[#allocation2 + $0x28] sm:$0xff] %vm2451_vm12, %v2821_v52  ;;  %3607 = vrot.lane.b32.xlu0 %v3599_v24, %s7072_s21 }
 0xad4   : > { %v3586_v38 = vpop.permute.xlu1 %3585 }
 0xad5   : > { %v3596_v39 = vsub.f32 %v3576_v43, %v3586_v38  ;;  %3613 = vrot.lane.b32.xlu1 %v3602_v49, %s7072_s21 }
 0xad6   : > { %v2817_v53 = vpop.permute.xlu0 %2816 }
 0xad7   : > { %v3600_v17 = vmul.f32 0.6666667, %v3596_v39  ;;  %2828 = vst.msk [vmem:[#allocation2 + $0x8] sm:$0xff] %vm2451_vm12, %v2817_v53 }
 0xad8   : > { %v2823_v35 = vpop.permute.xlu1 %2822 }
 0xad9   : > { %2831 = vst.msk [vmem:[#allocation2 + $0x38] sm:$0xff] %vm2451_vm12, %v2823_v35  ;;  %3609 = vrot.lane.b32.xlu1 %v3600_v17, %s7072_s21 }
 0xada   : > { %v8400_v8 = vld [vmem:[#allocation2 + $0x28] sm:$0xff] }
 0xadb   : > { %v3677_v32 = vadd.f32 %v8400_v8, %v8320_v44  ;;  %v3737_v35 = vadd.f32 %v8400_v8, %v8380_v6 }
 0xadc   : > { %v2819_v18 = vpop.permute.xlu1 %2818 }
 0xadd   : > { %2829 = vst.msk [vmem:[#allocation2 + $0x18] sm:$0xff] %vm2451_vm12, %v2819_v18 }
 0xade   : > { %v8408_v45 = vld [vmem:[#allocation2 + $0x8] sm:$0xff] }
 0xadf   : > { %v3675_v44 = vadd.f32 %v8408_v45, %v8337_v41 }
 0xae0   : > { %v3674_v0 = vld [vmem:[#allocation2 + $0x38] sm:$0xff] }
 0xae4   : > { %v3672_v33 = vld [vmem:[#allocation2 + $0x18] sm:$0xff] }
 0xae5   : > { %v3676_v36 = vadd.f32 %v3672_v33, %v8345_v61  ;;  %v3736_v6 = vadd.f32 %v3672_v33, %v8382_v13 }
 0xb41   : > { %v3612_v59 = vpop.permute.xlu0 %3611 }
 0xb42   : > { %v3621_v29 = vadd.f32 %v3612_v59, %v8350_v51 }
 0xb44   : > { %vm3625_vm6 = vcmp.ge.f32.partialorder %v3621_v29, 1.0 }
 0xb45   : > { %v8403_v62 = vsel %vm3625_vm6, 1.0, %v7071_v23  ;;  %v3608_v60 = vpop.permute.xlu0 %3607 }
 0xb46   : > { %v3637_v30 = vsub.f32 1.0, %v8403_v62  ;;  %v3619_v46 = vadd.f32 %v3608_v60, %v3531_v27  ;;  %v3678_v27 = vadd.f32 %v3674_v0, %v8339_v11  ;;  %v3735_v60 = vadd.f32 %v8408_v45, %v8378_v15 }
 0xb47   : > { %v3614_v47 = vpop.permute.xlu1 %3613  ;;  %v6668_v8 = vpack.c.bf16 %v8403_v62, %v8403_v62 }
 0xb48   : > { %v3641_v48 = vmul.f32 %v3637_v30, %v3621_v29  ;;  %vm3623_vm7 = vcmp.ge.f32.partialorder %v3619_v46, 1.0  ;;  %v3622_v14 = vadd.f32 %v3614_v47, %v3534_v25  ;;  %v3738_v47 = vadd.f32 %v3674_v0, %v8386_v31 }
 0xb49   : > { %v8411_v34 = vsel %vm3623_vm7, 1.0, %v7071_v23 }
 0xb4a   : > { %v3681_v58 = vsub.f32 %v3677_v32, %v3641_v48  ;;  %v3635_v26 = vsub.f32 1.0, %v8411_v34  ;;  %vm3626_vm8 = vcmp.ge.f32.partialorder %v3622_v14, 1.0  ;;  %v6666_v31 = vpack.c.bf16 %v8411_v34, %v8411_v34 }
 0xb4b   : > { %v8415_v51 = vsel %vm3626_vm8, 1.0, %v7071_v23  ;;  %v3610_v4 = vpop.permute.xlu1 %3609 }
 0xb4c   : > { %v3685_v9 = vmul.f32 0.6666667, %v3681_v58  ;;  %v3639_v21 = vmul.f32 %v3635_v26, %v3619_v46  ;;  %v3638_v42 = vsub.f32 1.0, %v8415_v51  ;;  %v3620_v37 = vadd.f32 %v3610_v4, %v8368_v10 }
 0xb4d   : > { %v6669_v13 = vpack.c.bf16 %v8415_v51, %v8415_v51 }
 0xb4e   : > { %v3689_v50 = vadd.f32 %v3685_v9, %v3641_v48  ;;  %v3679_v63 = vsub.f32 %v3675_v44, %v3639_v21  ;;  %v3642_v56 = vmul.f32 %v3638_v42, %v3622_v14  ;;  %vm3624_vm9 = vcmp.ge.f32.partialorder %v3620_v37, 1.0 }
 0xb4f   : > { %v8423_v1 = vsel %vm3624_vm9, 1.0, %v7071_v23 }
 0xb50   : > { %vm3693_vm10 = vcmp.ge.f32.partialorder %v3689_v50, 1.0  ;;  %v3683_v54 = vmul.f32 0.6666667, %v3679_v63  ;;  %v3682_v25 = vsub.f32 %v3678_v27, %v3642_v56  ;;  %v3636_v22 = vsub.f32 1.0, %v8423_v1 }
 0xb51   : > { %v6374_v41 = vsel %vm3693_vm10, 1.0, %v7071_v23  ;;  %v6667_v62 = vpack.c.bf16 %v8423_v1, %v8423_v1  ;;  %v3938_v1 = vld [vmem:[%s9513_s10 + $0x10] sm:$0xff] }
 0xb52   : > { %v6672_v57 = vpack.c.bf16 %v6374_v41, %v6374_v41  ;;  %v3687_v19 = vadd.f32 %v3683_v54, %v3639_v21  ;;  %v3686_v10 = vmul.f32 0.6666667, %v3682_v25  ;;  %v3705_v5 = vsub.f32 1.0, %v6374_v41 }
 0xb53   : > { %v3640_v11 = vmul.f32 %v3636_v22, %v3620_v37 }
 0xb54   : > { %3729 = vst.msk [vmem:[#allocation4 + $0x14] sm:$0xf] %vm654_vm1, %v6672_v57  ;;  %vm3691_vm11 = vcmp.ge.f32.partialorder %v3687_v19, 1.0  ;;  %v3690_v20 = vadd.f32 %v3686_v10, %v3642_v56  ;;  %v3709_v55 = vmul.f32 %v3705_v5, %v3689_v50  ;;  %v3939_v5 = vld [vmem:[%s9513_s10 + $0x18] sm:$0xff] }
 0xb55   : > { %v6372_v40 = vsel %vm3691_vm11, 1.0, %v7071_v23  ;;  %v3680_v3 = vsub.f32 %v3676_v36, %v3640_v11  ;;  %v3936_v36 = vld [vmem:[%s9513_s10] sm:$0xff] }
 0xb56   : > { %v6670_v12 = vpack.c.bf16 %v6372_v40, %v6372_v40  ;;  %vm3694_vm13 = vcmp.ge.f32.partialorder %v3690_v20, 1.0  ;;  %3747 = vrot.lane.b32.xlu0 %v3709_v55, %s7072_s21  ;;  %v3703_v7 = vsub.f32 1.0, %v6372_v40  ;;  %v3976_v40 = vld [vmem:[%s9514_s11] sm:$0xff] }
 0xb57   : > { %v6375_v28 = vsel %vm3694_vm13, 1.0, %v7071_v23  ;;  %v3684_v24 = vmul.f32 0.6666667, %v3680_v3  ;;  %v3983_v3 = vld [vmem:[%s9515_s12 + $0x18] sm:$0xff] }
 0xb58   : > { %3727 = vst.msk [vmem:[#allocation4 + $0x4] sm:$0xf] %vm654_vm1, %v6670_v12  ;;  %v6673_v61 = vpack.c.bf16 %v6375_v28, %v6375_v28  ;;  %v3707_v16 = vmul.f32 %v3703_v7, %v3687_v19  ;;  %v3706_v52 = vsub.f32 1.0, %v6375_v28  ;;  %v3978_v19 = vld [vmem:[%s9514_s11 + $0x10] sm:$0xff]  ;;  %v3980_v12 = vld [vmem:[%s9515_s12] sm:$0xff]  ;;  %v3977_v7 = vld [vmem:[%s9514_s11 + $0x8] sm:$0xff] }
 0xb59   : > { %v3688_v43 = vadd.f32 %v3684_v24, %v3640_v11  ;;  %v3979_v11 = vld [vmem:[%s9514_s11 + $0x18] sm:$0xff]  ;;  %v3981_v28 = vld [vmem:[%s9515_s12 + $0x8] sm:$0xff] }
 0xb5a   : > { %3730 = vst.msk [vmem:[#allocation4 + $0x1c] sm:$0xf] %vm654_vm1, %v6673_v61  ;;  %3743 = vrot.lane.b32.xlu0 %v3707_v16, %s7072_s21  ;;  %v3710_v49 = vmul.f32 %v3706_v52, %v3690_v20  ;;  %v3982_v20 = vld [vmem:[%s9515_s12 + $0x10] sm:$0xff] }
 0xb5b   : > { %vm3692_vm14 = vcmp.ge.f32.partialorder %v3688_v43, 1.0 }
 0xb5c   : > { %v6373_v38 = vsel %vm3692_vm14, 1.0, %v7071_v23  ;;  %3749 = vrot.lane.b32.xlu1 %v3710_v49, %s7072_s21 }
 0xb5d   : > { %v6671_v39 = vpack.c.bf16 %v6373_v38, %v6373_v38  ;;  %v3704_v53 = vsub.f32 1.0, %v6373_v38 }
 0xb5f   : > { %3728 = vst.msk [vmem:[#allocation4 + $0xc] sm:$0xf] %vm654_vm1, %v6671_v39  ;;  %v3708_v17 = vmul.f32 %v3704_v53, %v3688_v43  ;;  %v7012_v53 = vld [vmem:[%s9512_s9] sm:$0xff]  }
 0xb61   : > { %3745 = vrot.lane.b32.xlu1 %v3708_v17, %s7072_s21 }
 0xbc8   : > { %v3748_v18 = vpop.permute.xlu0 %3747 }
 0xbc9   : > { %v3757_v59 = vsub.f32 %v3737_v35, %v3748_v18 }
 0xbcb   : > { %v3761_v29 = vmul.f32 0.6666667, %v3757_v59 }
 0xbcc   : > { %v3744_v30 = vpop.permute.xlu0 %3743 }
 0xbcd   : > { %v3755_v46 = vsub.f32 %v3735_v60, %v3744_v30  ;;  %3771 = vrot.lane.b32.xlu0 %v3761_v29, %s7072_s21 }
 0xbce   : > { %v3750_v32 = vpop.permute.xlu1 %3749 }
 0xbcf   : > { %v3759_v48 = vmul.f32 0.6666667, %v3755_v46  ;;  %v3758_v14 = vsub.f32 %v3738_v47, %v3750_v32  ;;  %v3823_v32 = vld [vmem:[%s7214_s20] sm:$0xff] }
 0xbd1   : > { %v3762_v58 = vmul.f32 0.6666667, %v3758_v14  ;;  %3767 = vrot.lane.b32.xlu0 %v3759_v48, %s7072_s21 }
 0xbd3   : > { %v3746_v26 = vpop.permute.xlu1 %3745  ;;  %3773 = vrot.lane.b32.xlu1 %v3762_v58, %s7072_s21 }
 0xbd4   : > { %v3756_v15 = vsub.f32 %v3736_v6, %v3746_v26 }
 0xbd5   : > { %3659 = vrot.lane.b32.xlu0 %v6668_v8, %s7072_s21  ;;  %v3825_v8 = vld [vmem:[%s7214_s20 + $0x10] sm:$0xff] }
 0xbd6   : > { %v3760_v45 = vmul.f32 0.6666667, %v3756_v15 }
 0xbd8   : > { %3769 = vrot.lane.b32.xlu1 %v3760_v45, %s7072_s21 }
 0xbd9   : > { %3655 = vrot.lane.b32.xlu0 %v6666_v31, %s7072_s21 }
 0xbdc   : > { %3661 = vrot.lane.b32.xlu1 %v6669_v13, %s7072_s21 }
 0xbe0   : > { %3657 = vrot.lane.b32.xlu1 %v6667_v62, %s7072_s21 }
 0xc3f   : > { %v3772_v0 = vpop.permute.xlu0 %3771 }
 0xc40   : > { %v3781_v4 = vadd.f32 %v3772_v0, %v3709_v55  ;;  %v3937_v55 = vld [vmem:[%s9513_s10 + $0x8] sm:$0xff] }
 0xc42   : > { %vm3785_vm12 = vcmp.ge.f32.partialorder %v3781_v4, 1.0 }
 0xc43   : > { %v6382_v9 = vsel %vm3785_vm12, 1.0, %v7071_v23  ;;  %v3768_v34 = vpop.permute.xlu0 %3767 }
 0xc44   : > { %v6676_v44 = vpack.c.bf16 %v6382_v9, %v6382_v9  ;;  %v3779_v21 = vadd.f32 %v3768_v34, %v3707_v16  ;;  %v3827_v34 = vld [vmem:[%s7214_s20 + $0x20] sm:$0xff] }
 0xc45   : > { %v3774_v42 = vpop.permute.xlu1 %3773 }
 0xc46   : > { %vm3783_vm0 = vcmp.ge.f32.partialorder %v3779_v21, 1.0  ;;  %v3782_v37 = vadd.f32 %v3774_v42, %v3710_v49  ;;  %3811 = vrot.lane.b32.xlu0 %v6676_v44, %s7072_s21 }
 0xc47   : > { %v6380_v51 = vsel %vm3783_vm0, 1.0, %v7071_v23  ;;  %v3660_v50 = vpop.permute.xlu0 %3659 }
 0xc48   : > { %v6674_v63 = vpack.c.bf16 %v6380_v51, %v6380_v51  ;;  %vm3786_vm2 = vcmp.ge.f32.partialorder %v3782_v37, 1.0  ;;  %3669 = vst.msk [vmem:[#allocation4 + $0x10] sm:$0xf] %vm759_vm15, %v3660_v50 }
 0xc49   : > { %v6383_v27 = vsel %vm3786_vm2, 1.0, %v7071_v23 }
 0xc4a   : > { %v6677_v56 = vpack.c.bf16 %v6383_v27, %v6383_v27  ;;  %v3770_v54 = vpop.permute.xlu1 %3769  ;;  %3807 = vrot.lane.b32.xlu0 %v6674_v63, %s7072_s21  ;;  %v3829_v63 = vld [vmem:[%s7214_s20 + $0x30] sm:$0xff] }
 0xc4b   : > { %v3780_v25 = vadd.f32 %v3770_v54, %v3708_v17  ;;  %v3656_v33 = vpop.permute.xlu0 %3655  ;;  %v7013_v17 = vld [vmem:[%s9512_s9 + $0x8] sm:$0xff]  }
 0xc4c   : > { %3667 = vst.msk [vmem:[#allocation4] sm:$0xf] %vm759_vm15, %v3656_v33  ;;  %3813 = vrot.lane.b32.xlu1 %v6677_v56, %s7072_s21 }
 0xc4d   : > { %vm3784_vm4 = vcmp.ge.f32.partialorder %v3780_v25, 1.0 }
 0xc4e   : > { %v6381_v41 = vsel %vm3784_vm4, 1.0, %v7071_v23  ;;  %v3662_v22 = vpop.permute.xlu1 %3661  ;;  %3952 = vperm.xlu0 %6940, %v3938_v1  }
 0xc4f   : > { %v6675_v57 = vpack.c.bf16 %v6381_v41, %v6381_v41  ;;  %3670 = vst.msk [vmem:[#allocation4 + $0x18] sm:$0xf] %vm759_vm15, %v3662_v22 }
 0xc51   : > { %3809 = vrot.lane.b32.xlu1 %v6675_v57, %s7072_s21 }
 0xc52   : > { %v3658_v10 = vpop.permute.xlu1 %3657  ;;  %4000 = vperm.xlu0 %6940, %v3978_v19  }
 0xc53   : > { %3668 = vst.msk [vmem:[#allocation4 + $0x8] sm:$0xf] %vm759_vm15, %v3658_v10 }
 0xc55   : > { %3957 = vperm.xlu1 %6941, %v3939_v5  }
 0xc56   : > { %3942 = vperm.xlu0 %6940, %v3936_v36   ;;  %v7008_v49 = vld [vmem:[#allocation4 + $0x10] ss:$8 sps:$4 sm:$0xff]  }
 0xc59   : > { %4005 = vperm.xlu1 %6941, %v3979_v11  }
 0xc5a   : > { %4024 = vperm.xlu0 %6940, %v3982_v20   ;;  %v7011_v39 = vld [vmem:[#allocation4] ss:$8 sps:$4 sm:$0xff]  }
 0xc5d   : > { %3947 = vperm.xlu1 %6941, %v3937_v55  }
 0xc5e   : > { %3990 = vperm.xlu0 %6940, %v3976_v40  }
 0xc61   : > { %4029 = vperm.xlu1 %6941, %v3983_v3  }
 0xc62   : > { %4014 = vperm.xlu0 %6940, %v3980_v12  }
 0xc65   : > { %3995 = vperm.xlu1 %6941, %v3977_v7  }
 0xc69   : > { %4019 = vperm.xlu1 %6941, %v3981_v28  }
 0xcb8   : > { %v3812_v24 = vpop.permute.xlu0 %3811 }
 0xcb9   : > { %3821 = vst.msk [vmem:[#allocation4 + $0x14] sm:$0xf] %vm759_vm15, %v3812_v24 }
 0xcbc   : > { %v3808_v61 = vpop.permute.xlu0 %3807 }
 0xcbd   : > { %3819 = vst.msk [vmem:[#allocation4 + $0x4] sm:$0xf] %vm759_vm15, %v3808_v61 }
 0xcbe   : > { %v3814_v16 = vpop.permute.xlu1 %3813 }
 0xcbf   : > { %3822 = vst.msk [vmem:[#allocation4 + $0x1c] sm:$0xf] %vm759_vm15, %v3814_v16 }
 0xcc3   : > { %v3810_v52 = vpop.permute.xlu1 %3809 }
 0xcc4   : > { %3820 = vst.msk [vmem:[#allocation4 + $0xc] sm:$0xf] %vm759_vm15, %v3810_v52 }
 0xcc6   : > { %v7006_v43 = vld [vmem:[#allocation4 + $0x14] ss:$8 sps:$4 sm:$0xff]  }
 0xcc7   : > { %3887 = vmatprep.subr.bf16.mxu0 %v7006_v43 }
 0xcc8   : > { %3888 = vmatpush1.bf16.msra.mxu0 %v7008_v49 }
 0xcc9   : > { %v8523_v35 = vpop.permute.xlu0 %3952 }
 0xccb   : > { %v7009_v38 = vld [vmem:[#allocation4 + $0x4] ss:$8 sps:$4 sm:$0xff]  }
 0xccc   : > { %3889 = vmatprep.subr.bf16.mxu0 %v7009_v38 }
 0xccd   : > { %3890 = vmatpush1.bf16.msra.mxu0 %v7011_v39  ;;  %v8527_v59 = vpop.permute.xlu0 %4000 }
 0xcd0   : > { %6394 = vmatmul.mubr.msk.bf16.vlgmr.msra.gmra.mxu0 %vm1062_vm3, %v7012_v53  ;;  %v8525_v18 = vpop.permute.xlu1 %3957 }
 0xcd1   : > { %3917 = vmatprep.mubr.bf16.mxu0 %v9523_v2  ;;  %v8531_v60 = vpop.permute.xlu0 %3942 }
 0xcd4   : > { %v8529_v29 = vpop.permute.xlu1 %4005 }
 0xcd5   : > { %v8535_v46 = vpop.permute.xlu0 %4024 }
 0xcd8   : > { %6395 = vmatmul.mubr.msk.bf16.gmra.mxu0 %vm1062_vm3, %v7013_v17  ;;  %v8533_v30 = vpop.permute.xlu1 %3947 }
 0xcd9   : > { %6013 = vmatprep.mubr.bf16.mxu0 %v9523_v2  ;;  %v8540_v48 = vpop.permute.xlu0 %3990 }
 0xcdc   : > { %v8537_v47 = vpop.permute.xlu1 %4029 }
 0xcdd   : > { %v8552_v62 = vpop.permute.xlu0 %4014 }
 0xce0   : > { %v8548_v15 = vpop.permute.xlu1 %3995 }
 0xce4   : > { %v8563_v37 = vpop.permute.xlu1 %4019 }
 0xd90   : > { %v3909_v14 = vpop.f32.mrf.mxu0 }
 0xd91   : > { %v3928_v58 = vadd.f32 %v3909_v14, %v3823_v32 }
 0xd92   : > { %v8542_v6 = vpop.f32.mrf.mxu0 }
 0xd93   : > { %v8546_v26 = vadd.f32 %v8531_v60, %v3928_v58 }
 0xd94   : > { %v3913_v45 = vpop.f32.mrf.mxu0 }
 0xd95   : > { %9540 = vst [vmem:[#allocation6_spill] sm:$0xff] %v8546_v26  ;;  %v4008_v31 = vmul.f32 %v8540_v48, %v8546_v26  ;;  %v3930_v13 = vadd.f32 %v3913_v45, %v3825_v8 }
 0xd96   : > { %v8554_v0 = vpop.f32.mrf.mxu0 }
 0xd97   : > { %v4032_v4 = vadd.f32 %v8552_v62, %v4008_v31  ;;  %v8558_v9 = vadd.f32 %v8533_v30, %v3930_v13 }
 0xd98   : > { %v3919_v44 = vpop.f32.mrf.mxu0 }
 0xd99   : > { %9541 = vst [vmem:[#allocation7_spill] sm:$0xff] %v8558_v9  ;;  %v4036_v21 = vmul.f32 0.6666667, %v4032_v4  ;;  %v4009_v42 = vmul.f32 %v8548_v15, %v8558_v9  ;;  %v3932_v51 = vadd.f32 %v3919_v44, %v3827_v34 }
 0xd9a   : > { %v3921_v50 = vpop.f32.mrf.mxu0 }
 0xd9b   : > { %vm4044_vm5 = vcmp.ge.f32.partialorder %v4036_v21, 1.0  ;;  %v4033_v27 = vadd.f32 %v8563_v37, %v4009_v42  ;;  %v8568_v56 = vadd.f32 %v8523_v35, %v3932_v51  ;;  %v3824_v42 = vld [vmem:[%s7214_s20 + $0x8] sm:$0xff] }
 0xd9c   : > { %v3923_v54 = vpop.f32.mrf.mxu0  ;;  %v6396_v25 = vsel %vm4044_vm5, 1.0, %v7071_v23 }
 0xd9d   : > { %9542 = vst [vmem:[#allocation8_spill] sm:$0xff] %v8568_v56  ;;  %v4037_v33 = vmul.f32 0.6666667, %v4033_v27  ;;  %v3934_v1 = vadd.f32 %v3923_v54, %v3829_v63  ;;  %v4010_v41 = vmul.f32 %v8527_v59, %v8568_v56  ;;  %v6678_v22 = vpack.c.bf16 %v6396_v25, %v6396_v25  ;;  %v3830_v63 = vld [vmem:[%s7214_s20 + $0x38] sm:$0xff] }
 0xd9e   : > { %v4056_v28 = vsub.f32 1.0, %v6396_v25  ;;  %v3925_v54 = vpop.f32.mrf.mxu0 }
 0xd9f   : > { %vm4045_vm6 = vcmp.ge.f32.partialorder %v4037_v33, 1.0  ;;  %v8574_v57 = vadd.f32 %v8525_v18, %v3934_v1  ;;  %v4034_v19 = vadd.f32 %v8535_v46, %v4010_v41  ;;  %4080 = vst.msk [vmem:[#allocation4] sm:$0xf] %vm654_vm1, %v6678_v22  ;;  %v3935_v25 = vadd.f32 %v3925_v54, %v3830_v63 }
 0xda0   : > { %v6397_v10 = vsel %vm4045_vm6, 1.0, %v7071_v23  ;;  %v4060_v49 = vmul.f32 %v4056_v28, %v4036_v21  ;;  %v3828_v21 = vld [vmem:[%s7214_s20 + $0x28] sm:$0xff] }
 0xda1   : > { %9543 = vst [vmem:[#allocation9_spill] sm:$0xff] %v8574_v57  ;;  %v4011_v5 = vmul.f32 %v8529_v29, %v8574_v57  ;;  %v4038_v36 = vmul.f32 0.6666667, %v4034_v19  ;;  %v6679_v11 = vpack.c.bf16 %v6397_v10, %v6397_v10  ;;  %v4057_v43 = vsub.f32 1.0, %v6397_v10 }
 0xda2   : > { %v3933_v51 = vadd.f32 %v3921_v50, %v3828_v21  ;;  %v8608_v10 = vadd.f32 %v8525_v18, %v3935_v25 }
 0xda3   : > { %v4035_v20 = vadd.f32 %v8537_v47, %v4011_v5  ;;  %vm4046_vm7 = vcmp.ge.f32.partialorder %v4038_v36, 1.0  ;;  %4081 = vst.msk [vmem:[#allocation4 + $0x8] sm:$0xf] %vm654_vm1, %v6679_v11  ;;  %v4061_v38 = vmul.f32 %v4057_v43, %v4037_v33  ;;  %v3826_v33 = vld [vmem:[%s7214_s20 + $0x18] sm:$0xff] }
 0xda4   : > { %v6398_v40 = vsel %vm4046_vm7, 1.0, %v7071_v23  ;;  %v8601_v1 = vadd.f32 %v8523_v35, %v3933_v51  ;;  %9546 = vst [vmem:[#allocation12_spill] sm:$0xff] %v8608_v10  ;;  %v4195_v18 = vmul.f32 %v8529_v29, %v8608_v10 }
 0xda5   : > { %v4039_v55 = vmul.f32 0.6666667, %v4035_v20  ;;  %v4058_v3 = vsub.f32 1.0, %v6398_v40  ;;  %v6680_v12 = vpack.c.bf16 %v6398_v40, %v6398_v40 }
 0xda6   : > { %9544 = vst [vmem:[#allocation10_spill] sm:$0xff] %v8601_v1  ;;  %v4194_v50 = vmul.f32 %v8527_v59, %v8601_v1 }
 0xda7   : > { %vm4047_vm8 = vcmp.ge.f32.partialorder %v4039_v55, 1.0  ;;  %v4062_v7 = vmul.f32 %v4058_v3, %v4038_v36  ;;  %4082 = vst.msk [vmem:[#allocation4 + $0x10] sm:$0xf] %vm654_vm1, %v6680_v12 }
 0xda8   : > { %v6399_v24 = vsel %vm4047_vm8, 1.0, %v7071_v23  ;;  %v4198_v59 = vadd.f32 %v4194_v50, %v8535_v46  ;;  %v4199_v46 = vadd.f32 %v4195_v18, %v8537_v47 }
 0xda9   : > { %v4059_v61 = vsub.f32 1.0, %v6399_v24  ;;  %v6681_v16 = vpack.c.bf16 %v6399_v24, %v6399_v24  ;;  %4104 = vrot.lane.b32.xlu0 %v4062_v7, %s7072_s21 }
 0xdab   : > { %v4063_v52 = vmul.f32 %v4059_v61, %v4039_v55  ;;  %4083 = vst.msk [vmem:[#allocation4 + $0x18] sm:$0xf] %vm654_vm1, %v6681_v16 }
 0xdad   : > { %4106 = vrot.lane.b32.xlu1 %v4063_v52, %s7072_s21  ;;  %4100 = vrot.lane.b32.xlu0 %v4060_v49, %s7072_s21 }
 0xdb1   : > { %4102 = vrot.lane.b32.xlu1 %v4061_v38, %s7072_s21 }
 0xe1b   : > { %v4105_v39 = vpop.permute.xlu0 %4104 }
 0xe1c   : > { %v4114_v53 = vsub.f32 %v4034_v19, %v4105_v39  ;;  %v3931_v19 = vadd.f32 %v8554_v0, %v3826_v33 }
 0xe1e   : > { %v4118_v17 = vmul.f32 0.6666667, %v4114_v53  ;;  %v8619_v0 = vadd.f32 %v8533_v30, %v3931_v19 }
 0xe1f   : > { %v4107_v32 = vpop.permute.xlu1 %4106  ;;  %v4101_v14 = vpop.permute.xlu0 %4100 }
 0xe20   : > { %v4115_v58 = vsub.f32 %v4035_v20, %v4107_v32  ;;  %v4112_v8 = vsub.f32 %v4032_v4, %v4101_v14  ;;  %4128 = vrot.lane.b32.xlu0 %v4118_v17, %s7072_s21  ;;  %v3929_v4 = vadd.f32 %v8542_v6, %v3824_v42  ;;  %9547 = vst [vmem:[#allocation13_spill] sm:$0xff] %v8619_v0 }
 0xe21   : > { %v4193_v29 = vmul.f32 %v8548_v15, %v8619_v0 }
 0xe22   : > { %v4119_v45 = vmul.f32 0.6666667, %v4115_v58  ;;  %v4116_v31 = vmul.f32 0.6666667, %v4112_v8  ;;  %v8604_v22 = vadd.f32 %v8531_v60, %v3929_v4 }
 0xe23   : > { %v4103_v13 = vpop.permute.xlu1 %4102  ;;  %v4197_v17 = vadd.f32 %v4193_v29, %v8563_v37 }
 0xe24   : > { %v4113_v34 = vsub.f32 %v4033_v27, %v4103_v13  ;;  %4130 = vrot.lane.b32.xlu1 %v4119_v45, %s7072_s21  ;;  %4124 = vrot.lane.b32.xlu0 %v4116_v31, %s7072_s21  ;;  %9545 = vst [vmem:[#allocation11_spill] sm:$0xff] %v8604_v22  ;;  %v4192_v60 = vmul.f32 %v8540_v48, %v8604_v22 }
 0xe26   : > { %v4117_v44 = vmul.f32 0.6666667, %v4113_v34  ;;  %v4196_v61 = vadd.f32 %v4192_v60, %v8552_v62 }
 0xe28   : > { %4126 = vrot.lane.b32.xlu1 %v4117_v44, %s7072_s21 }
 0xe92   : > { %v4129_v27 = vpop.permute.xlu0 %4128 }
 0xe93   : > { %v4138_v41 = vadd.f32 %v4129_v27, %v4062_v7 }
 0xe95   : > { %vm4142_vm9 = vcmp.ge.f32.partialorder %v4138_v41, 1.0 }
 0xe96   : > { %v4131_v6 = vpop.permute.xlu1 %4130  ;;  %v8613_v5 = vsel %vm4142_vm9, 1.0, %v7071_v23  ;;  %v4125_v35 = vpop.permute.xlu0 %4124 }
 0xe97   : > { %v4139_v36 = vadd.f32 %v4131_v6, %v4063_v52  ;;  %v4154_v11 = vsub.f32 1.0, %v8613_v5  ;;  %v4136_v20 = vadd.f32 %v4125_v35, %v4060_v49 }
 0xe99   : > { %vm4143_vm10 = vcmp.ge.f32.partialorder %v4139_v36, 1.0  ;;  %v4158_v55 = vmul.f32 %v4154_v11, %v4138_v41  ;;  %vm4140_vm11 = vcmp.ge.f32.partialorder %v4136_v20, 1.0 }
 0xe9a   : > { %v8625_v40 = vsel %vm4143_vm10, 1.0, %v7071_v23  ;;  %v4127_v3 = vpop.permute.xlu1 %4126  ;;  %v8628_v12 = vsel %vm4140_vm11, 1.0, %v7071_v23 }
 0xe9b   : > { %v4155_v48 = vsub.f32 1.0, %v8625_v40  ;;  %v4137_v7 = vadd.f32 %v4127_v3, %v4061_v38  ;;  %v4202_v30 = vsub.f32 %v4198_v59, %v4158_v55  ;;  %v4152_v28 = vsub.f32 1.0, %v8628_v12 }
 0xe9d   : > { %v4159_v24 = vmul.f32 %v4155_v48, %v4139_v36  ;;  %vm4141_vm13 = vcmp.ge.f32.partialorder %v4137_v7, 1.0  ;;  %v4206_v16 = vmul.f32 0.6666667, %v4202_v30  ;;  %v4156_v52 = vmul.f32 %v4152_v28, %v4136_v20 }
 0xe9e   : > { %v8637_v43 = vsel %vm4141_vm13, 1.0, %v7071_v23  ;;  %v6684_v30 = vpack.c.bf16 %v8613_v5, %v8613_v5  ;;  %v6682_v28 = vpack.c.bf16 %v8628_v12, %v8628_v12 }
 0xe9f   : > { %v4203_v49 = vsub.f32 %v4199_v46, %v4159_v24  ;;  %v4153_v38 = vsub.f32 1.0, %v8637_v43  ;;  %v4210_v39 = vadd.f32 %v4206_v16, %v4158_v55  ;;  %v4200_v53 = vsub.f32 %v4196_v61, %v4156_v52 }
 0xea0   : > { %v6683_v29 = vpack.c.bf16 %v8637_v43, %v8637_v43 }
 0xea1   : > { %v4207_v32 = vmul.f32 0.6666667, %v4203_v49  ;;  %v4157_v15 = vmul.f32 %v4153_v38, %v4137_v7  ;;  %vm4214_vm14 = vcmp.ge.f32.partialorder %v4210_v39, 1.0  ;;  %v4204_v47 = vmul.f32 0.6666667, %v4200_v53 }
 0xea2   : > { %v6414_v14 = vsel %vm4214_vm14, 1.0, %v7071_v23 }
 0xea3   : > { %v4211_v58 = vadd.f32 %v4207_v32, %v4159_v24  ;;  %v4201_v62 = vsub.f32 %v4197_v17, %v4157_v15  ;;  %v6688_v8 = vpack.c.bf16 %v6414_v14, %v6414_v14  ;;  %v4208_v45 = vadd.f32 %v4204_v47, %v4156_v52 }
 0xea4   : > { %v4226_v31 = vsub.f32 1.0, %v6414_v14 }
 0xea5   : > { %vm4215_vm12 = vcmp.ge.f32.partialorder %v4211_v58, 1.0  ;;  %v4205_v13 = vmul.f32 0.6666667, %v4201_v62  ;;  %4250 = vst.msk [vmem:[#allocation4 + $0x14] sm:$0xf] %vm654_vm1, %v6688_v8  ;;  %vm4212_vm0 = vcmp.ge.f32.partialorder %v4208_v45, 1.0 }
 0xea6   : > { %v6415_v34 = vsel %vm4215_vm12, 1.0, %v7071_v23  ;;  %v4230_v44 = vmul.f32 %v4226_v31, %v4210_v39  ;;  %v6412_v37 = vsel %vm4212_vm0, 1.0, %v7071_v23  ;;  %v4382_v62 = vld [vmem:[%s9517_s14 + $0x70] sm:$0xff]  ;;  %v4380_v31 = vld [vmem:[%s9517_s14 + $0x60] sm:$0xff] }
 0xea7   : > { %v6689_v21 = vpack.c.bf16 %v6415_v34, %v6415_v34  ;;  %v4209_v42 = vadd.f32 %v4205_v13, %v4157_v15  ;;  %v4227_v51 = vsub.f32 1.0, %v6415_v34  ;;  %v6686_v63 = vpack.c.bf16 %v6412_v37, %v6412_v37  ;;  %v4381_v13 = vld [vmem:[%s9517_s14 + $0x68] sm:$0xff]  ;;  %v4378_v34 = vld [vmem:[%s9517_s14 + $0x50] sm:$0xff] }
 0xea8   : > { %4272 = vrot.lane.b32.xlu0 %v4230_v44, %s7072_s21  ;;  %v4224_v54 = vsub.f32 1.0, %v6412_v37  ;;  %v4376_v37 = vld [vmem:[%s9517_s14 + $0x40] sm:$0xff] }
 0xea9   : > { %4251 = vst.msk [vmem:[#allocation4 + $0x1c] sm:$0xf] %vm654_vm1, %v6689_v21  ;;  %vm4213_vm2 = vcmp.ge.f32.partialorder %v4209_v42, 1.0  ;;  %v4231_v4 = vmul.f32 %v4227_v51, %v4211_v58  ;;  %4248 = vst.msk [vmem:[#allocation4 + $0x4] sm:$0xf] %vm654_vm1, %v6686_v63  ;;  %v4377_v21 = vld [vmem:[%s9517_s14 + $0x48] sm:$0xff] }
 0xeaa   : > { %v6413_v25 = vsel %vm4213_vm2, 1.0, %v7071_v23  ;;  %v4228_v33 = vmul.f32 %v4224_v54, %v4208_v45  ;;  %v4383_v45 = vld [vmem:[%s9517_s14 + $0x78] sm:$0xff]  ;;  %v4372_v63 = vld [vmem:[%s9517_s14 + $0x20] sm:$0xff]  ;;  %v4373_v54 = vld [vmem:[%s9517_s14 + $0x28] sm:$0xff] }
 0xeab   : > { %v6687_v27 = vpack.c.bf16 %v6413_v25, %v6413_v25  ;;  %4274 = vrot.lane.b32.xlu1 %v4231_v4, %s7072_s21  ;;  %v4225_v41 = vsub.f32 1.0, %v6413_v25  ;;  %v4375_v51 = vld [vmem:[%s9517_s14 + $0x38] sm:$0xff] }
 0xeac   : > { %4268 = vrot.lane.b32.xlu0 %v4228_v33, %s7072_s21  ;;  %v4371_v25 = vld [vmem:[%s9517_s14 + $0x18] sm:$0xff] }
 0xead   : > { %4249 = vst.msk [vmem:[#allocation4 + $0xc] sm:$0xf] %vm654_vm1, %v6687_v27  ;;  %v4229_v19 = vmul.f32 %v4225_v41, %v4209_v42  ;;  %v4374_v42 = vld [vmem:[%s9517_s14 + $0x30] sm:$0xff]  ;;  %v4369_v27 = vld [vmem:[%s9517_s14 + $0x8] sm:$0xff] }
 0xeaf   : > { %4270 = vrot.lane.b32.xlu1 %v4229_v19, %s7072_s21 }
 0xf1a   : > { %v4273_v50 = vpop.permute.xlu0 %4272 }
 0xf1b   : > { %v4282_v6 = vsub.f32 %v4198_v59, %v4273_v50  ;;  %v6685_v59 = vpack.c.bf16 %v8625_v40, %v8625_v40 }
 0xf1d   : > { %v4286_v35 = vmul.f32 0.6666667, %v4282_v6  ;;  %v4275_v36 = vpop.permute.xlu1 %4274 }
 0xf1e   : > { %v4269_v11 = vpop.permute.xlu0 %4268  ;;  %v4283_v20 = vsub.f32 %v4199_v46, %v4275_v36 }
 0xf1f   : > { %v4280_v60 = vsub.f32 %v4196_v61, %v4269_v11  ;;  %4296 = vrot.lane.b32.xlu0 %v4286_v35, %s7072_s21 }
 0xf20   : > { %v4287_v18 = vmul.f32 0.6666667, %v4283_v20 }
 0xf21   : > { %v4284_v55 = vmul.f32 0.6666667, %v4280_v60  ;;  %v4271_v3 = vpop.permute.xlu1 %4270  ;;  %v7020_v60 = vld [vmem:[%s9516_s13] sm:$0xff]  }
 0xf22   : > { %v4281_v48 = vsub.f32 %v4197_v17, %v4271_v3  ;;  %4298 = vrot.lane.b32.xlu1 %v4287_v18, %s7072_s21  ;;  %v7021_v18 = vld [vmem:[%s9516_s13 + $0x8] sm:$0xff]   ;;  %v7023_v3 = vld [vmem:[%s9516_s13 + $0x18] sm:$0xff]  }
 0xf23   : > { %4292 = vrot.lane.b32.xlu0 %v4284_v55, %s7072_s21  ;;  %v7022_v55 = vld [vmem:[%s9516_s13 + $0x10] sm:$0xff]  }
 0xf24   : > { %v4285_v7 = vmul.f32 0.6666667, %v4281_v48  ;;  %v7024_v48 = vld [vmem:[%s9516_s13 + $0x20] sm:$0xff]  }
 0xf26   : > { %4294 = vrot.lane.b32.xlu1 %v4285_v7, %s7072_s21  ;;  %v7025_v7 = vld [vmem:[%s9516_s13 + $0x28] sm:$0xff]  }
 0xf27   : > { %4176 = vrot.lane.b32.xlu0 %v6684_v30, %s7072_s21  ;;  %v7026_v30 = vld [vmem:[%s9516_s13 + $0x30] sm:$0xff]  }
 0xf2a   : > { %4178 = vrot.lane.b32.xlu1 %v6685_v59, %s7072_s21  ;;  %v7027_v59 = vld [vmem:[%s9516_s13 + $0x38] sm:$0xff]  }
 0xf2b   : > { %4172 = vrot.lane.b32.xlu0 %v6682_v28, %s7072_s21 }
 0xf2e   : > { %4174 = vrot.lane.b32.xlu1 %v6683_v29, %s7072_s21 }
 0xf91   : > { %v4297_v5 = vpop.permute.xlu0 %4296 }
 0xf92   : > { %v4306_v46 = vadd.f32 %v4297_v5, %v4230_v44  ;;  %v4379_v44 = vld [vmem:[%s9517_s14 + $0x58] sm:$0xff] }
 0xf94   : > { %vm4310_vm4 = vcmp.ge.f32.partialorder %v4306_v46, 1.0  ;;  %v4299_v24 = vpop.permute.xlu1 %4298 }
 0xf95   : > { %v6422_v61 = vsel %vm4310_vm4, 1.0, %v7071_v23  ;;  %v4293_v16 = vpop.permute.xlu0 %4292  ;;  %v4307_v40 = vadd.f32 %v4299_v24, %v4231_v4  ;;  %v4370_v4 = vld [vmem:[%s9517_s14 + $0x10] sm:$0xff] }
 0xf96   : > { %v6692_v52 = vpack.c.bf16 %v6422_v61, %v6422_v61  ;;  %v4304_v49 = vadd.f32 %v4293_v16, %v4228_v33  ;;  %v4368_v33 = vld [vmem:[%s9517_s14] sm:$0xff] }
 0xf97   : > { %vm4311_vm5 = vcmp.ge.f32.partialorder %v4307_v40, 1.0 }
 0xf98   : > { %vm4308_vm6 = vcmp.ge.f32.partialorder %v4304_v49, 1.0  ;;  %v6423_v12 = vsel %vm4311_vm5, 1.0, %v7071_v23  ;;  %4336 = vrot.lane.b32.xlu0 %v6692_v52, %s7072_s21  ;;  %v4295_v38 = vpop.permute.xlu1 %4294 }
 0xf99   : > { %v6420_v43 = vsel %vm4308_vm6, 1.0, %v7071_v23  ;;  %v6693_v39 = vpack.c.bf16 %v6423_v12, %v6423_v12  ;;  %v4177_v53 = vpop.permute.xlu0 %4176  ;;  %v4305_v17 = vadd.f32 %v4295_v38, %v4229_v19 }
 0xf9a   : > { %v6690_v32 = vpack.c.bf16 %v6420_v43, %v6420_v43  ;;  %4186 = vst.msk [vmem:[#allocation4 + $0x10] sm:$0xf] %vm759_vm15, %v4177_v53 }
 0xf9b   : > { %vm4309_vm7 = vcmp.ge.f32.partialorder %v4305_v17, 1.0  ;;  %4338 = vrot.lane.b32.xlu1 %v6693_v39, %s7072_s21 }
 0xf9c   : > { %v6421_v15 = vsel %vm4309_vm7, 1.0, %v7071_v23  ;;  %4332 = vrot.lane.b32.xlu0 %v6690_v32, %s7072_s21  ;;  %v4179_v47 = vpop.permute.xlu1 %4178 }
 0xf9d   : > { %v6691_v14 = vpack.c.bf16 %v6421_v15, %v6421_v15  ;;  %v4173_v58 = vpop.permute.xlu0 %4172  ;;  %4187 = vst.msk [vmem:[#allocation4 + $0x18] sm:$0xf] %vm759_vm15, %v4179_v47 }
 0xf9e   : > { %4184 = vst.msk [vmem:[#allocation4] sm:$0xf] %vm759_vm15, %v4173_v58 }
 0xf9f   : > { %4334 = vrot.lane.b32.xlu1 %v6691_v14, %s7072_s21 }
 0xfa0   : > { %4456 = vperm.xlu0 %6940, %v4382_v62   ;;  %v4175_v8 = vpop.permute.xlu1 %4174 }
 0xfa1   : > { %4185 = vst.msk [vmem:[#allocation4 + $0x8] sm:$0xf] %vm759_vm15, %v4175_v8 }
 0xfa3   : > { %4461 = vperm.xlu1 %6941, %v4383_v45  }
 0xfa4   : > { %4446 = vperm.xlu0 %6940, %v4380_v31   ;;  %v7014_v35 = vld [vmem:[#allocation4 + $0x10] ss:$8 sps:$4 sm:$0xff]  }
 0xfa7   : > { %4451 = vperm.xlu1 %6941, %v4381_v13  }
 0xfa8   : > { %4436 = vperm.xlu0 %6940, %v4378_v34   ;;  %v7017_v11 = vld [vmem:[#allocation4] ss:$8 sps:$4 sm:$0xff]  }
 0xfab   : > { %4441 = vperm.xlu1 %6941, %v4379_v44  }
 0xfac   : > { %4426 = vperm.xlu0 %6940, %v4376_v37  }
 0xfaf   : > { %4431 = vperm.xlu1 %6941, %v4377_v21  }
 0xfb0   : > { %4416 = vperm.xlu0 %6940, %v4374_v42  }
 0xfb3   : > { %4421 = vperm.xlu1 %6941, %v4375_v51  }
 0xfb4   : > { %4406 = vperm.xlu0 %6940, %v4372_v63  }
 0xfb7   : > { %4411 = vperm.xlu1 %6941, %v4373_v54  }
 0xfb8   : > { %4396 = vperm.xlu0 %6940, %v4370_v4  }
 0xfbb   : > { %4401 = vperm.xlu1 %6941, %v4371_v25  }
 0xfbc   : > { %4386 = vperm.xlu0 %6940, %v4368_v33  }
 0xfbf   : > { %4391 = vperm.xlu1 %6941, %v4369_v27  }
0x100a   : > { %v4337_v41 = vpop.permute.xlu0 %4336 }
0x100b   : > { %4346 = vst.msk [vmem:[#allocation4 + $0x14] sm:$0xf] %vm759_vm15, %v4337_v41 }
0x100d   : > { %v4339_v19 = vpop.permute.xlu1 %4338 }
0x100e   : > { %v4333_v50 = vpop.permute.xlu0 %4332  ;;  %4347 = vst.msk [vmem:[#allocation4 + $0x1c] sm:$0xf] %vm759_vm15, %v4339_v19 }
0x100f   : > { %4344 = vst.msk [vmem:[#allocation4 + $0x4] sm:$0xf] %vm759_vm15, %v4333_v50 }
0x1011   : > { %v4335_v6 = vpop.permute.xlu1 %4334 }
0x1012   : > { %4345 = vst.msk [vmem:[#allocation4 + $0xc] sm:$0xf] %vm759_vm15, %v4335_v6 }
0x1015   : > { %v7016_v36 = vld [vmem:[#allocation4 + $0x14] ss:$8 sps:$4 sm:$0xff]  }
0x1016   : > { %4560 = vmatprep.subr.bf16.mxu1 %v7016_v36 }
0x1017   : > { %4561 = vmatpush1.bf16.msra.mxu1 %v7014_v35 }
0x1019   : > { %v7019_v20 = vld [vmem:[#allocation4 + $0x4] ss:$8 sps:$4 sm:$0xff]  }
0x101a   : > { %4562 = vmatprep.subr.bf16.mxu1 %v7019_v20 }
0x101b   : > { %4563 = vmatpush1.bf16.msra.mxu1 %v7017_v11  ;;  %v8772_v28 = vpop.permute.xlu0 %4456 }
0x101e   : > { %6440 = vmatmul.mubr.msk.bf16.vlgmr.msra.gmra.mxu1 %vm1062_vm3, %v7020_v60  ;;  %v8774_v29 = vpop.permute.xlu1 %4461 }
0x101f   : > { %4590 = vmatprep.mubr.bf16.mxu1 %v9523_v2  ;;  %v8776_v5 = vpop.permute.xlu0 %4446 }
0x1022   : > { %v8778_v46 = vpop.permute.xlu1 %4451 }
0x1023   : > { %v8780_v24 = vpop.permute.xlu0 %4436 }
0x1026   : > { %6441 = vmatmul.mubr.msk.bf16.gmra.mxu1 %vm1062_vm3, %v7021_v18  ;;  %v8782_v61 = vpop.permute.xlu1 %4441 }
0x1027   : > { %4600 = vmatprep.mubr.bf16.mxu1 %v9523_v2  ;;  %v8784_v16 = vpop.permute.xlu0 %4426 }
0x102a   : > { %v8786_v40 = vpop.permute.xlu1 %4431 }
0x102b   : > { %v8788_v52 = vpop.permute.xlu0 %4416 }
0x102e   : > { %6442 = vmatmul.mubr.msk.bf16.gmra.mxu1 %vm1062_vm3, %v7022_v55  ;;  %v8790_v49 = vpop.permute.xlu1 %4421 }
0x102f   : > { %4610 = vmatprep.mubr.bf16.mxu1 %v9523_v2  ;;  %v4407_v12 = vpop.permute.xlu0 %4406 }
0x1032   : > { %v8792_v38 = vpop.permute.xlu1 %4411 }
0x1033   : > { %v4397_v43 = vpop.permute.xlu0 %4396 }
0x1036   : > { %6443 = vmatmul.mubr.msk.bf16.gmra.mxu1 %vm1062_vm3, %v7023_v3  ;;  %v4402_v39 = vpop.permute.xlu1 %4401 }
0x1037   : > { %4620 = vmatprep.mubr.bf16.mxu1 %v9523_v2  ;;  %v4387_v53 = vpop.permute.xlu0 %4386 }
0x103a   : > { %v4392_v58 = vpop.permute.xlu1 %4391 }
0x103e   : > { %6444 = vmatmul.mubr.msk.bf16.gmra.mxu1 %vm1062_vm3, %v7024_v48 }
0x103f   : > { %4630 = vmatprep.mubr.bf16.mxu1 %v9523_v2 }
0x1046   : > { %6445 = vmatmul.mubr.msk.bf16.gmra.mxu1 %vm1062_vm3, %v7025_v7 }
0x1047   : > { %4640 = vmatprep.mubr.bf16.mxu1 %v9523_v2 }
0x104e   : > { %6446 = vmatmul.mubr.msk.bf16.gmra.mxu1 %vm1062_vm3, %v7026_v30 }
0x104f   : > { %4650 = vmatprep.mubr.bf16.mxu1 %v9523_v2 }
0x1056   : > { %6447 = vmatmul.mubr.msk.bf16.gmra.mxu1 %vm1062_vm3, %v7027_v59 }
0x10de   : > { %v4582_v17 = vpop.f32.mrf.mxu1 }
0x10df   : > { %v8794_v32 = vadd.f32 %v4582_v17, %v4387_v53 }
0x10e0   : > { %v4584_v15 = vpop.f32.mrf.mxu1 }
0x10e1   : > { %4661 = vst [vmem:[#allocation2] sm:$0xff] %v8794_v32  ;;  %v4585_v47 = vadd.f32 %v4584_v15, %v4387_v53  ;;  %v4709_v14 = vmul.f32 0.6666667, %v8794_v32 }
0x10e2   : > { %v4586_v62 = vpop.f32.mrf.mxu1 }
0x10e3   : > { %4662 = vst [vmem:[#allocation2 + $0x8] sm:$0xff] %v4585_v47  ;;  %v8798_v8 = vadd.f32 %v4586_v62, %v4392_v58  ;;  %vm4741_vm3 = vcmp.ge.f32.partialorder %v4709_v14, 1.0 }
0x10e4   : > { %v4588_v45 = vpop.f32.mrf.mxu1  ;;  %v6448_v31 = vsel %vm4741_vm3, 1.0, %v7071_v23 }
0x10e5   : > { %4663 = vst [vmem:[#allocation2 + $0x10] sm:$0xff] %v8798_v8  ;;  %v4589_v13 = vadd.f32 %v4588_v45, %v4392_v58  ;;  %v4789_v34 = vsub.f32 1.0, %v6448_v31  ;;  %v6694_v44 = vpack.c.bf16 %v6448_v31, %v6448_v31  ;;  %v4710_v37 = vmul.f32 0.6666667, %v8798_v8 }
0x10e6   : > { %v4592_v21 = vpop.f32.mrf.mxu1 }
0x10e7   : > { %4664 = vst [vmem:[#allocation2 + $0x18] sm:$0xff] %v4589_v13  ;;  %v8803_v42 = vadd.f32 %v4592_v21, %v4397_v43  ;;  %v8805_v51 = vmul.f32 %v4789_v34, %v4709_v14  ;;  %4885 = vst.msk [vmem:[#allocation3] sm:$0xf] %vm654_vm1, %v6694_v44  ;;  %vm4742_vm8 = vcmp.ge.f32.partialorder %v4710_v37, 1.0 }
0x10e8   : > { %v4594_v63 = vpop.f32.mrf.mxu1  ;;  %v6449_v54 = vsel %vm4742_vm8, 1.0, %v7071_v23 }
0x10e9   : > { %4665 = vst [vmem:[#allocation2 + $0x20] sm:$0xff] %v8803_v42  ;;  %v8810_v4 = vadd.f32 %v4594_v63, %v4397_v43  ;;  %v4711_v25 = vmul.f32 0.6666667, %v8803_v42  ;;  %v4790_v33 = vsub.f32 1.0, %v6449_v54  ;;  %v6695_v27 = vpack.c.bf16 %v6449_v54, %v6449_v54 }
0x10ea   : > { %v4596_v41 = vpop.f32.mrf.mxu1 }
0x10eb   : > { %9548 = vst [vmem:[#allocation14_spill] sm:$0xff] %v8810_v4  ;;  %4666 = vst [vmem:[#allocation2 + $0x28] sm:$0xff] %v8810_v4  ;;  %v8814_v19 = vadd.f32 %v4596_v41, %v4402_v39  ;;  %vm4743_vm9 = vcmp.ge.f32.partialorder %v4711_v25, 1.0  ;;  %v8816_v50 = vmul.f32 %v4790_v33, %v4710_v37 }
0x10ec   : > { %4886 = vst.msk [vmem:[#allocation3 + $0x8] sm:$0xf] %vm654_vm1, %v6695_v27  ;;  %v4598_v6 = vpop.f32.mrf.mxu1  ;;  %v6450_v35 = vsel %vm4743_vm9, 1.0, %v7071_v23 }
0x10ed   : > { %4667 = vst [vmem:[#allocation2 + $0x30] sm:$0xff] %v8814_v19  ;;  %v4599_v36 = vadd.f32 %v4598_v6, %v4402_v39  ;;  %v4791_v11 = vsub.f32 1.0, %v6450_v35  ;;  %v6696_v20 = vpack.c.bf16 %v6450_v35, %v6450_v35  ;;  %v4712_v60 = vmul.f32 0.6666667, %v8814_v19 }
0x10ee   : > { %v4602_v18 = vpop.f32.mrf.mxu1 }
0x10ef   : > { %4668 = vst [vmem:[#allocation2 + $0x38] sm:$0xff] %v4599_v36  ;;  %v8822_v55 = vadd.f32 %v4602_v18, %v4407_v12  ;;  %v8824_v3 = vmul.f32 %v4791_v11, %v4711_v25  ;;  %4887 = vst.msk [vmem:[#allocation3 + $0x10] sm:$0xf] %vm654_vm1, %v6696_v20  ;;  %vm4744_vm10 = vcmp.ge.f32.partialorder %v4712_v60, 1.0 }
0x10f0   : > { %v4604_v48 = vpop.f32.mrf.mxu1  ;;  %v6451_v7 = vsel %vm4744_vm10, 1.0, %v7071_v23 }
0x10f1   : > { %v8828_v30 = vadd.f32 %v4604_v48, %v4407_v12  ;;  %v8831_v59 = vmul.f32 0.6666667, %v8822_v55  ;;  %v4792_v43 = vsub.f32 1.0, %v6451_v7  ;;  %v6697_v39 = vpack.c.bf16 %v6451_v7, %v6451_v7 }
0x10f2   : > { %v4606_v53 = vpop.f32.mrf.mxu1 }
0x10f3   : > { %9549 = vst [vmem:[#allocation15_spill] sm:$0xff] %v8828_v30  ;;  %4670 = vst [vmem:[#allocation2 + $0x48] sm:$0xff] %v8828_v30  ;;  %v8835_v17 = vadd.f32 %v4606_v53, %v8792_v38  ;;  %vm4745_vm11 = vcmp.ge.f32.partialorder %v8831_v59, 1.0  ;;  %v8838_v15 = vmul.f32 %v4792_v43, %v4712_v60 }
0x10f4   : > { %4888 = vst.msk [vmem:[#allocation3 + $0x18] sm:$0xf] %vm654_vm1, %v6697_v39  ;;  %v4608_v47 = vpop.f32.mrf.mxu1  ;;  %v8842_v12 = vsel %vm4745_vm11, 1.0, %v7071_v23 }
0x10f5   : > { %v8845_v14 = vadd.f32 %v4608_v47, %v8792_v38  ;;  %v6698_v58 = vpack.c.bf16 %v8842_v12, %v8842_v12  ;;  %v8850_v62 = vmul.f32 0.6666667, %v8835_v17 }
0x10f6   : > { %v4612_v45 = vpop.f32.mrf.mxu1 }
0x10f7   : > { %9550 = vst [vmem:[#allocation16_spill] sm:$0xff] %v8845_v14  ;;  %4672 = vst [vmem:[#allocation2 + $0x58] sm:$0xff] %v8845_v14  ;;  %v8854_v31 = vadd.f32 %v4612_v45, %v8788_v52  ;;  %vm4746_vm13 = vcmp.ge.f32.partialorder %v8850_v62, 1.0 }
0x10f8   : > { %4889 = vst.msk [vmem:[#allocation3 + $0x20] sm:$0xf] %vm654_vm1, %v6698_v58  ;;  %v4614_v13 = vpop.f32.mrf.mxu1  ;;  %v8859_v38 = vsel %vm4746_vm13, 1.0, %v7071_v23 }
0x10f9   : > { %v8862_v34 = vadd.f32 %v4614_v13, %v8788_v52  ;;  %v8865_v44 = vmul.f32 0.6666667, %v8854_v31  ;;  %v6699_v37 = vpack.c.bf16 %v8859_v38, %v8859_v38 }
0x10fa   : > { %v4616_v21 = vpop.f32.mrf.mxu1 }
0x10fb   : > { %4674 = vst [vmem:[#allocation2 + $0x68] sm:$0xff] %v8862_v34  ;;  %v8871_v63 = vadd.f32 %v4616_v21, %v8790_v49  ;;  %vm4747_vm14 = vcmp.ge.f32.partialorder %v8865_v44, 1.0  ;;  %4890 = vst.msk [vmem:[#allocation3 + $0x28] sm:$0xf] %vm654_vm1, %v6699_v37 }
0x10fc   : > { %v4618_v54 = vpop.f32.mrf.mxu1  ;;  %v8876_v52 = vsel %vm4747_vm14, 1.0, %v7071_v23 }
0x10fd   : > { %v8879_v25 = vadd.f32 %v4618_v54, %v8790_v49  ;;  %v6700_v33 = vpack.c.bf16 %v8876_v52, %v8876_v52  ;;  %v8884_v27 = vmul.f32 0.6666667, %v8871_v63 }
0x10fe   : > { %v4622_v41 = vpop.f32.mrf.mxu1 }
0x10ff   : > { %9551 = vst [vmem:[#allocation17_spill] sm:$0xff] %v8879_v25  ;;  %4676 = vst [vmem:[#allocation2 + $0x78] sm:$0xff] %v8879_v25  ;;  %v8888_v6 = vadd.f32 %v4622_v41, %v8784_v16  ;;  %vm4748_vm12 = vcmp.ge.f32.partialorder %v8884_v27, 1.0 }
0x1100   : > { %4891 = vst.msk [vmem:[#allocation3 + $0x30] sm:$0xf] %vm654_vm1, %v6700_v33  ;;  %v4624_v35 = vpop.f32.mrf.mxu1  ;;  %v8893_v49 = vsel %vm4748_vm12, 1.0, %v7071_v23 }
0x1101   : > { %v8896_v36 = vadd.f32 %v4624_v35, %v8784_v16  ;;  %v8899_v11 = vmul.f32 0.6666667, %v8888_v6  ;;  %v6701_v20 = vpack.c.bf16 %v8893_v49, %v8893_v49 }
0x1102   : > { %v4626_v60 = vpop.f32.mrf.mxu1 }
0x1103   : > { %4678 = vst [vmem:[#allocation2 + $0x88] sm:$0xff] %v8896_v36  ;;  %v8905_v18 = vadd.f32 %v4626_v60, %v8786_v40  ;;  %vm4749_vm0 = vcmp.ge.f32.partialorder %v8899_v11, 1.0  ;;  %4892 = vst.msk [vmem:[#allocation3 + $0x38] sm:$0xf] %vm654_vm1, %v6701_v20 }
0x1104   : > { %v4628_v48 = vpop.f32.mrf.mxu1  ;;  %v8910_v16 = vsel %vm4749_vm0, 1.0, %v7071_v23 }
0x1105   : > { %v8913_v7 = vadd.f32 %v4628_v48, %v8786_v40  ;;  %v6702_v43 = vpack.c.bf16 %v8910_v16, %v8910_v16  ;;  %v8918_v39 = vmul.f32 0.6666667, %v8905_v18 }
0x1106   : > { %v4632_v53 = vpop.f32.mrf.mxu1 }
0x1107   : > { %4680 = vst [vmem:[#allocation2 + $0x98] sm:$0xff] %v8913_v7  ;;  %v8922_v47 = vadd.f32 %v4632_v53, %v8780_v24  ;;  %4893 = vst.msk [vmem:[#allocation3 + $0x40] sm:$0xf] %vm654_vm1, %v6702_v43  ;;  %vm4750_vm2 = vcmp.ge.f32.partialorder %v8918_v39, 1.0 }
0x1108   : > { %v4634_v58 = vpop.f32.mrf.mxu1  ;;  %v8927_v40 = vsel %vm4750_vm2, 1.0, %v7071_v23 }
0x1109   : > { %v8930_v45 = vadd.f32 %v4634_v58, %v8780_v24  ;;  %v8933_v13 = vmul.f32 0.6666667, %v8922_v47  ;;  %v6703_v37 = vpack.c.bf16 %v8927_v40, %v8927_v40 }
0x110a   : > { %v4636_v21 = vpop.f32.mrf.mxu1 }
0x110b   : > { %4682 = vst [vmem:[#allocation2 + $0xa8] sm:$0xff] %v8930_v45  ;;  %v8939_v54 = vadd.f32 %v4636_v21, %v8782_v61  ;;  %vm4751_vm4 = vcmp.ge.f32.partialorder %v8933_v13, 1.0  ;;  %4894 = vst.msk [vmem:[#allocation3 + $0x48] sm:$0xf] %vm654_vm1, %v6703_v37 }
0x110c   : > { %v4638_v33 = vpop.f32.mrf.mxu1  ;;  %v6458_v24 = vsel %vm4751_vm4, 1.0, %v7071_v23 }
0x110d   : > { %v8945_v41 = vadd.f32 %v4638_v33, %v8782_v61  ;;  %v6704_v35 = vpack.c.bf16 %v6458_v24, %v6458_v24  ;;  %v8948_v20 = vmul.f32 0.6666667, %v8939_v54 }
0x110e   : > { %v4642_v60 = vpop.f32.mrf.mxu1 }
0x110f   : > { %4684 = vst [vmem:[#allocation2 + $0xb8] sm:$0xff] %v8945_v41  ;;  %v8952_v48 = vadd.f32 %v4642_v60, %v8776_v5  ;;  %4895 = vst.msk [vmem:[#allocation3 + $0x50] sm:$0xf] %vm654_vm1, %v6704_v35  ;;  %vm4752_vm5 = vcmp.ge.f32.partialorder %v8948_v20, 1.0 }
0x1110   : > { %v4644_v43 = vpop.f32.mrf.mxu1  ;;  %v6459_v53 = vsel %vm4752_vm5, 1.0, %v7071_v23 }
0x1111   : > { %v8958_v61 = vadd.f32 %v4644_v43, %v8776_v5  ;;  %v4721_v58 = vmul.f32 0.6666667, %v8952_v48  ;;  %v6705_v37 = vpack.c.bf16 %v6459_v53, %v6459_v53 }
0x1112   : > { %v4646_v21 = vpop.f32.mrf.mxu1 }
0x1113   : > { %4686 = vst [vmem:[#allocation2 + $0xc8] sm:$0xff] %v8958_v61  ;;  %v8963_v33 = vadd.f32 %v4646_v21, %v8778_v46  ;;  %vm4753_vm6 = vcmp.ge.f32.partialorder %v4721_v58, 1.0  ;;  %4896 = vst.msk [vmem:[#allocation3 + $0x58] sm:$0xf] %vm654_vm1, %v6705_v37 }
0x1114   : > { %v4648_v35 = vpop.f32.mrf.mxu1  ;;  %v6460_v60 = vsel %vm4753_vm6, 1.0, %v7071_v23 }
0x1115   : > { %v8968_v2 = vadd.f32 %v4648_v35, %v8778_v46  ;;  %v4722_v5 = vmul.f32 0.6666667, %v8963_v33  ;;  %v6706_v43 = vpack.c.bf16 %v6460_v60, %v6460_v60 }
0x1116   : > { %v4652_v10 = vpop.f32.mrf.mxu1 }
0x1117   : > { %4688 = vst [vmem:[#allocation2 + $0xd8] sm:$0xff] %v8968_v2  ;;  %v8973_v57 = vadd.f32 %v4652_v10, %v8772_v28  ;;  %vm4754_vm7 = vcmp.ge.f32.partialorder %v4722_v5, 1.0  ;;  %4897 = vst.msk [vmem:[#allocation3 + $0x60] sm:$0xf] %vm654_vm1, %v6706_v43 }
0x1118   : > { %v4654_v21 = vpop.f32.mrf.mxu1  ;;  %v6461_v37 = vsel %vm4754_vm7, 1.0, %v7071_v23 }
0x1119   : > { %v8978_v1 = vadd.f32 %v4654_v21, %v8772_v28  ;;  %v4723_v46 = vmul.f32 0.6666667, %v8973_v57  ;;  %v6707_v35 = vpack.c.bf16 %v6461_v37, %v6461_v37  ;;  %v4801_v21 = vsub.f32 1.0, %v6460_v60 }
0x111a   : > { %v4656_v56 = vpop.f32.mrf.mxu1  ;;  %v4802_v30 = vsub.f32 1.0, %v6461_v37 }
0x111b   : > { %v4657_v0 = vadd.f32 %v4656_v56, %v8774_v29  ;;  %vm4755_vm3 = vcmp.ge.f32.partialorder %v4723_v46, 1.0  ;;  %4898 = vst.msk [vmem:[#allocation3 + $0x68] sm:$0xf] %vm654_vm1, %v6707_v35  ;;  %v8993_v25 = vmul.f32 %v4801_v21, %v4721_v58  ;;  %v4800_v58 = vsub.f32 1.0, %v6459_v53 }
0x111c   : > { %v4658_v10 = vpop.f32.mrf.mxu1  ;;  %v6462_v9 = vsel %vm4755_vm3, 1.0, %v7071_v23 }
0x111d   : > { %v8985_v43 = vadd.f32 %v4658_v10, %v8774_v29  ;;  %v4803_v22 = vsub.f32 1.0, %v6462_v9  ;;  %v4724_v26 = vmul.f32 0.6666667, %v4657_v0  ;;  %v6708_v14 = vpack.c.bf16 %v6462_v9, %v6462_v9 }
0x111e   : > { %v4799_v10 = vsub.f32 1.0, %v6458_v24 }
0x111f   : > { %v8987_v28 = vmul.f32 %v4803_v22, %v4723_v46  ;;  %vm4756_vm8 = vcmp.ge.f32.partialorder %v4724_v26, 1.0  ;;  %4899 = vst.msk [vmem:[#allocation3 + $0x70] sm:$0xf] %vm654_vm1, %v6708_v14  ;;  %v9005_v22 = vmul.f32 %v4802_v30, %v4722_v5  ;;  %v4797_v14 = vsub.f32 1.0, %v8910_v16 }
0x1120   : > { %v6463_v56 = vsel %vm4756_vm8, 1.0, %v7071_v23  ;;  %v9003_v9 = vmul.f32 %v4799_v10, %v8933_v13  ;;  %v4795_v13 = vsub.f32 1.0, %v8876_v52  ;;  %v4798_v30 = vsub.f32 1.0, %v8927_v40 }
0x1121   : > { %4961 = vrot.lane.b32.xlu0 %v8987_v28, %s7072_s21  ;;  %v4804_v35 = vsub.f32 1.0, %v6463_v56  ;;  %v6709_v4 = vpack.c.bf16 %v6463_v56, %v6463_v56 }
0x1122   : > { %v9025_v16 = vmul.f32 %v4795_v13, %v8865_v44  ;;  %v9028_v24 = vmul.f32 %v4798_v30, %v8918_v39  ;;  %v4794_v44 = vsub.f32 1.0, %v8859_v38 }
0x1123   : > { %v8995_v29 = vmul.f32 %v4804_v35, %v4724_v26  ;;  %4900 = vst.msk [vmem:[#allocation3 + $0x78] sm:$0xf] %vm654_vm1, %v6709_v4  ;;  %v9013_v26 = vmul.f32 %v4797_v14, %v8899_v11  ;;  %v9016_v4 = vmul.f32 %v4800_v58, %v8948_v20  ;;  %v4793_v11 = vsub.f32 1.0, %v8842_v12 }
0x1124   : > { %v4796_v20 = vsub.f32 1.0, %v8893_v49  ;;  %v9048_v12 = vmul.f32 %v4794_v44, %v8850_v62 }
0x1125   : > { %4957 = vrot.lane.b32.xlu0 %v8993_v25, %s7072_s21  ;;  %4963 = vrot.lane.b32.xlu1 %v8995_v29, %s7072_s21  ;;  %v9037_v52 = vmul.f32 %v4793_v11, %v8831_v59 }
0x1126   : > { %v9040_v40 = vmul.f32 %v4796_v20, %v8884_v27 }
0x1129   : > { %4953 = vrot.lane.b32.xlu0 %v9003_v9, %s7072_s21  ;;  %4959 = vrot.lane.b32.xlu1 %v9005_v22, %s7072_s21 }
0x112d   : > { %4949 = vrot.lane.b32.xlu0 %v9013_v26, %s7072_s21  ;;  %4955 = vrot.lane.b32.xlu1 %v9016_v4, %s7072_s21 }
0x1131   : > { %4945 = vrot.lane.b32.xlu0 %v9025_v16, %s7072_s21  ;;  %4951 = vrot.lane.b32.xlu1 %v9028_v24, %s7072_s21 }
0x1135   : > { %4941 = vrot.lane.b32.xlu0 %v9037_v52, %s7072_s21  ;;  %4947 = vrot.lane.b32.xlu1 %v9040_v40, %s7072_s21 }
0x1139   : > { %4937 = vrot.lane.b32.xlu0 %v8824_v3, %s7072_s21  ;;  %4943 = vrot.lane.b32.xlu1 %v9048_v12, %s7072_s21 }
0x113d   : > { %4933 = vrot.lane.b32.xlu0 %v8805_v51, %s7072_s21  ;;  %4939 = vrot.lane.b32.xlu1 %v8838_v15, %s7072_s21 }
0x1141   : > { %4935 = vrot.lane.b32.xlu1 %v8816_v50, %s7072_s21 }
0x1193   : > { %v4962_v59 = vpop.permute.xlu0 %4961 }
0x1194   : > { %v4995_v38 = vsub.f32 %v8973_v57, %v4962_v59 }
0x1196   : > { %v5011_v62 = vmul.f32 0.6666667, %v4995_v38 }
0x1197   : > { %v4958_v27 = vpop.permute.xlu0 %4957  ;;  %v4964_v49 = vpop.permute.xlu1 %4963 }
0x1198   : > { %v4993_v39 = vsub.f32 %v8952_v48, %v4958_v27  ;;  %v4996_v53 = vsub.f32 %v4657_v0, %v4964_v49  ;;  %5057 = vrot.lane.b32.xlu0 %v5011_v62, %s7072_s21 }
0x119a   : > { %v5009_v60 = vmul.f32 0.6666667, %v4993_v39  ;;  %v5012_v5 = vmul.f32 0.6666667, %v4996_v53 }
0x119b   : > { %v4954_v37 = vpop.permute.xlu0 %4953  ;;  %v4960_v46 = vpop.permute.xlu1 %4959 }
0x119c   : > { %v4991_v21 = vsub.f32 %v8922_v47, %v4954_v37  ;;  %v4994_v56 = vsub.f32 %v8963_v33, %v4960_v46  ;;  %5053 = vrot.lane.b32.xlu0 %v5009_v60, %s7072_s21  ;;  %5059 = vrot.lane.b32.xlu1 %v5012_v5, %s7072_s21 }
0x119e   : > { %v5007_v57 = vmul.f32 0.6666667, %v4991_v21  ;;  %v5010_v35 = vmul.f32 0.6666667, %v4994_v56 }
0x119f   : > { %v4950_v10 = vpop.permute.xlu0 %4949  ;;  %v4956_v14 = vpop.permute.xlu1 %4955 }
0x11a0   : > { %v4989_v0 = vsub.f32 %v8888_v6, %v4950_v10  ;;  %v4992_v48 = vsub.f32 %v8939_v54, %v4956_v14  ;;  %5049 = vrot.lane.b32.xlu0 %v5007_v57, %s7072_s21  ;;  %5055 = vrot.lane.b32.xlu1 %v5010_v35, %s7072_s21 }
0x11a2   : > { %v5005_v58 = vmul.f32 0.6666667, %v4989_v0  ;;  %v5008_v47 = vmul.f32 0.6666667, %v4992_v48 }
0x11a3   : > { %v4946_v13 = vpop.permute.xlu0 %4945  ;;  %v4952_v33 = vpop.permute.xlu1 %4951 }
0x11a4   : > { %v4987_v30 = vsub.f32 %v8854_v31, %v4946_v13  ;;  %v4990_v11 = vsub.f32 %v8905_v18, %v4952_v33  ;;  %5045 = vrot.lane.b32.xlu0 %v5005_v58, %s7072_s21  ;;  %5051 = vrot.lane.b32.xlu1 %v5008_v47, %s7072_s21 }
0x11a6   : > { %v5003_v20 = vmul.f32 0.6666667, %v4987_v30  ;;  %v5006_v6 = vmul.f32 0.6666667, %v4990_v11 }
0x11a7   : > { %v4942_v44 = vpop.permute.xlu0 %4941  ;;  %v4948_v54 = vpop.permute.xlu1 %4947 }
0x11a8   : > { %v4985_v59 = vsub.f32 %v8822_v55, %v4942_v44  ;;  %v4988_v38 = vsub.f32 %v8871_v63, %v4948_v54  ;;  %5041 = vrot.lane.b32.xlu0 %v5003_v20, %s7072_s21  ;;  %5047 = vrot.lane.b32.xlu1 %v5006_v6, %s7072_s21 }
0x11aa   : > { %v5001_v62 = vmul.f32 0.6666667, %v4985_v59  ;;  %v5004_v31 = vmul.f32 0.6666667, %v4988_v38 }
0x11ab   : > { %v4938_v27 = vpop.permute.xlu0 %4937  ;;  %v4944_v18 = vpop.permute.xlu1 %4943 }
0x11ac   : > { %v4983_v49 = vsub.f32 %v8803_v42, %v4938_v27  ;;  %v4986_v39 = vsub.f32 %v8835_v17, %v4944_v18  ;;  %5037 = vrot.lane.b32.xlu0 %v5001_v62, %s7072_s21  ;;  %5043 = vrot.lane.b32.xlu1 %v5004_v31, %s7072_s21 }
0x11ae   : > { %v4999_v53 = vmul.f32 0.6666667, %v4983_v49  ;;  %v5002_v55 = vmul.f32 0.6666667, %v4986_v39 }
0x11af   : > { %v4934_v60 = vpop.permute.xlu0 %4933  ;;  %v4940_v63 = vpop.permute.xlu1 %4939 }
0x11b0   : > { %v4981_v5 = vsub.f32 %v8794_v32, %v4934_v60  ;;  %v4984_v37 = vsub.f32 %v8814_v19, %v4940_v63  ;;  %5033 = vrot.lane.b32.xlu0 %v4999_v53, %s7072_s21  ;;  %5039 = vrot.lane.b32.xlu1 %v5002_v55, %s7072_s21 }
0x11b2   : > { %v4997_v46 = vmul.f32 0.6666667, %v4981_v5  ;;  %v5000_v42 = vmul.f32 0.6666667, %v4984_v37 }
0x11b3   : > { %v4936_v21 = vpop.permute.xlu1 %4935 }
0x11b4   : > { %v4982_v17 = vsub.f32 %v8798_v8, %v4936_v21  ;;  %5029 = vrot.lane.b32.xlu0 %v4997_v46, %s7072_s21  ;;  %5035 = vrot.lane.b32.xlu1 %v5000_v42, %s7072_s21 }
0x11b6   : > { %v4998_v56 = vmul.f32 0.6666667, %v4982_v17 }
0x11b8   : > { %5031 = vrot.lane.b32.xlu1 %v4998_v56, %s7072_s21 }
0x120a   : > { %v5058_v57 = vpop.permute.xlu0 %5057 }
0x120b   : > { %v5091_v32 = vadd.f32 %v5058_v57, %v8987_v28 }
0x120d   : > { %vm5107_vm9 = vcmp.ge.f32.partialorder %v5091_v32, 1.0 }
0x120e   : > { %v9093_v19 = vsel %vm5107_vm9, 1.0, %v7071_v23  ;;  %v5054_v35 = vpop.permute.xlu0 %5053  ;;  %v5060_v10 = vpop.permute.xlu1 %5059 }
0x120f   : > { %v5155_v14 = vsub.f32 1.0, %v9093_v19  ;;  %v5089_v8 = vadd.f32 %v5054_v35, %v8993_v25  ;;  %v5092_v0 = vadd.f32 %v5060_v10, %v8995_v29 }
0x1211   : > { %v5171_v48 = vmul.f32 %v5155_v14, %v5091_v32  ;;  %vm5105_vm10 = vcmp.ge.f32.partialorder %v5089_v8, 1.0  ;;  %vm5108_vm11 = vcmp.ge.f32.partialorder %v5092_v0, 1.0 }
0x1212   : > { %v9099_v58 = vsel %vm5105_vm10, 1.0, %v7071_v23  ;;  %v9102_v28 = vsel %vm5108_vm11, 1.0, %v7071_v23  ;;  %v5050_v47 = vpop.permute.xlu0 %5049  ;;  %v5056_v13 = vpop.permute.xlu1 %5055 }
0x1213   : > { %v5315_v33 = vsub.f32 %v8978_v1, %v5171_v48  ;;  %v5153_v30 = vsub.f32 1.0, %v9099_v58  ;;  %v5156_v11 = vsub.f32 1.0, %v9102_v28  ;;  %v5087_v25 = vadd.f32 %v5050_v47, %v9003_v9 }
0x1214   : > { %v5090_v29 = vadd.f32 %v5056_v13, %v9005_v22 }
0x1215   : > { %v5331_v20 = vmul.f32 0.6666667, %v5315_v33  ;;  %v5169_v6 = vmul.f32 %v5153_v30, %v5089_v8  ;;  %v5172_v44 = vmul.f32 %v5156_v11, %v5092_v0  ;;  %vm5103_vm13 = vcmp.ge.f32.partialorder %v5087_v25, 1.0 }
0x1216   : > { %vm5106_vm14 = vcmp.ge.f32.partialorder %v5090_v29, 1.0  ;;  %v5046_v54 = vpop.permute.xlu0 %5045  ;;  %v9112_v31 = vsel %vm5103_vm13, 1.0, %v7071_v23  ;;  %v5052_v27 = vpop.permute.xlu1 %5051 }
0x1217   : > { %v5347_v59 = vadd.f32 %v5331_v20, %v5171_v48  ;;  %v5313_v38 = vsub.f32 %v8958_v61, %v5169_v6  ;;  %v5316_v62 = vsub.f32 %v8985_v43, %v5172_v44  ;;  %v5151_v18 = vsub.f32 1.0, %v9112_v31 }
0x1218   : > { %v9116_v9 = vsel %vm5106_vm14, 1.0, %v7071_v23  ;;  %v5085_v22 = vadd.f32 %v5046_v54, %v9013_v26  ;;  %v5088_v21 = vadd.f32 %v5052_v27, %v9016_v4 }
0x1219   : > { %vm5363_vm12 = vcmp.ge.f32.partialorder %v5347_v59, 1.0  ;;  %v5329_v49 = vmul.f32 0.6666667, %v5313_v38  ;;  %v5332_v39 = vmul.f32 0.6666667, %v5316_v62  ;;  %v5154_v53 = vsub.f32 1.0, %v9116_v9 }
0x121a   : > { %v9121_v61 = vsel %vm5363_vm12, 1.0, %v7071_v23  ;;  %v5167_v55 = vmul.f32 %v5151_v18, %v5087_v25  ;;  %vm5101_vm0 = vcmp.ge.f32.partialorder %v5085_v22, 1.0  ;;  %v5042_v60 = vpop.permute.xlu0 %5041  ;;  %v5048_v32 = vpop.permute.xlu1 %5047  ;;  %vm5104_vm5 = vcmp.ge.f32.partialorder %v5088_v21, 1.0 }
0x121b   : > { %v5411_v63 = vsub.f32 1.0, %v9121_v61  ;;  %v5345_v5 = vadd.f32 %v5329_v49, %v5169_v6  ;;  %v5348_v37 = vadd.f32 %v5332_v39, %v5172_v44  ;;  %v5170_v46 = vmul.f32 %v5154_v53, %v5090_v29 }
0x121c   : > { %v5311_v42 = vsub.f32 %v8930_v45, %v5167_v55  ;;  %v9126_v26 = vsel %vm5101_vm0, 1.0, %v7071_v23  ;;  %v5083_v17 = vadd.f32 %v5042_v60, %v9025_v16  ;;  %v9149_v33 = vsel %vm5104_vm5, 1.0, %v7071_v23 }
0x121d   : > { %v9130_v56 = vmul.f32 %v5411_v63, %v5347_v59  ;;  %vm5361_vm2 = vcmp.ge.f32.partialorder %v5345_v5, 1.0  ;;  %vm5364_vm4 = vcmp.ge.f32.partialorder %v5348_v37, 1.0  ;;  %v5314_v57 = vsub.f32 %v8968_v2, %v5170_v46 }
0x121e   : > { %v9134_v35 = vsel %vm5361_vm2, 1.0, %v7071_v23  ;;  %v9137_v10 = vsel %vm5364_vm4, 1.0, %v7071_v23  ;;  %v5327_v45 = vmul.f32 0.6666667, %v5311_v42  ;;  %v5149_v14 = vsub.f32 1.0, %v9126_v26  ;;  %v5038_v6 = vpop.permute.xlu0 %5037  ;;  %v5044_v44 = vpop.permute.xlu1 %5043 }
0x121f   : > { %v5409_v4 = vsub.f32 1.0, %v9134_v35  ;;  %v5412_v16 = vsub.f32 1.0, %v9137_v10  ;;  %v5330_v8 = vmul.f32 0.6666667, %v5314_v57  ;;  %5569 = vrot.lane.b32.xlu0 %v9130_v56, %s7072_s21  ;;  %vm5099_vm6 = vcmp.ge.f32.partialorder %v5083_v17, 1.0 }
0x1220   : > { %v5343_v0 = vadd.f32 %v5327_v45, %v5167_v55  ;;  %v5165_v2 = vmul.f32 %v5149_v14, %v5085_v22  ;;  %v5152_v11 = vsub.f32 1.0, %v9149_v33  ;;  %v9155_v29 = vsel %vm5099_vm6, 1.0, %v7071_v23 }
0x1221   : > { %v9144_v48 = vmul.f32 %v5409_v4, %v5345_v5  ;;  %v9146_v47 = vmul.f32 %v5412_v16, %v5348_v37  ;;  %v5346_v13 = vadd.f32 %v5330_v8, %v5170_v46  ;;  %v5086_v20 = vadd.f32 %v5048_v32, %v9028_v24 }
0x1222   : > { %vm5359_vm7 = vcmp.ge.f32.partialorder %v5343_v0, 1.0  ;;  %v5309_v30 = vsub.f32 %v8896_v36, %v5165_v2  ;;  %v5168_v27 = vmul.f32 %v5152_v11, %v5088_v21  ;;  %v5147_v18 = vsub.f32 1.0, %v9155_v29  ;;  %v5040_v42 = vpop.permute.xlu1 %5039 }
0x1223   : > { %v6522_v25 = vsel %vm5359_vm7, 1.0, %v7071_v23  ;;  %vm5362_vm3 = vcmp.ge.f32.partialorder %v5346_v13, 1.0  ;;  %5565 = vrot.lane.b32.xlu0 %v9144_v48, %s7072_s21  ;;  %5571 = vrot.lane.b32.xlu1 %v9146_v47, %s7072_s21  ;;  %vm5102_vm8 = vcmp.ge.f32.partialorder %v5086_v20, 1.0  ;;  %v5081_v49 = vadd.f32 %v5038_v6, %v9037_v52 }
0x1224   : > { %v5407_v54 = vsub.f32 1.0, %v6522_v25  ;;  %v6736_v36 = vpack.c.bf16 %v6522_v25, %v6522_v25  ;;  %v9163_v59 = vsel %vm5362_vm3, 1.0, %v7071_v23  ;;  %v5325_v38 = vmul.f32 0.6666667, %v5309_v30  ;;  %v9552_v25 = vld [vmem:[#allocation15_spill] sm:$0xff] }
0x1225   : > { %v5410_v62 = vsub.f32 1.0, %v9163_v59  ;;  %v5312_v53 = vsub.f32 %v8945_v41, %v5168_v27  ;;  %v5163_v55 = vmul.f32 %v5147_v18, %v5083_v17  ;;  %v9175_v60 = vsel %vm5102_vm8, 1.0, %v7071_v23  ;;  %v5034_v41 = vpop.permute.xlu0 %5033 }
0x1226   : > { %v9167_v24 = vmul.f32 %v5407_v54, %v5343_v0  ;;  %5503 = vst.msk [vmem:[#allocation3 + $0x54] sm:$0xf] %vm654_vm1, %v6736_v36  ;;  %v5341_v22 = vadd.f32 %v5325_v38, %v5165_v2  ;;  %v5150_v63 = vsub.f32 1.0, %v9175_v60  ;;  %vm5097_vm10 = vcmp.ge.f32.partialorder %v5081_v49, 1.0 }
0x1227   : > { %v9171_v39 = vmul.f32 %v5410_v62, %v5346_v13  ;;  %v5328_v37 = vmul.f32 0.6666667, %v5312_v53  ;;  %v5307_v52 = vsub.f32 %v8862_v34, %v5163_v55  ;;  %v9183_v46 = vsel %vm5097_vm10, 1.0, %v7071_v23 }
0x1228   : > { %vm5357_vm9 = vcmp.ge.f32.partialorder %v5341_v22, 1.0  ;;  %5561 = vrot.lane.b32.xlu0 %v9167_v24, %s7072_s21  ;;  %v5166_v57 = vmul.f32 %v5150_v63, %v5086_v20  ;;  %v5145_v32 = vsub.f32 1.0, %v9183_v46  ;;  %v5084_v4 = vadd.f32 %v5044_v44, %v9040_v40  ;;  %v5036_v44 = vpop.permute.xlu1 %5035 }
0x1229   : > { %v6520_v5 = vsel %vm5357_vm9, 1.0, %v7071_v23  ;;  %5567 = vrot.lane.b32.xlu1 %v9171_v39, %s7072_s21  ;;  %v5344_v45 = vadd.f32 %v5328_v37, %v5168_v27  ;;  %v5323_v14 = vmul.f32 0.6666667, %v5307_v52  ;;  %v5079_v0 = vadd.f32 %v5034_v41, %v8824_v3 }
0x122a   : > { %v5405_v21 = vsub.f32 1.0, %v6520_v5  ;;  %v6734_v17 = vpack.c.bf16 %v6520_v5, %v6520_v5  ;;  %v5310_v34 = vsub.f32 %v8913_v7, %v5166_v57  ;;  %v5161_v8 = vmul.f32 %v5145_v32, %v5081_v49 }
0x122b   : > { %vm5360_vm11 = vcmp.ge.f32.partialorder %v5344_v45, 1.0  ;;  %v5339_v2 = vadd.f32 %v5323_v14, %v5163_v55  ;;  %vm5100_vm13 = vcmp.ge.f32.partialorder %v5084_v4, 1.0  ;;  %v5082_v13 = vadd.f32 %v5040_v42, %v9048_v12  ;;  %v9553_v55 = vld [vmem:[#allocation17_spill] sm:$0xff]  ;;  %v5030_v42 = vpop.permute.xlu0 %5029 }
0x122c   : > { %v9189_v16 = vmul.f32 %v5405_v21, %v5341_v22  ;;  %5501 = vst.msk [vmem:[#allocation3 + $0x44] sm:$0xf] %vm654_vm1, %v6734_v17  ;;  %v6523_v30 = vsel %vm5360_vm11, 1.0, %v7071_v23  ;;  %v5326_v11 = vmul.f32 0.6666667, %v5310_v34  ;;  %v5305_v20 = vsub.f32 %v9552_v25, %v5161_v8  ;;  %v5032_v32 = vpop.permute.xlu1 %5031  ;;  %v9554_v25 = vld [vmem:[#allocation14_spill] sm:$0xff] }
0x122d   : > { %v9198_v40 = vsel %vm5100_vm13, 1.0, %v7071_v23  ;;  %v5408_v7 = vsub.f32 1.0, %v6523_v30  ;;  %v6737_v6 = vpack.c.bf16 %v6523_v30, %v6523_v30  ;;  %vm5355_vm14 = vcmp.ge.f32.partialorder %v5339_v2, 1.0 }
0x122e   : > { %5557 = vrot.lane.b32.xlu0 %v9189_v16, %s7072_s21  ;;  %v5148_v3 = vsub.f32 1.0, %v9198_v40  ;;  %v6518_v54 = vsel %vm5355_vm14, 1.0, %v7071_v23  ;;  %v5342_v12 = vadd.f32 %v5326_v11, %v5166_v57  ;;  %v5321_v36 = vmul.f32 0.6666667, %v5305_v20 }
0x122f   : > { %v9204_v38 = vmul.f32 %v5408_v7, %v5344_v45  ;;  %5504 = vst.msk [vmem:[#allocation3 + $0x5c] sm:$0xf] %vm654_vm1, %v6737_v6  ;;  %v5403_v62 = vsub.f32 1.0, %v6518_v54  ;;  %v6732_v27 = vpack.c.bf16 %v6518_v54, %v6518_v54  ;;  %vm5095_vm0 = vcmp.ge.f32.partialorder %v5079_v0, 1.0 }
0x1230   : > { %v5164_v18 = vmul.f32 %v5148_v3, %v5084_v4  ;;  %vm5358_vm12 = vcmp.ge.f32.partialorder %v5342_v12, 1.0  ;;  %v5337_v22 = vadd.f32 %v5321_v36, %v5161_v8  ;;  %vm5098_vm2 = vcmp.ge.f32.partialorder %v5082_v13, 1.0 }
0x1231   : > { %v9207_v49 = vmul.f32 %v5403_v62, %v5339_v2  ;;  %5499 = vst.msk [vmem:[#allocation3 + $0x34] sm:$0xf] %vm654_vm1, %v6732_v27  ;;  %v6521_v53 = vsel %vm5358_vm12, 1.0, %v7071_v23  ;;  %v9213_v5 = vsel %vm5095_vm0, 1.0, %v7071_v23  ;;  %5563 = vrot.lane.b32.xlu1 %v9204_v38, %s7072_s21  ;;  %v9220_v57 = vsel %vm5098_vm2, 1.0, %v7071_v23 }
0x1232   : > { %v5308_v63 = vsub.f32 %v9553_v55, %v5164_v18  ;;  %v5406_v37 = vsub.f32 1.0, %v6521_v53  ;;  %v6735_v52 = vpack.c.bf16 %v6521_v53, %v6521_v53  ;;  %vm5353_vm4 = vcmp.ge.f32.partialorder %v5337_v22, 1.0  ;;  %v9255_v55 = vld [vmem:[#allocation2 + $0x8] sm:$0xff] }
0x1233   : > { %v5143_v41 = vsub.f32 1.0, %v9213_v5  ;;  %v6516_v21 = vsel %vm5353_vm4, 1.0, %v7071_v23  ;;  %5553 = vrot.lane.b32.xlu0 %v9207_v49, %s7072_s21  ;;  %v5146_v2 = vsub.f32 1.0, %v9220_v57  ;;  %v5077_v30 = vadd.f32 %v5030_v42, %v8805_v51 }
0x1234   : > { %v5324_v17 = vmul.f32 0.6666667, %v5308_v63  ;;  %v9224_v45 = vmul.f32 %v5406_v37, %v5342_v12  ;;  %5502 = vst.msk [vmem:[#allocation3 + $0x4c] sm:$0xf] %vm654_vm1, %v6735_v52  ;;  %v5401_v14 = vsub.f32 1.0, %v6516_v21  ;;  %v6730_v4 = vpack.c.bf16 %v6516_v21, %v6516_v21 }
0x1235   : > { %v5159_v34 = vmul.f32 %v5143_v41, %v5079_v0  ;;  %v5080_v7 = vadd.f32 %v5036_v44, %v8838_v15  ;;  %v5078_v6 = vadd.f32 %v5032_v32, %v8816_v50  ;;  %v5162_v0 = vmul.f32 %v5146_v2, %v5082_v13  ;;  %v9555_v44 = vld [vmem:[#allocation16_spill] sm:$0xff] }
0x1236   : > { %v5340_v8 = vadd.f32 %v5324_v17, %v5164_v18  ;;  %v9229_v11 = vmul.f32 %v5401_v14, %v5337_v22  ;;  %5497 = vst.msk [vmem:[#allocation3 + $0x24] sm:$0xf] %vm654_vm1, %v6730_v4  ;;  %5559 = vrot.lane.b32.xlu1 %v9224_v45, %s7072_s21  ;;  %vm5093_vm6 = vcmp.ge.f32.partialorder %v5077_v30, 1.0  ;;  %v6738_v3 = vpack.c.bf16 %v9134_v35, %v9134_v35  ;;  %v9266_v14 = vld [vmem:[#allocation2 + $0x38] sm:$0xff] }
0x1237   : > { %v5303_v20 = vsub.f32 %v9554_v25, %v5159_v34  ;;  %v9241_v12 = vsel %vm5093_vm6, 1.0, %v7071_v23  ;;  %vm5096_vm7 = vcmp.ge.f32.partialorder %v5080_v7, 1.0  ;;  %v5306_v36 = vsub.f32 %v9555_v44, %v5162_v0 }
0x1238   : > { %vm5356_vm5 = vcmp.ge.f32.partialorder %v5340_v8, 1.0  ;;  %5549 = vrot.lane.b32.xlu0 %v9229_v11, %s7072_s21  ;;  %v5141_v13 = vsub.f32 1.0, %v9241_v12  ;;  %5505 = vst.msk [vmem:[#allocation3 + $0x64] sm:$0xf] %vm654_vm1, %v6738_v3  ;;  %v9249_v35 = vsel %vm5096_vm7, 1.0, %v7071_v23  ;;  %vm5094_vm3 = vcmp.ge.f32.partialorder %v5078_v6, 1.0 }
0x1239   : > { %v6519_v51 = vsel %vm5356_vm5, 1.0, %v7071_v23  ;;  %v5319_v54 = vmul.f32 0.6666667, %v5303_v20  ;;  %v5322_v18 = vmul.f32 0.6666667, %v5306_v36  ;;  %v5144_v53 = vsub.f32 1.0, %v9249_v35 }
0x123a   : > { %v5404_v50 = vsub.f32 1.0, %v6519_v51  ;;  %v6733_v15 = vpack.c.bf16 %v6519_v51, %v6519_v51  ;;  %v5157_v22 = vmul.f32 %v5141_v13, %v5077_v30  ;;  %v9258_v63 = vsel %vm5094_vm3, 1.0, %v7071_v23 }
0x123b   : > { %v5335_v62 = vadd.f32 %v5319_v54, %v5159_v34  ;;  %v6740_v37 = vpack.c.bf16 %v9121_v61, %v9121_v61  ;;  %v5338_v41 = vadd.f32 %v5322_v18, %v5162_v0  ;;  %v5160_v21 = vmul.f32 %v5144_v53, %v5080_v7  ;;  %v9279_v54 = vld [vmem:[#allocation2 + $0x18] sm:$0xff] }
0x123c   : > { %v9251_v27 = vmul.f32 %v5404_v50, %v5340_v8  ;;  %5500 = vst.msk [vmem:[#allocation3 + $0x3c] sm:$0xf] %vm654_vm1, %v6733_v15  ;;  %v5301_v42 = vsub.f32 %v9255_v55, %v5157_v22  ;;  %v5142_v4 = vsub.f32 1.0, %v9258_v63  ;;  %v6739_v8 = vpack.c.bf16 %v9163_v59, %v9163_v59 }
0x123d   : > { %vm5351_vm8 = vcmp.ge.f32.partialorder %v5335_v62, 1.0  ;;  %5507 = vst.msk [vmem:[#allocation3 + $0x74] sm:$0xf] %vm654_vm1, %v6740_v37  ;;  %vm5354_vm9 = vcmp.ge.f32.partialorder %v5338_v41, 1.0  ;;  %v5304_v61 = vsub.f32 %v9266_v14, %v5160_v21  ;;  %v6741_v20 = vpack.c.bf16 %v9137_v10, %v9137_v10 }
0x123e   : > { %v6514_v52 = vsel %vm5351_vm8, 1.0, %v7071_v23  ;;  %5555 = vrot.lane.b32.xlu1 %v9251_v27, %s7072_s21  ;;  %v5317_v34 = vmul.f32 0.6666667, %v5301_v42  ;;  %v6517_v30 = vsel %vm5354_vm9, 1.0, %v7071_v23  ;;  %v5158_v25 = vmul.f32 %v5142_v4, %v5078_v6  ;;  %5506 = vst.msk [vmem:[#allocation3 + $0x6c] sm:$0xf] %vm654_vm1, %v6739_v8 }
0x123f   : > { %v5399_v17 = vsub.f32 1.0, %v6514_v52  ;;  %v6728_v32 = vpack.c.bf16 %v6514_v52, %v6514_v52  ;;  %v5402_v7 = vsub.f32 1.0, %v6517_v30  ;;  %v6731_v0 = vpack.c.bf16 %v6517_v30, %v6517_v30  ;;  %5508 = vst.msk [vmem:[#allocation3 + $0x7c] sm:$0xf] %vm654_vm1, %v6741_v20 }
0x1240   : > { %v5333_v3 = vadd.f32 %v5317_v34, %v5157_v22  ;;  %v5320_v51 = vmul.f32 0.6666667, %v5304_v61  ;;  %v5302_v59 = vsub.f32 %v9279_v54, %v5158_v25  ;;  %v5521_v34 = vld [vmem:[#allocation2 + $0xc8] sm:$0xff] }
0x1241   : > { %v9273_v2 = vmul.f32 %v5399_v17, %v5335_v62  ;;  %5495 = vst.msk [vmem:[#allocation3 + $0x14] sm:$0xf] %vm654_vm1, %v6728_v32  ;;  %v9286_v50 = vmul.f32 %v5402_v7, %v5338_v41  ;;  %5498 = vst.msk [vmem:[#allocation3 + $0x2c] sm:$0xf] %vm654_vm1, %v6731_v0  ;;  %v5519_v0 = vld [vmem:[#allocation2 + $0xa8] sm:$0xff] }
0x1242   : > { %vm5349_vm10 = vcmp.ge.f32.partialorder %v5333_v3, 1.0  ;;  %v5336_v10 = vadd.f32 %v5320_v51, %v5160_v21  ;;  %v5318_v15 = vmul.f32 0.6666667, %v5302_v59  ;;  %v5522_v59 = vld [vmem:[#allocation2 + $0xd8] sm:$0xff] }
0x1243   : > { %5545 = vrot.lane.b32.xlu0 %v9273_v2, %s7072_s21  ;;  %v6512_v6 = vsel %vm5349_vm10, 1.0, %v7071_v23  ;;  %5551 = vrot.lane.b32.xlu1 %v9286_v50, %s7072_s21 }
0x1244   : > { %v5397_v44 = vsub.f32 1.0, %v6512_v6  ;;  %v6726_v36 = vpack.c.bf16 %v6512_v6, %v6512_v6  ;;  %vm5352_vm11 = vcmp.ge.f32.partialorder %v5336_v10, 1.0  ;;  %v5334_v62 = vadd.f32 %v5318_v15, %v5158_v25 }
0x1245   : > { %v6515_v13 = vsel %vm5352_vm11, 1.0, %v7071_v23 }
0x1246   : > { %v9293_v18 = vmul.f32 %v5397_v44, %v5333_v3  ;;  %5493 = vst.msk [vmem:[#allocation3 + $0x4] sm:$0xf] %vm654_vm1, %v6726_v36  ;;  %v5400_v22 = vsub.f32 1.0, %v6515_v13  ;;  %v6729_v53 = vpack.c.bf16 %v6515_v13, %v6515_v13  ;;  %vm5350_vm13 = vcmp.ge.f32.partialorder %v5334_v62, 1.0  ;;  %v5517_v44 = vld [vmem:[#allocation2 + $0x88] sm:$0xff] }
0x1247   : > { %v6513_v52 = vsel %vm5350_vm13, 1.0, %v7071_v23 }
0x1248   : > { %v9296_v37 = vmul.f32 %v5400_v22, %v5336_v10  ;;  %5496 = vst.msk [vmem:[#allocation3 + $0x1c] sm:$0xf] %vm654_vm1, %v6729_v53  ;;  %5541 = vrot.lane.b32.xlu0 %v9293_v18, %s7072_s21  ;;  %v5398_v41 = vsub.f32 1.0, %v6513_v52  ;;  %v6727_v42 = vpack.c.bf16 %v6513_v52, %v6513_v52  ;;  %v5515_v52 = vld [vmem:[#allocation2 + $0x68] sm:$0xff] }
0x124a   : > { %5547 = vrot.lane.b32.xlu1 %v9296_v37, %s7072_s21  ;;  %v9304_v21 = vmul.f32 %v5398_v41, %v5334_v62  ;;  %5494 = vst.msk [vmem:[#allocation3 + $0xc] sm:$0xf] %vm654_vm1, %v6727_v42  ;;  %v5520_v62 = vld [vmem:[#allocation2 + $0xb8] sm:$0xff] }
0x124e   : > { %5543 = vrot.lane.b32.xlu1 %v9304_v21, %s7072_s21 }
0x1291   : > { %v5570_v17 = vpop.permute.xlu0 %5569 }
0x1292   : > { %v5603_v32 = vsub.f32 %v8978_v1, %v5570_v17 }
0x1294   : > { %v5619_v4 = vmul.f32 0.6666667, %v5603_v32 }
0x1295   : > { %v5566_v61 = vpop.permute.xlu0 %5565  ;;  %v5572_v8 = vpop.permute.xlu1 %5571 }
0x1296   : > { %v5601_v30 = vsub.f32 %v5521_v34, %v5566_v61  ;;  %v5604_v25 = vsub.f32 %v8985_v43, %v5572_v8  ;;  %5665 = vrot.lane.b32.xlu0 %v5619_v4, %s7072_s21  ;;  %v5518_v4 = vld [vmem:[#allocation2 + $0x98] sm:$0xff]  ;;  %v5513_v8 = vld [vmem:[#allocation2 + $0x48] sm:$0xff] }
0x1298   : > { %v5617_v20 = vmul.f32 0.6666667, %v5601_v30  ;;  %v5620_v7 = vmul.f32 0.6666667, %v5604_v25 }
0x129a   : > { %v5562_v3 = vpop.permute.xlu0 %5561  ;;  %5661 = vrot.lane.b32.xlu0 %v5617_v20, %s7072_s21  ;;  %5667 = vrot.lane.b32.xlu1 %v5620_v7, %s7072_s21 }
0x129b   : > { %v5599_v51 = vsub.f32 %v5519_v0, %v5562_v3  ;;  %v5568_v1 = vpop.permute.xlu1 %5567  ;;  %v5516_v0 = vld [vmem:[#allocation2 + $0x78] sm:$0xff] }
0x129c   : > { %v5602_v10 = vsub.f32 %v5522_v59, %v5568_v1  ;;  %v5511_v1 = vld [vmem:[#allocation2 + $0x28] sm:$0xff] }
0x129d   : > { %v5615_v6 = vmul.f32 0.6666667, %v5599_v51 }
0x129e   : > { %v5618_v15 = vmul.f32 0.6666667, %v5602_v10 }
0x129f   : > { %5657 = vrot.lane.b32.xlu0 %v5615_v6, %s7072_s21 }
0x12a0   : > { %v5558_v43 = vpop.permute.xlu0 %5557  ;;  %5663 = vrot.lane.b32.xlu1 %v5618_v15, %s7072_s21 }
0x12a1   : > { %v5597_v36 = vsub.f32 %v5517_v44, %v5558_v43  ;;  %v5514_v44 = vld [vmem:[#allocation2 + $0x58] sm:$0xff] }
0x12a3   : > { %v5613_v13 = vmul.f32 0.6666667, %v5597_v36  ;;  %v5564_v22 = vpop.permute.xlu1 %5563 }
0x12a4   : > { %v5600_v53 = vsub.f32 %v5520_v62, %v5564_v22 }
0x12a5   : > { %5653 = vrot.lane.b32.xlu0 %v5613_v13, %s7072_s21  ;;  %v5554_v41 = vpop.permute.xlu0 %5553 }
0x12a6   : > { %v5616_v42 = vmul.f32 0.6666667, %v5600_v53  ;;  %v5595_v17 = vsub.f32 %v5515_v52, %v5554_v41 }
0x12a8   : > { %v5611_v32 = vmul.f32 0.6666667, %v5595_v17  ;;  %v5560_v34 = vpop.permute.xlu1 %5559  ;;  %5659 = vrot.lane.b32.xlu1 %v5616_v42, %s7072_s21 }
0x12a9   : > { %v5598_v61 = vsub.f32 %v5518_v4, %v5560_v34 }
0x12aa   : > { %v5550_v30 = vpop.permute.xlu0 %5549  ;;  %5649 = vrot.lane.b32.xlu0 %v5611_v32, %s7072_s21  ;;  %v6724_v32 = vpack.c.bf16 %v9093_v19, %v9093_v19  ;;  %v6720_v19 = vpack.c.bf16 %v9112_v31, %v9112_v31  ;;  %v6716_v31 = vpack.c.bf16 %v9155_v29, %v9155_v29 }
0x12ab   : > { %v5614_v25 = vmul.f32 0.6666667, %v5598_v61  ;;  %v5593_v20 = vsub.f32 %v5513_v8, %v5550_v30 }
0x12ad   : > { %v5609_v7 = vmul.f32 0.6666667, %v5593_v20  ;;  %5655 = vrot.lane.b32.xlu1 %v5614_v25, %s7072_s21 }
0x12af   : > { %5645 = vrot.lane.b32.xlu0 %v5609_v7, %s7072_s21 }
0x12b0   : > { %v5556_v3 = vpop.permute.xlu1 %5555 }
0x12b1   : > { %v5596_v51 = vsub.f32 %v5516_v0, %v5556_v3 }
0x12b3   : > { %v5612_v59 = vmul.f32 0.6666667, %v5596_v51 }
0x12b5   : > { %v5546_v10 = vpop.permute.xlu0 %5545  ;;  %5651 = vrot.lane.b32.xlu1 %v5612_v59, %s7072_s21  ;;  %v5552_v43 = vpop.permute.xlu1 %5551 }
0x12b6   : > { %v5591_v6 = vsub.f32 %v5511_v1, %v5546_v10  ;;  %v5594_v36 = vsub.f32 %v5514_v44, %v5552_v43 }
0x12b8   : > { %v5607_v15 = vmul.f32 0.6666667, %v5591_v6  ;;  %v5610_v13 = vmul.f32 0.6666667, %v5594_v36 }
0x12ba   : > { %5641 = vrot.lane.b32.xlu0 %v5607_v15, %s7072_s21  ;;  %v5542_v62 = vpop.permute.xlu0 %5541  ;;  %5647 = vrot.lane.b32.xlu1 %v5610_v13, %s7072_s21 }
0x12bb   : > { %v5589_v22 = vsub.f32 %v9255_v55, %v5542_v62  ;;  %v6722_v55 = vpack.c.bf16 %v9099_v58, %v9099_v58  ;;  %v6718_v58 = vpack.c.bf16 %v9126_v26, %v9126_v26  ;;  %v6717_v26 = vpack.c.bf16 %v9198_v40, %v9198_v40 }
0x12bc   : > { %v5548_v53 = vpop.permute.xlu1 %5547 }
0x12bd   : > { %v5605_v52 = vmul.f32 0.6666667, %v5589_v22  ;;  %v5592_v41 = vsub.f32 %v9266_v14, %v5548_v53  ;;  %v6725_v14 = vpack.c.bf16 %v9102_v28, %v9102_v28  ;;  %v6721_v28 = vpack.c.bf16 %v9149_v33, %v9149_v33 }
0x12bf   : > { %v5608_v42 = vmul.f32 0.6666667, %v5592_v41  ;;  %5637 = vrot.lane.b32.xlu0 %v5605_v52, %s7072_s21 }
0x12c0   : > { %v5544_v17 = vpop.permute.xlu1 %5543 }
0x12c1   : > { %v5590_v4 = vsub.f32 %v9279_v54, %v5544_v17  ;;  %5643 = vrot.lane.b32.xlu1 %v5608_v42, %s7072_s21  ;;  %v6723_v54 = vpack.c.bf16 %v9116_v9, %v9116_v9  ;;  %v6719_v9 = vpack.c.bf16 %v9175_v60, %v9175_v60 }
0x12c3   : > { %v5606_v34 = vmul.f32 0.6666667, %v5590_v4  ;;  %5249 = vrot.lane.b32.xlu0 %v6724_v32, %s7072_s21 }
0x12c5   : > { %5639 = vrot.lane.b32.xlu1 %v5606_v34, %s7072_s21 }
0x12c7   : > { %5245 = vrot.lane.b32.xlu0 %v6722_v55, %s7072_s21 }
0x12c9   : > { %5251 = vrot.lane.b32.xlu1 %v6725_v14, %s7072_s21 }
0x12cb   : > { %5241 = vrot.lane.b32.xlu0 %v6720_v19, %s7072_s21 }
0x12cd   : > { %5247 = vrot.lane.b32.xlu1 %v6723_v54, %s7072_s21 }
0x12cf   : > { %5237 = vrot.lane.b32.xlu0 %v6718_v58, %s7072_s21 }
0x12d1   : > { %5243 = vrot.lane.b32.xlu1 %v6721_v28, %s7072_s21 }
0x12d3   : > { %5233 = vrot.lane.b32.xlu0 %v6716_v31, %s7072_s21 }
0x12d5   : > { %5239 = vrot.lane.b32.xlu1 %v6719_v9, %s7072_s21  ;;  %v6712_v9 = vpack.c.bf16 %v9213_v5, %v9213_v5 }
0x12d9   : > { %5235 = vrot.lane.b32.xlu1 %v6717_v26, %s7072_s21 }
0x1308   : > { %v5666_v33 = vpop.permute.xlu0 %5665 }
0x1309   : > { %v5699_v59 = vadd.f32 %v5666_v33, %v9130_v56 }
0x130b   : > { %vm5715_vm0 = vcmp.ge.f32.partialorder %v5699_v59, 1.0 }
0x130c   : > { %v5662_v61 = vpop.permute.xlu0 %5661  ;;  %v5668_v8 = vpop.permute.xlu1 %5667  ;;  %v6558_v43 = vsel %vm5715_vm0, 1.0, %v7071_v23 }
0x130d   : > { %v5697_v60 = vadd.f32 %v5662_v61, %v9144_v48  ;;  %v6756_v62 = vpack.c.bf16 %v6558_v43, %v6558_v43 }
0x130f   : > { %vm5713_vm12 = vcmp.ge.f32.partialorder %v5697_v60, 1.0 }
0x1311   : > { %v5658_v30 = vpop.permute.xlu0 %5657 }
0x1312   : > { %v5695_v29 = vadd.f32 %v5658_v30, %v9167_v24  ;;  %v5664_v25 = vpop.permute.xlu1 %5663 }
0x1313   : > { %v5698_v56 = vadd.f32 %v5664_v25, %v9171_v39 }
0x1314   : > { %vm5711_vm1 = vcmp.ge.f32.partialorder %v5695_v29, 1.0 }
0x1315   : > { %v6554_v51 = vsel %vm5711_vm1, 1.0, %v7071_v23  ;;  %vm5714_vm6 = vcmp.ge.f32.partialorder %v5698_v56, 1.0 }
0x1316   : > { %v6752_v1 = vpack.c.bf16 %v6554_v51, %v6554_v51  ;;  %v6557_v41 = vsel %vm5714_vm6, 1.0, %v7071_v23 }
0x1317   : > { %v5654_v20 = vpop.permute.xlu0 %5653 }
0x1318   : > { %v5693_v7 = vadd.f32 %v5654_v20, %v9189_v16  ;;  %v6556_v16 = vsel %vm5713_vm12, 1.0, %v7071_v23 }
0x1319   : > { %v6754_v44 = vpack.c.bf16 %v6556_v16, %v6556_v16  ;;  %v6044_v16 = vld [vmem:[%s9519_s16 + $0x10] sm:$0xff] }
0x131a   : > { %vm5709_vm14 = vcmp.ge.f32.partialorder %v5693_v7, 1.0  ;;  %v5660_v40 = vpop.permute.xlu1 %5659  ;;  %v6713_v7 = vpack.c.bf16 %v9249_v35, %v9249_v35  ;;  %v6042_v35 = vld [vmem:[%s9519_s16] sm:$0xff] }
0x131b   : > { %v6552_v0 = vsel %vm5709_vm14, 1.0, %v7071_v23  ;;  %v5696_v10 = vadd.f32 %v5660_v40, %v9204_v38 }
0x131c   : > { %v6750_v3 = vpack.c.bf16 %v6552_v0, %v6552_v0  ;;  %v5650_v24 = vpop.permute.xlu0 %5649 }
0x131d   : > { %v5691_v6 = vadd.f32 %v5650_v24, %v9207_v49  ;;  %vm5712_vm2 = vcmp.ge.f32.partialorder %v5696_v10, 1.0 }
0x131e   : > { %5813 = vrot.lane.b32.xlu0 %v6750_v3, %s7072_s21  ;;  %v6555_v13 = vsel %vm5712_vm2, 1.0, %v7071_v23 }
0x131f   : > { %v5656_v48 = vpop.permute.xlu1 %5655  ;;  %vm5707_vm5 = vcmp.ge.f32.partialorder %v5691_v6, 1.0  ;;  %v6753_v53 = vpack.c.bf16 %v6555_v13, %v6555_v13 }
0x1320   : > { %v5694_v15 = vadd.f32 %v5656_v48, %v9224_v45  ;;  %v5700_v45 = vadd.f32 %v5668_v8, %v9146_v47  ;;  %v6550_v39 = vsel %vm5707_vm5, 1.0, %v7071_v23  ;;  %v6755_v47 = vpack.c.bf16 %v6557_v41, %v6557_v41 }
0x1321   : > { %v5646_v49 = vpop.permute.xlu0 %5645  ;;  %v6748_v42 = vpack.c.bf16 %v6550_v39, %v6550_v39 }
0x1322   : > { %5817 = vrot.lane.b32.xlu0 %v6752_v1, %s7072_s21  ;;  %vm5710_vm4 = vcmp.ge.f32.partialorder %v5694_v15, 1.0  ;;  %v5689_v52 = vadd.f32 %v5646_v49, %v9229_v11  ;;  %vm5716_vm7 = vcmp.ge.f32.partialorder %v5700_v45, 1.0  ;;  %v6714_v11 = vpack.c.bf16 %v9183_v46, %v9183_v46 }
0x1323   : > { %v6553_v36 = vsel %vm5710_vm4, 1.0, %v7071_v23  ;;  %v6559_v4 = vsel %vm5716_vm7, 1.0, %v7071_v23 }
0x1324   : > { %v6751_v38 = vpack.c.bf16 %v6553_v36, %v6553_v36  ;;  %vm5705_vm3 = vcmp.ge.f32.partialorder %v5689_v52, 1.0  ;;  %v6757_v14 = vpack.c.bf16 %v6559_v4, %v6559_v4 }
0x1325   : > { %v6548_v55 = vsel %vm5705_vm3, 1.0, %v7071_v23 }
0x1326   : > { %5821 = vrot.lane.b32.xlu0 %v6754_v44, %s7072_s21  ;;  %5815 = vrot.lane.b32.xlu1 %v6751_v38, %s7072_s21  ;;  %v6746_v54 = vpack.c.bf16 %v6548_v55, %v6548_v55 }
0x1327   : > { %v5652_v22 = vpop.permute.xlu1 %5651 }
0x1328   : > { %v5692_v17 = vadd.f32 %v5652_v22, %v9251_v27 }
0x132a   : > { %5825 = vrot.lane.b32.xlu0 %v6756_v62, %s7072_s21  ;;  %5819 = vrot.lane.b32.xlu1 %v6753_v53, %s7072_s21  ;;  %vm5708_vm8 = vcmp.ge.f32.partialorder %v5692_v17, 1.0 }
0x132b   : > { %v6551_v19 = vsel %vm5708_vm8, 1.0, %v7071_v23 }
0x132c   : > { %v5642_v32 = vpop.permute.xlu0 %5641  ;;  %v5648_v34 = vpop.permute.xlu1 %5647  ;;  %v6749_v46 = vpack.c.bf16 %v6551_v19, %v6551_v19 }
0x132d   : > { %v5687_v27 = vadd.f32 %v5642_v32, %v9273_v2  ;;  %v5690_v58 = vadd.f32 %v5648_v34, %v9286_v50  ;;  %v6715_v50 = vpack.c.bf16 %v9220_v57, %v9220_v57  ;;  %v6710_v57 = vpack.c.bf16 %v9241_v12, %v9241_v12 }
0x132e   : > { %5809 = vrot.lane.b32.xlu0 %v6748_v42, %s7072_s21  ;;  %5823 = vrot.lane.b32.xlu1 %v6755_v47, %s7072_s21 }
0x132f   : > { %vm5703_vm9 = vcmp.ge.f32.partialorder %v5687_v27, 1.0  ;;  %vm5706_vm10 = vcmp.ge.f32.partialorder %v5690_v58, 1.0 }
0x1330   : > { %v6546_v26 = vsel %vm5703_vm9, 1.0, %v7071_v23  ;;  %v6549_v8 = vsel %vm5706_vm10, 1.0, %v7071_v23 }
0x1331   : > { %v5638_v28 = vpop.permute.xlu0 %5637  ;;  %v6744_v30 = vpack.c.bf16 %v6546_v26, %v6546_v26  ;;  %v6747_v25 = vpack.c.bf16 %v6549_v8, %v6549_v8 }
0x1332   : > { %5229 = vrot.lane.b32.xlu0 %v6714_v11, %s7072_s21  ;;  %5827 = vrot.lane.b32.xlu1 %v6757_v14, %s7072_s21  ;;  %v5685_v33 = vadd.f32 %v5638_v28, %v9293_v18 }
0x1333   : > { %v5644_v31 = vpop.permute.xlu1 %5643 }
0x1334   : > { %v5688_v5 = vadd.f32 %v5644_v31, %v9296_v37  ;;  %vm5701_vm11 = vcmp.ge.f32.partialorder %v5685_v33, 1.0 }
0x1335   : > { %v5250_v2 = vpop.permute.xlu0 %5249  ;;  %v6544_v37 = vsel %vm5701_vm11, 1.0, %v7071_v23 }
0x1336   : > { %5805 = vrot.lane.b32.xlu0 %v6746_v54, %s7072_s21  ;;  %5811 = vrot.lane.b32.xlu1 %v6749_v46, %s7072_s21  ;;  %5283 = vst.msk [vmem:[#allocation3 + $0x70] sm:$0xf] %vm759_vm15, %v5250_v2  ;;  %vm5704_vm13 = vcmp.ge.f32.partialorder %v5688_v5, 1.0  ;;  %v6742_v3 = vpack.c.bf16 %v6544_v37, %v6544_v37  ;;  %v9556_v5 = vmov 0  }
0x1337   : > { %v5640_v61 = vpop.permute.xlu1 %5639  ;;  %v6547_v0 = vsel %vm5704_vm13, 1.0, %v7071_v23 }
0x1338   : > { %v5686_v12 = vadd.f32 %v5640_v61, %v9304_v21  ;;  %v6745_v51 = vpack.c.bf16 %v6547_v0, %v6547_v0  ;;  %v6711_v21 = vpack.c.bf16 %v9258_v63, %v9258_v63  ;;  %v6043_v63 = vld [vmem:[%s9519_s16 + $0x8] sm:$0xff] }
0x1339   : > { %v5246_v29 = vpop.permute.xlu0 %5245 }
0x133a   : > { %5225 = vrot.lane.b32.xlu0 %v6712_v9, %s7072_s21  ;;  %5231 = vrot.lane.b32.xlu1 %v6715_v50, %s7072_s21  ;;  %5281 = vst.msk [vmem:[#allocation3 + $0x60] sm:$0xf] %vm759_vm15, %v5246_v29  ;;  %vm5702_vm1 = vcmp.ge.f32.partialorder %v5686_v12, 1.0  ;;  %v7053_v29 = vld [vmem:[%s9518_s15 + $0x8] sm:$0xff]  }
0x133b   : > { %v5252_v20 = vpop.permute.xlu1 %5251  ;;  %v6545_v10 = vsel %vm5702_vm1, 1.0, %v7071_v23  ;;  %v6045_v23 = vld [vmem:[%s9519_s16 + $0x18] sm:$0xff] }
0x133c   : > { %5284 = vst.msk [vmem:[#allocation3 + $0x78] sm:$0xf] %vm759_vm15, %v5252_v20  ;;  %v6743_v48 = vpack.c.bf16 %v6545_v10, %v6545_v10  ;;  %v9557_v20 = vld [vmem:[#allocation6_spill] sm:$0xff] }
0x133d   : > { %v5242_v18 = vpop.permute.xlu0 %5241 }
0x133e   : > { %5801 = vrot.lane.b32.xlu0 %v6744_v30, %s7072_s21  ;;  %5807 = vrot.lane.b32.xlu1 %v6747_v25, %s7072_s21  ;;  %5279 = vst.msk [vmem:[#allocation3 + $0x50] sm:$0xf] %vm759_vm15, %v5242_v18  ;;  %v7052_v30 = vld [vmem:[%s9518_s15] sm:$0xff]  }
0x133f   : > { %v5248_v60 = vpop.permute.xlu1 %5247 }
0x1340   : > { %5282 = vst.msk [vmem:[#allocation3 + $0x68] sm:$0xf] %vm759_vm15, %v5248_v60  ;;  %v9559_v60 = vld [vmem:[#allocation11_spill] sm:$0xff] }
0x1341   : > { %v5238_v40 = vpop.permute.xlu0 %5237 }
0x1342   : > { %5221 = vrot.lane.b32.xlu0 %v6710_v57, %s7072_s21  ;;  %5227 = vrot.lane.b32.xlu1 %v6713_v7, %s7072_s21  ;;  %5277 = vst.msk [vmem:[#allocation3 + $0x40] sm:$0xf] %vm759_vm15, %v5238_v40  ;;  %v9560_v40 = vld [vmem:[#allocation7_spill] sm:$0xff] }
0x1343   : > { %v5244_v59 = vpop.permute.xlu1 %5243  ;;  %v7028_v41 = vld [vmem:[#allocation3 + $0x70] ss:$8 sps:$4 sm:$0xff]  }
0x1344   : > { %5280 = vst.msk [vmem:[#allocation3 + $0x58] sm:$0xf] %vm759_vm15, %v5244_v59 }
0x1345   : > { %v5234_v24 = vpop.permute.xlu0 %5233 }
0x1346   : > { %5797 = vrot.lane.b32.xlu0 %v6742_v3, %s7072_s21  ;;  %5803 = vrot.lane.b32.xlu1 %v6745_v51, %s7072_s21  ;;  %5275 = vst.msk [vmem:[#allocation3 + $0x30] sm:$0xf] %vm759_vm15, %v5234_v24 }
0x1347   : > { %v5240_v1 = vpop.permute.xlu1 %5239  ;;  %v7031_v4 = vld [vmem:[#allocation3 + $0x60] ss:$8 sps:$4 sm:$0xff]  }
0x1348   : > { %5278 = vst.msk [vmem:[#allocation3 + $0x48] sm:$0xf] %vm759_vm15, %v5240_v1 }
0x134a   : > { %6048 = vperm.xlu0 %6940, %v6042_v35   ;;  %5223 = vrot.lane.b32.xlu1 %v6711_v21, %s7072_s21  ;;  %v9561_v21 = vld [vmem:[#allocation13_spill] sm:$0xff] }
0x134b   : > { %v5236_v6 = vpop.permute.xlu1 %5235  ;;  %v7034_v14 = vld [vmem:[#allocation3 + $0x50] ss:$8 sps:$4 sm:$0xff]  }
0x134c   : > { %5276 = vst.msk [vmem:[#allocation3 + $0x38] sm:$0xf] %vm759_vm15, %v5236_v6 }
0x134e   : > { %6058 = vperm.xlu0 %6940, %v6044_v16   ;;  %5799 = vrot.lane.b32.xlu1 %v6743_v48, %s7072_s21  ;;  %v9562_v48 = vld [vmem:[#allocation8_spill] sm:$0xff] }
0x134f   : > { %v7037_v58 = vld [vmem:[#allocation3 + $0x40] ss:$8 sps:$4 sm:$0xff]  }
0x1352   : > { %6053 = vperm.xlu1 %6941, %v6043_v63  }
0x1353   : > { %v7040_v31 = vld [vmem:[#allocation3 + $0x30] ss:$8 sps:$4 sm:$0xff]  }
0x1356   : > { %6063 = vperm.xlu1 %6941, %v6045_v23  }
0x1390   : > { %v5814_v15 = vpop.permute.xlu0 %5813 }
0x1391   : > { %5853 = vst.msk [vmem:[#allocation3 + $0x44] sm:$0xf] %vm759_vm15, %v5814_v15 }
0x1394   : > { %v5818_v44 = vpop.permute.xlu0 %5817 }
0x1395   : > { %5855 = vst.msk [vmem:[#allocation3 + $0x54] sm:$0xf] %vm759_vm15, %v5818_v44  ;;  %v9563_v44 = vld [vmem:[#allocation10_spill] sm:$0xff] }
0x1398   : > { %v5822_v56 = vpop.permute.xlu0 %5821  ;;  %v5816_v43 = vpop.permute.xlu1 %5815 }
0x1399   : > { %5857 = vst.msk [vmem:[#allocation3 + $0x64] sm:$0xf] %vm759_vm15, %v5822_v56  ;;  %5854 = vst.msk [vmem:[#allocation3 + $0x4c] sm:$0xf] %vm759_vm15, %v5816_v43 }
0x139c   : > { %v5826_v36 = vpop.permute.xlu0 %5825  ;;  %v5820_v38 = vpop.permute.xlu1 %5819 }
0x139d   : > { %5859 = vst.msk [vmem:[#allocation3 + $0x74] sm:$0xf] %vm759_vm15, %v5826_v36  ;;  %5856 = vst.msk [vmem:[#allocation3 + $0x5c] sm:$0xf] %vm759_vm15, %v5820_v38  ;;  %v9564_v38 = vld [vmem:[#allocation9_spill] sm:$0xff] }
0x13a0   : > { %v5810_v13 = vpop.permute.xlu0 %5809  ;;  %v5824_v49 = vpop.permute.xlu1 %5823  ;;  %v7039_v27 = vld [vmem:[#allocation3 + $0x44] ss:$8 sps:$4 sm:$0xff]  }
0x13a1   : > { %5851 = vst.msk [vmem:[#allocation3 + $0x34] sm:$0xf] %vm759_vm15, %v5810_v13  ;;  %5858 = vst.msk [vmem:[#allocation3 + $0x6c] sm:$0xf] %vm759_vm15, %v5824_v49 }
0x13a4   : > { %v5230_v62 = vpop.permute.xlu0 %5229  ;;  %v5828_v45 = vpop.permute.xlu1 %5827  ;;  %v7036_v11 = vld [vmem:[#allocation3 + $0x54] ss:$8 sps:$4 sm:$0xff]  }
0x13a5   : > { %5273 = vst.msk [vmem:[#allocation3 + $0x20] sm:$0xf] %vm759_vm15, %v5230_v62  ;;  %5860 = vst.msk [vmem:[#allocation3 + $0x7c] sm:$0xf] %vm759_vm15, %v5828_v45 }
0x13a8   : > { %v5806_v39 = vpop.permute.xlu0 %5805  ;;  %v5812_v22 = vpop.permute.xlu1 %5811  ;;  %v7033_v17 = vld [vmem:[#allocation3 + $0x64] ss:$8 sps:$4 sm:$0xff]  }
0x13a9   : > { %5849 = vst.msk [vmem:[#allocation3 + $0x24] sm:$0xf] %vm759_vm15, %v5806_v39  ;;  %5852 = vst.msk [vmem:[#allocation3 + $0x3c] sm:$0xf] %vm759_vm15, %v5812_v22  ;;  %v9565_v39 = vld [vmem:[#allocation12_spill] sm:$0xff] }
0x13ac   : > { %v5226_v53 = vpop.permute.xlu0 %5225  ;;  %v5232_v52 = vpop.permute.xlu1 %5231  ;;  %v7030_v42 = vld [vmem:[#allocation3 + $0x74] ss:$8 sps:$4 sm:$0xff]  }
0x13ad   : > { %5271 = vst.msk [vmem:[#allocation3 + $0x10] sm:$0xf] %vm759_vm15, %v5226_v53  ;;  %5274 = vst.msk [vmem:[#allocation3 + $0x28] sm:$0xf] %vm759_vm15, %v5232_v52  ;;  %5981 = vmatprep.subr.bf16.mxu0 %v7030_v42 }
0x13ae   : > { %5982 = vmatpush1.bf16.msra.mxu0 %v7028_v41 }
0x13af   : > { %5983 = vmatprep.subr.bf16.mxu0 %v7033_v17 }
0x13b0   : > { %v5802_v47 = vpop.permute.xlu0 %5801  ;;  %v5808_v32 = vpop.permute.xlu1 %5807  ;;  %v7042_v28 = vld [vmem:[#allocation3 + $0x34] ss:$8 sps:$4 sm:$0xff]  }
0x13b1   : > { %5847 = vst.msk [vmem:[#allocation3 + $0x14] sm:$0xf] %vm759_vm15, %v5802_v47  ;;  %5850 = vst.msk [vmem:[#allocation3 + $0x2c] sm:$0xf] %vm759_vm15, %v5808_v32 }
0x13b2   : > { %5984 = vmatpush1.bf16.msra.mxu0 %v7031_v4 }
0x13b3   : > { %5985 = vmatprep.subr.bf16.mxu0 %v7036_v11 }
0x13b4   : > { %v5222_v34 = vpop.permute.xlu0 %5221  ;;  %v5228_v55 = vpop.permute.xlu1 %5227  ;;  %v7043_v26 = vld [vmem:[#allocation3 + $0x20] ss:$8 sps:$4 sm:$0xff]  }
0x13b5   : > { %5269 = vst.msk [vmem:[#allocation3] sm:$0xf] %vm759_vm15, %v5222_v34  ;;  %5272 = vst.msk [vmem:[#allocation3 + $0x18] sm:$0xf] %vm759_vm15, %v5228_v55 }
0x13b6   : > { %5986 = vmatpush1.bf16.msra.mxu0 %v7034_v14 }
0x13b7   : > { %5987 = vmatprep.subr.bf16.mxu0 %v7039_v27 }
0x13b8   : > { %v5798_v19 = vpop.permute.xlu0 %5797  ;;  %v5804_v54 = vpop.permute.xlu1 %5803  ;;  %v7045_v9 = vld [vmem:[#allocation3 + $0x24] ss:$8 sps:$4 sm:$0xff]  }
0x13b9   : > { %5845 = vst.msk [vmem:[#allocation3 + $0x4] sm:$0xf] %vm759_vm15, %v5798_v19  ;;  %5848 = vst.msk [vmem:[#allocation3 + $0x1c] sm:$0xf] %vm759_vm15, %v5804_v54 }
0x13ba   : > { %5988 = vmatpush1.bf16.msra.mxu0 %v7037_v58 }
0x13bb   : > { %5989 = vmatprep.subr.bf16.mxu0 %v7042_v28 }
0x13bc   : > { %v5224_v46 = vpop.permute.xlu1 %5223  ;;  %v7046_v33 = vld [vmem:[#allocation3 + $0x10] ss:$8 sps:$4 sm:$0xff]  }
0x13bd   : > { %5270 = vst.msk [vmem:[#allocation3 + $0x8] sm:$0xf] %vm759_vm15, %v5224_v46 }
0x13be   : > { %5990 = vmatpush1.bf16.msra.mxu0 %v7040_v31 }
0x13bf   : > { %5991 = vmatprep.subr.bf16.mxu0 %v7045_v9 }
0x13c0   : > { %v5800_v2 = vpop.permute.xlu1 %5799  ;;  %v7048_v50 = vld [vmem:[#allocation3 + $0x14] ss:$8 sps:$4 sm:$0xff]  }
0x13c1   : > { %5846 = vst.msk [vmem:[#allocation3 + $0xc] sm:$0xf] %vm759_vm15, %v5800_v2 }
0x13c2   : > { %5992 = vmatpush1.bf16.msra.mxu0 %v7043_v26 }
0x13c3   : > { %5993 = vmatprep.subr.bf16.mxu0 %v7048_v50 }
0x13c4   : > { %v7049_v61 = vld [vmem:[#allocation3] ss:$8 sps:$4 sm:$0xff]  }
0x13c5   : > { %v6049_v18 = vpop.permute.xlu0 %6048 }
0x13c6   : > { %5994 = vmatpush1.bf16.msra.mxu0 %v7046_v33 }
0x13c8   : > { %v7051_v8 = vld [vmem:[#allocation3 + $0x4] ss:$8 sps:$4 sm:$0xff]  }
0x13c9   : > { %5995 = vmatprep.subr.bf16.mxu0 %v7051_v8  ;;  %v6059_v63 = vpop.permute.xlu0 %6058 }
0x13ca   : > { %5996 = vmatpush1.bf16.msra.mxu0 %v7049_v61 }
0x13cd   : > { %6014 = vmatmul.mubr.bf16.vlgmr.msra.gmra.mxu0 %v7052_v30  ;;  %v6054_v59 = vpop.permute.xlu1 %6053 }
0x13ce   : > { %6023 = vmatprep.mubr.bf16.mxu0 %v9556_v5 }
0x13d1   : > { %v6064_v49 = vpop.permute.xlu1 %6063 }
0x13d5   : > { %6024 = vmatmul.mubr.bf16.gmra.mxu0 %v7053_v29 }
0x148d   : > { %v6015_v25 = vpop.f32.mrf.mxu0 }
0x148e   : > { %v6034_v57 = vadd.f32 %v6015_v25, %v9557_v20 }
0x148f   : > { %v6017_v37 = vpop.f32.mrf.mxu0 }
0x1490   : > { %v6066_v7 = vadd.f32 %v6049_v18, %v6034_v57  ;;  %v6035_v0 = vadd.f32 %v6017_v37, %v9559_v60 }
0x1491   : > { %v6019_v3 = vpop.f32.mrf.mxu0 }
0x1492   : > { %6074 = vst [vmem:[%s9483_s28] sm:$0xff] %v6066_v7  ;;  %v6067_v12 = vadd.f32 %v6049_v18, %v6035_v0  ;;  %v6036_v51 = vadd.f32 %v6019_v3, %v9560_v40 }
0x1493   : > { %v6021_v35 = vpop.f32.mrf.mxu0 }
0x1494   : > { %6075 = vst [vmem:[%s9483_s28 + $0x8] sm:$0xff] %v6067_v12  ;;  %v6068_v24 = vadd.f32 %v6054_v59, %v6036_v51  ;;  %v6037_v1 = vadd.f32 %v6021_v35, %v9561_v21 }
0x1495   : > { %v6025_v10 = vpop.f32.mrf.mxu0 }
0x1496   : > { %6076 = vst [vmem:[%s9483_s28 + $0x10] sm:$0xff] %v6068_v24  ;;  %v6069_v16 = vadd.f32 %v6054_v59, %v6037_v1  ;;  %v6038_v6 = vadd.f32 %v6025_v10, %v9562_v48 }
0x1497   : > { %v6027_v23 = vpop.f32.mrf.mxu0 }
0x1498   : > { %6077 = vst [vmem:[%s9483_s28 + $0x18] sm:$0xff] %v6069_v16  ;;  %v6070_v15 = vadd.f32 %v6059_v63, %v6038_v6  ;;  %v6039_v56 = vadd.f32 %v6027_v23, %v9563_v44 }
0x1499   : > { %v6029_v43 = vpop.f32.mrf.mxu0 }
0x149a   : > { %6078 = vst [vmem:[%s9483_s28 + $0x20] sm:$0xff] %v6070_v15  ;;  %v6071_v36 = vadd.f32 %v6059_v63, %v6039_v56  ;;  %v6040_v13 = vadd.f32 %v6029_v43, %v9564_v38 }
0x149b   : > { %v6031_v62 = vpop.f32.mrf.mxu0 }
0x149c   : > { %6079 = vst [vmem:[%s9483_s28 + $0x28] sm:$0xff] %v6071_v36  ;;  %v6072_v45 = vadd.f32 %v6064_v49, %v6040_v13  ;;  %v6041_v22 = vadd.f32 %v6031_v62, %v9565_v39 }
0x149e   : > { %6080 = vst [vmem:[%s9483_s28 + $0x30] sm:$0xff] %v6072_v45  ;;  %v6073_v53 = vadd.f32 %v6064_v49, %v6041_v22 }
0x14a0   : > { %6081 = vst [vmem:[%s9483_s28 + $0x38] sm:$0xff] %v6073_v53 }
0x14a1 PF: > { %s27_s24 = sadd.s32 1, %s7068_s24  }
0x14a2   : > { %p24_p4 = scmp.ge.s32.totalorder %s27_s24, 4  }
0x14a4   :  { %26 = sbr.rel (!%p24_p4) target bundleno = 3 (0x3), region = 118 }

</bundles_post_ra>
